<compile_context>
chip_gen: v6e
topology: v6e:2x2x1
jax: 0.10.0
libtpu: 0.0.40
codegen_flags: <defaults>
</compile_context>

<pallas_src>
import functools

import jax
import jax.numpy as jnp
from jax.experimental import pallas as pl
from jax.experimental.pallas import tpu as pltpu


_ROW_GRAN = 32   # row-tile granularity: satisfies f32(8)/bf16(16)/int8(32) sublane packing


def _round_up(x, m):
    return (x + m - 1) // m * m


def _tpu_budget():
    """(vmem_limit_bytes, default row tile) picked per TPU generation."""
    try:
        cap = int(pltpu.get_tpu_info().vmem_capacity_bytes)
    except Exception:
        cap = 128 * 1024 * 1024
    if cap <= 64 * 1024 * 1024:            # v7x: 64 MiB per TensorCore
        return 44 * 1024 * 1024, 256
    return 100 * 1024 * 1024, 512          # v5e / v6e: 128 MiB


def _choose_tiles(n, target_tm):
    """Padded node count + row tile: tile divides n_pad, multiple of 32, >=2 tiles."""
    tm = max(_ROW_GRAN, (min(target_tm, max(n, _ROW_GRAN)) // _ROW_GRAN) * _ROW_GRAN)
    n_pad = _round_up(n, tm)
    while n_pad // tm < 2 and tm > _ROW_GRAN:      # keep both v7x TensorCores busy
        tm = max(_ROW_GRAN, ((tm // 2) // _ROW_GRAN) * _ROW_GRAN)
        n_pad = _round_up(n, tm)
    if n_pad // tm < 2:                            # tiny graphs: pad (rows are masked)
        n_pad = 2 * tm
    return n_pad, tm


# ----------------------------------------------------------------------------
# Kernel 1: fused node projection + per-node attention scalars (one matmul)
# ----------------------------------------------------------------------------
def project_kernel(x_ref, w_ref, h_ref, a_ref, *, hc):
    # y = x @ [W | W@A_src | W@A_dst]   -> [TM, H*C + 2H]   (single MXU op)
    y = jnp.dot(x_ref[...], w_ref[...], preferred_element_type=jnp.float32)
    h_ref[...] = y[:, :hc].astype(jnp.bfloat16)   # bf16 h: halves HBM + resident VMEM
    a_ref[...] = y[:, hc:]                        # [TM, 2H] f32 (a_src | a_dst)


def gat_project(x, w_full, hc, *, tm, vmem_limit):
    n, f = x.shape
    tot = w_full.shape[1]
    ah = tot - hc
    return pl.pallas_call(
        functools.partial(project_kernel, hc=hc),
        grid=(n // tm,),
        in_specs=[pl.BlockSpec((tm, f), lambda i: (i, 0)),
                  pl.BlockSpec((f, tot), lambda i: (0, 0))],
        out_specs=[pl.BlockSpec((tm, hc), lambda i: (i, 0)),
                   pl.BlockSpec((tm, ah), lambda i: (i, 0))],
        out_shape=[jax.ShapeDtypeStruct((n, hc), jnp.bfloat16),
                   jax.ShapeDtypeStruct((n, ah), jnp.float32)],
        compiler_params=pltpu.CompilerParams(
            dimension_semantics=("parallel",),
            vmem_limit_bytes=vmem_limit),
    )(x, w_full)


# ----------------------------------------------------------------------------
# Kernel 2: row-tiled masked-softmax attention + per-head aggregation
# ----------------------------------------------------------------------------
def gat_attn_kernel(h_ref, asrc_ref, adst_ref, adj_ref, *rest,
                    heads, out_ch, concat, has_edge, relu_residual):
    idx = 0
    elog_ref = None
    if has_edge:
        elog_ref = rest[idx]; idx += 1
    bias_ref = rest[idx]; idx += 1
    res_ref = None
    if relu_residual:
        res_ref = rest[idx]; idx += 1
    out_ref = rest[idx]

    adj = adj_ref[...] > 0            # [TM, N] edge mask from compact bf16 {0,1} stream
    a_dst = adst_ref[...]             # [TM, H] f32 (tiny)
    a_src = asrc_ref[...]             # [H, N]  f32 (grid-invariant / resident)

    ohs = []
    for hd in range(heads):
        # logits[i, j] = a_dst[i] + a_src[j] (+ edge logit)
        logits = a_dst[:, hd:hd + 1] + a_src[hd:hd + 1, :]          # [TM, N]
        if has_edge:
            logits = logits + elog_ref[hd].astype(jnp.float32)      # bf16 edge logits
        logits = jnp.where(logits > 0, logits, 0.2 * logits)        # LeakyReLU(0.2)
        logits = jnp.where(adj, logits, -1e30)                      # mask non-edges (exact)
        m = jnp.max(logits, axis=-1, keepdims=True)
        p = jnp.exp(logits - m)                                     # EUP
        l = jnp.sum(p, axis=-1, keepdims=True)
        # per-head aggregation: bf16 MXU matmul with f32 accumulate.
        hr = h_ref[:, hd * out_ch:(hd + 1) * out_ch]                # ref slice, [N, C] bf16
        oh = jnp.dot(p.astype(jnp.bfloat16), hr,
                     preferred_element_type=jnp.float32)            # [TM, C]
        ohs.append(oh * pl.reciprocal(l, approx=True))

    bias = bias_ref[...]                                            # [1, out_dim]
    if concat:
        result = jnp.concatenate(ohs, axis=-1) + bias               # single lane-dense store
        if relu_residual:
            result = jnp.maximum(result, 0.0) + res_ref[...]        # fused SKIPGAT epilogue
        out_ref[...] = result
    else:
        acc = ohs[0]
        for oh in ohs[1:]:
            acc = acc + oh
        out_ref[...] = acc * (1.0 / heads) + bias                   # head-mean (concat=False)


def gat_attention(h, a_src_t, a_dst, adj, elog, bias, *, concat, residual,
                  tm, vmem_limit):
    n, hc = h.shape
    heads = a_src_t.shape[0]
    out_ch = hc // heads
    out_dim = hc if concat else out_ch
    has_edge = elog is not None
    relu_residual = residual is not None

    in_specs = [
        pl.BlockSpec((n, hc), lambda i: (0, 0)),            # h (resident, bf16)
        pl.BlockSpec((heads, n), lambda i: (0, 0)),         # a_src^T (resident)
        pl.BlockSpec((tm, heads), lambda i: (i, 0)),        # a_dst row tile
        pl.BlockSpec((tm, n), lambda i: (i, 0)),            # adjacency row tile (bf16)
    ]
    operands = [h, a_src_t, a_dst, adj]
    if has_edge:
        in_specs.append(pl.BlockSpec((heads, tm, n), lambda i: (0, i, 0)))
        operands.append(elog)                               # bf16 edge logits row tile
    in_specs.append(pl.BlockSpec((1, out_dim), lambda i: (0, 0)))
    operands.append(bias.reshape(1, -1))
    if relu_residual:
        in_specs.append(pl.BlockSpec((tm, out_dim), lambda i: (i, 0)))
        operands.append(residual)

    kernel = functools.partial(gat_attn_kernel, heads=heads, out_ch=out_ch,
                               concat=concat, has_edge=has_edge,
                               relu_residual=relu_residual)
    return pl.pallas_call(
        kernel,
        grid=(n // tm,),
        in_specs=in_specs,
        out_specs=pl.BlockSpec((tm, out_dim), lambda i: (i, 0)),
        out_shape=jax.ShapeDtypeStruct((n, out_dim), jnp.float32),
        compiler_params=pltpu.CompilerParams(
            dimension_semantics=("parallel",),
            vmem_limit_bytes=vmem_limit),
    )(*operands)


# ----------------------------------------------------------------------------
# JAX glue: params, weight folding, graph densification, layer stacking
# ----------------------------------------------------------------------------
def init_gatconv_params(key, in_ch, out_ch, heads, edge_dim=None):
    ks = jax.random.split(key, 6)
    scale = lambda fan: 1.0 / jnp.sqrt(jnp.float32(fan))
    p = {
        "w": jax.random.normal(ks[0], (in_ch, heads * out_ch), jnp.float32) * scale(in_ch),
        "att_src": jax.random.normal(ks[1], (heads, out_ch), jnp.float32) * scale(out_ch),
        "att_dst": jax.random.normal(ks[2], (heads, out_ch), jnp.float32) * scale(out_ch),
        "bias": jnp.zeros((heads * out_ch,), jnp.float32),
    }
    if edge_dim is not None:
        p["w_edge"] = jax.random.normal(ks[3], (edge_dim, heads * out_ch), jnp.float32) * scale(edge_dim)
        p["att_edge"] = jax.random.normal(ks[4], (heads, out_ch), jnp.float32) * scale(out_ch)
    return p


def build_att_fold(w, att_src, att_dst):
    """[F, H*C + 2H]: one matmul yields h | a_src | a_dst (folds att maps into W)."""
    f = w.shape[0]
    heads, out_ch = att_src.shape
    w3 = w.reshape(f, heads, out_ch)
    a_src_w = jnp.einsum('fhc,hc->fh', w3, att_src)   # [F, H]
    a_dst_w = jnp.einsum('fhc,hc->fh', w3, att_dst)   # [F, H]
    return jnp.concatenate([w, a_src_w, a_dst_w], axis=1)


def build_adjacency(edge_index, n_pad):
    """bf16 {0,1} adjacency [N_pad, N_pad] incl. self loops (PyG add_self_loops)."""
    src, dst = edge_index[0], edge_index[1]
    adj = jnp.zeros((n_pad, n_pad), jnp.float32).at[dst, src].set(1.0)
    diag = jnp.arange(n_pad)
    adj = adj.at[diag, diag].set(1.0)        # also keeps padded rows finite
    return adj.astype(jnp.bfloat16)


def build_edge_logits(edge_attr, edge_index, w_edge, att_edge, n_pad):
    """bf16 [H, N_pad, N_pad] edge-attention logits (0 on non-edges, masked in-kernel)."""
    heads, out_ch = att_edge.shape
    e_dim = edge_attr.shape[1]
    fold = (w_edge.reshape(e_dim, heads, out_ch) * att_edge[None]).sum(-1)   # [E_dim, H]
    e_alpha = edge_attr @ fold                                               # [E, H]
    self_alpha = edge_attr.mean(axis=0) @ fold                               # [H] fill='mean'
    src, dst = edge_index[0], edge_index[1]
    elog = jnp.zeros((heads, n_pad, n_pad), jnp.float32)
    elog = elog.at[:, dst, src].set(e_alpha.T)
    diag = jnp.arange(n_pad)
    elog = elog.at[:, diag, diag].set(self_alpha[:, None])
    return elog.astype(jnp.bfloat16)


def gat_conv_layer(x, params, adj, elog, *, concat, residual, tm, vmem_limit):
    heads = params["att_src"].shape[0]
    hc = params["w"].shape[1]
    w_full = build_att_fold(params["w"], params["att_src"], params["att_dst"])
    h, a = gat_project(x, w_full, hc, tm=tm, vmem_limit=vmem_limit)
    a_src_t = a[:, :heads].T          # [H, N]
    a_dst = a[:, heads:]              # [N, H]
    return gat_attention(h, a_src_t, a_dst, adj, elog, params["bias"],
                         concat=concat, residual=residual, tm=tm,
                         vmem_limit=vmem_limit)


def gat_forward(params, x, edge_index, edge_attr, *, tile_m=None):
    n = x.shape[0]
    vmem_limit, default_tm = _tpu_budget()
    n_pad, tm = _choose_tiles(n, tile_m if tile_m is not None else default_tm)

    x_pad = jnp.zeros((n_pad, x.shape[1]), jnp.float32).at[:n].set(x.astype(jnp.float32))
    adj = build_adjacency(edge_index, n_pad)                 # shared by all layers

    # initial_conv (edge attributes)
    p = params["initial"]
    elog = build_edge_logits(edge_attr, edge_index, p["w_edge"], p["att_edge"], n_pad)
    hidden = gat_conv_layer(x_pad, p, adj, elog, concat=True, residual=None,
                            tm=tm, vmem_limit=vmem_limit)

    # skipgat1 (edge attributes) — relu + residual fused in the kernel epilogue
    p = params["skip1"]
    elog = build_edge_logits(edge_attr, edge_index, p["w_edge"], p["att_edge"], n_pad)
    hidden = gat_conv_layer(hidden, p, adj, elog, concat=True, residual=hidden,
                            tm=tm, vmem_limit=vmem_limit)

    # skipgat2..4 — no edge attributes: only the compact bf16 adjacency streams
    for name in ("skip2", "skip3", "skip4"):
        hidden = gat_conv_layer(hidden, params[name], adj, None, concat=True,
                                residual=hidden, tm=tm, vmem_limit=vmem_limit)

    # mean_conv: concat=False -> average heads, output [N, out_ch]
    out = gat_conv_layer(hidden, params["mean"], adj, None, concat=False,
                         residual=None, tm=tm, vmem_limit=vmem_limit)
    return out[:n]


if __name__ == "__main__":
    # Small synthetic graph consistent with the module's forward signature.
    N = 16
    NODE_FEATURES = 8
    EDGE_FEATURES = 4
    EMB_REDUCED = 8
    HEADS = 4
    TILE_M = 32                # forces a 2-tile row grid on the toy (padded) graph

    key = jax.random.PRNGKey(0)
    k_x, k_e, k_p = jax.random.split(key, 3)

    x = jax.random.normal(k_x, (N, NODE_FEATURES), jnp.float32)

    # deterministic ring + chords graph (no self loops, no duplicate edges)
    base = jnp.arange(N, dtype=jnp.int32)
    src = jnp.concatenate([base, base, base])
    dst = jnp.concatenate([(base + 1) % N, (base + 4) % N, (base + 7) % N])
    edge_index = jnp.stack([src, dst])                      # [2, 48]
    edge_attr = jax.random.normal(k_e, (edge_index.shape[1], EDGE_FEATURES),
                                  jnp.float32)

    pk = jax.random.split(k_p, 6)
    hidden_dim = EMB_REDUCED * HEADS
    params = {
        "initial": init_gatconv_params(pk[0], NODE_FEATURES, EMB_REDUCED, HEADS,
                                       edge_dim=EDGE_FEATURES),
        "skip1": init_gatconv_params(pk[1], hidden_dim, EMB_REDUCED, HEADS,
                                     edge_dim=EDGE_FEATURES),
        "skip2": init_gatconv_params(pk[2], hidden_dim, EMB_REDUCED, HEADS),
        "skip3": init_gatconv_params(pk[3], hidden_dim, EMB_REDUCED, HEADS),
        "skip4": init_gatconv_params(pk[4], hidden_dim, EMB_REDUCED, HEADS),
        "mean": init_gatconv_params(pk[5], hidden_dim, EMB_REDUCED, HEADS),
    }
    # mean_conv: concat=False -> bias has size EMB_REDUCED
    params["mean"]["bias"] = jnp.zeros((EMB_REDUCED,), jnp.float32)

    forward = jax.jit(functools.partial(gat_forward, tile_m=TILE_M))
    out = forward(params, x, edge_index, edge_attr)
    out = jax.block_until_ready(out)
    assert out.shape == (N, EMB_REDUCED), out.shape
    assert bool(jnp.all(jnp.isfinite(out)))
    print("KERNEL_OK")
</pallas_src>

<mosaic_0001>
module attributes {stable_mosaic.version = 11 : i64} {
  func.func @project_kernel(%arg0: i32, %arg1: memref<32x8xf32, #tpu.memory_space<vmem>>, %arg2: memref<8x40xf32, #tpu.memory_space<vmem>>, %arg3: memref<32x32xbf16, #tpu.memory_space<vmem>>, %arg4: memref<32x8xf32, #tpu.memory_space<vmem>>) attributes {dimension_semantics = [#tpu.dimension_semantics<parallel>], iteration_bounds = array<i64: 2>, scalar_prefetch = 0 : i64, scratch_operands = 0 : i64, tpu.core_type = #tpu.core_type<tc>, window_params = [{transform_indices = @transform_0, window_bounds = array<i64: 32, 8>}, {pipeline_mode = #tpu.pipeline_mode<synchronous>, transform_indices = @transform_1, window_bounds = array<i64: 8, 40>}, {transform_indices = @transform_2, window_bounds = array<i64: 32, 32>}, {transform_indices = @transform_3, window_bounds = array<i64: 32, 8>}]} {
    %c0 = arith.constant 0 : index
    %c0_0 = arith.constant 0 : index
    %0 = vector.load %arg1[%c0, %c0_0] : memref<32x8xf32, #tpu.memory_space<vmem>>, vector<32x8xf32>
    %c0_1 = arith.constant 0 : index
    %c0_2 = arith.constant 0 : index
    %1 = vector.load %arg2[%c0_1, %c0_2] : memref<8x40xf32, #tpu.memory_space<vmem>>, vector<8x40xf32>
    %cst = arith.constant dense<0.000000e+00> : vector<32x40xf32>
    %2 = tpu.matmul %0, %1, %cst {dimension_numbers = #tpu.dot_dimension_numbers<[1], [0], [0], [1], [0, 0, 1, 1], [], []>} : vector<32x8xf32>, vector<8x40xf32>, vector<32x40xf32> -> vector<32x40xf32>
    %3 = vector.extract_strided_slice %2 {offsets = [0, 0], sizes = [32, 32], strides = [1, 1]} : vector<32x40xf32> to vector<32x32xf32>
    %4 = arith.truncf %3 : vector<32x32xf32> to vector<32x32xbf16>
    %c0_3 = arith.constant 0 : index
    %c0_4 = arith.constant 0 : index
    %5 = vector.load %arg3[%c0_3, %c0_4] : memref<32x32xbf16, #tpu.memory_space<vmem>>, vector<32x32xbf16>
    tpu.vector_store %arg3[%c0_3, %c0_4], %4 {strides = array<i32>} : memref<32x32xbf16, #tpu.memory_space<vmem>>, vector<32x32xbf16>,
    %6 = vector.extract_strided_slice %2 {offsets = [0, 32], sizes = [32, 8], strides = [1, 1]} : vector<32x40xf32> to vector<32x8xf32>
    %c0_5 = arith.constant 0 : index
    %c0_6 = arith.constant 0 : index
    %7 = vector.load %arg4[%c0_5, %c0_6] : memref<32x8xf32, #tpu.memory_space<vmem>>, vector<32x8xf32>
    tpu.vector_store %arg4[%c0_5, %c0_6], %6 {strides = array<i32>} : memref<32x8xf32, #tpu.memory_space<vmem>>, vector<32x8xf32>,
    return
  }
  func.func @transform_0(%arg0: i32) -> (i32, i32) {
    %c0_i32 = arith.constant 0 : i32
    %c0_i32_0 = arith.constant 0 : i32
    return %arg0, %c0_i32 : i32, i32
  }
  func.func @transform_1(%arg0: i32) -> (i32, i32) {
    %c0_i32 = arith.constant 0 : i32
    %c0_i32_0 = arith.constant 0 : i32
    %c0_i32_1 = arith.constant 0 : i32
    return %c0_i32, %c0_i32_0 : i32, i32
  }
  func.func @transform_2(%arg0: i32) -> (i32, i32) {
    %c0_i32 = arith.constant 0 : i32
    %c0_i32_0 = arith.constant 0 : i32
    return %arg0, %c0_i32 : i32, i32
  }
  func.func @transform_3(%arg0: i32) -> (i32, i32) {
    %c0_i32 = arith.constant 0 : i32
    %c0_i32_0 = arith.constant 0 : i32
    return %arg0, %c0_i32 : i32, i32
  }
}

module attributes {stable_mosaic.version = 11 : i64} {
  func.func @gat_attn_kernel(%arg0: i32, %arg1: memref<64x32xbf16, #tpu.memory_space<vmem>>, %arg2: memref<4x64xf32, #tpu.memory_space<vmem>>, %arg3: memref<32x4xf32, #tpu.memory_space<vmem>>, %arg4: memref<32x64xbf16, #tpu.memory_space<vmem>>, %arg5: memref<4x32x64xbf16, #tpu.memory_space<vmem>>, %arg6: memref<1x32xf32, #tpu.memory_space<vmem>>, %arg7: memref<32x32xf32, #tpu.memory_space<vmem>>) attributes {dimension_semantics = [#tpu.dimension_semantics<parallel>], iteration_bounds = array<i64: 2>, scalar_prefetch = 0 : i64, scratch_operands = 0 : i64, tpu.core_type = #tpu.core_type<tc>, window_params = [{pipeline_mode = #tpu.pipeline_mode<synchronous>, transform_indices = @transform_0, window_bounds = array<i64: 64, 32>}, {pipeline_mode = #tpu.pipeline_mode<synchronous>, transform_indices = @transform_1, window_bounds = array<i64: 4, 64>}, {transform_indices = @transform_2, window_bounds = array<i64: 32, 4>}, {transform_indices = @transform_3, window_bounds = array<i64: 32, 64>}, {transform_indices = @transform_4, window_bounds = array<i64: 4, 32, 64>}, {pipeline_mode = #tpu.pipeline_mode<synchronous>, transform_indices = @transform_5, window_bounds = array<i64: 1, 32>}, {transform_indices = @transform_6, window_bounds = array<i64: 32, 32>}]} {
    %c0 = arith.constant 0 : index
    %c0_0 = arith.constant 0 : index
    %0 = vector.load %arg4[%c0, %c0_0] : memref<32x64xbf16, #tpu.memory_space<vmem>>, vector<32x64xbf16>
    %cst = arith.constant 0.000000e+00 : bf16
    %1 = vector.broadcast %cst : bf16 to vector<32x64xbf16>
    %2 = arith.cmpf ogt, %0, %1 : vector<32x64xbf16>
    %c0_1 = arith.constant 0 : index
    %c0_2 = arith.constant 0 : index
    %3 = vector.load %arg3[%c0_1, %c0_2] : memref<32x4xf32, #tpu.memory_space<vmem>>, vector<32x4xf32>
    %c0_3 = arith.constant 0 : index
    %c0_4 = arith.constant 0 : index
    %4 = vector.load %arg2[%c0_3, %c0_4] : memref<4x64xf32, #tpu.memory_space<vmem>>, vector<4x64xf32>
    %5 = vector.extract_strided_slice %3 {offsets = [0, 0], sizes = [32, 1], strides = [1, 1]} : vector<32x4xf32> to vector<32x1xf32>
    %6 = vector.extract_strided_slice %4 {offsets = [0, 0], sizes = [1, 64], strides = [1, 1]} : vector<4x64xf32> to vector<1x64xf32>
    %7 = vector.broadcast %5 : vector<32x1xf32> to vector<32x64xf32>
    %8 = vector.broadcast %6 : vector<1x64xf32> to vector<32x64xf32>
    %9 = arith.addf %7, %8 : vector<32x64xf32>
    %c0_5 = arith.constant 0 : index
    %c0_6 = arith.constant 0 : index
    %c0_7 = arith.constant 0 : index
    %10 = vector.load %arg5[%c0_5, %c0_6, %c0_7] : memref<4x32x64xbf16, #tpu.memory_space<vmem>>, vector<1x32x64xbf16>
    %11 = vector.shape_cast %10 : vector<1x32x64xbf16> to vector<32x64xbf16>
    %12 = arith.extf %11 : vector<32x64xbf16> to vector<32x64xf32>
    %13 = arith.addf %9, %12 : vector<32x64xf32>
    %cst_8 = arith.constant 0.000000e+00 : f32
    %14 = vector.broadcast %cst_8 : f32 to vector<32x64xf32>
    %15 = arith.cmpf ogt, %13, %14 : vector<32x64xf32>
    %cst_9 = arith.constant 2.000000e-01 : f32
    %16 = vector.broadcast %cst_9 : f32 to vector<32x64xf32>
    %17 = arith.mulf %16, %13 : vector<32x64xf32>
    %18 = arith.select %15, %13, %17 : vector<32x64xi1>, vector<32x64xf32>
    %cst_10 = arith.constant -1.000000e+30 : f32
    %19 = vector.broadcast %cst_10 : f32 to vector<32x64xf32>
    %20 = arith.select %2, %18, %19 : vector<32x64xi1>, vector<32x64xf32>
    %cst_11 = arith.constant dense<0xFF800000> : vector<32xf32>
    %21 = vector.multi_reduction <maximumf>, %20, %cst_11 [1] : vector<32x64xf32> to vector<32xf32>
    %22 = vector.shape_cast %21 : vector<32xf32> to vector<32x1xf32>
    %23 = vector.broadcast %22 : vector<32x1xf32> to vector<32x64xf32>
    %24 = arith.subf %20, %23 : vector<32x64xf32>
    %25 = math.exp %24 : vector<32x64xf32>
    %cst_12 = arith.constant dense<0.000000e+00> : vector<32xf32>
    %26 = vector.multi_reduction <add>, %25, %cst_12 [1] : vector<32x64xf32> to vector<32xf32>
    %27 = vector.shape_cast %26 : vector<32xf32> to vector<32x1xf32>
    %c0_13 = arith.constant 0 : index
    %c0_14 = arith.constant 0 : index
    %28 = vector.load %arg1[%c0_13, %c0_14] : memref<64x32xbf16, #tpu.memory_space<vmem>>, vector<64x8xbf16>
    %29 = arith.truncf %25 : vector<32x64xf32> to vector<32x64xbf16>
    %cst_15 = arith.constant dense<0.000000e+00> : vector<32x8xf32>
    %30 = tpu.matmul %29, %28, %cst_15 {dimension_numbers = #tpu.dot_dimension_numbers<[1], [0], [0], [1], [0, 0, 1, 1], [], []>} : vector<32x64xbf16>, vector<64x8xbf16>, vector<32x8xf32> -> vector<32x8xf32>
    %31 = tpu.reciprocal %27 {approx = true} : vector<32x1xf32> -> vector<32x1xf32>
    %32 = vector.broadcast %31 : vector<32x1xf32> to vector<32x8xf32>
    %33 = arith.mulf %30, %32 : vector<32x8xf32>
    %34 = vector.extract_strided_slice %3 {offsets = [0, 1], sizes = [32, 1], strides = [1, 1]} : vector<32x4xf32> to vector<32x1xf32>
    %35 = vector.extract_strided_slice %4 {offsets = [1, 0], sizes = [1, 64], strides = [1, 1]} : vector<4x64xf32> to vector<1x64xf32>
    %36 = vector.broadcast %34 : vector<32x1xf32> to vector<32x64xf32>
    %37 = vector.broadcast %35 : vector<1x64xf32> to vector<32x64xf32>
    %38 = arith.addf %36, %37 : vector<32x64xf32>
    %c1 = arith.constant 1 : index
    %c0_16 = arith.constant 0 : index
    %c0_17 = arith.constant 0 : index
    %39 = vector.load %arg5[%c1, %c0_16, %c0_17] : memref<4x32x64xbf16, #tpu.memory_space<vmem>>, vector<1x32x64xbf16>
    %40 = vector.shape_cast %39 : vector<1x32x64xbf16> to vector<32x64xbf16>
    %41 = arith.extf %40 : vector<32x64xbf16> to vector<32x64xf32>
    %42 = arith.addf %38, %41 : vector<32x64xf32>
    %cst_18 = arith.constant 0.000000e+00 : f32
    %43 = vector.broadcast %cst_18 : f32 to vector<32x64xf32>
    %44 = arith.cmpf ogt, %42, %43 : vector<32x64xf32>
    %cst_19 = arith.constant 2.000000e-01 : f32
    %45 = vector.broadcast %cst_19 : f32 to vector<32x64xf32>
    %46 = arith.mulf %45, %42 : vector<32x64xf32>
    %47 = arith.select %44, %42, %46 : vector<32x64xi1>, vector<32x64xf32>
    %cst_20 = arith.constant -1.000000e+30 : f32
    %48 = vector.broadcast %cst_20 : f32 to vector<32x64xf32>
    %49 = arith.select %2, %47, %48 : vector<32x64xi1>, vector<32x64xf32>
    %cst_21 = arith.constant dense<0xFF800000> : vector<32xf32>
    %50 = vector.multi_reduction <maximumf>, %49, %cst_21 [1] : vector<32x64xf32> to vector<32xf32>
    %51 = vector.shape_cast %50 : vector<32xf32> to vector<32x1xf32>
    %52 = vector.broadcast %51 : vector<32x1xf32> to vector<32x64xf32>
    %53 = arith.subf %49, %52 : vector<32x64xf32>
    %54 = math.exp %53 : vector<32x64xf32>
    %cst_22 = arith.constant dense<0.000000e+00> : vector<32xf32>
    %55 = vector.multi_reduction <add>, %54, %cst_22 [1] : vector<32x64xf32> to vector<32xf32>
    %56 = vector.shape_cast %55 : vector<32xf32> to vector<32x1xf32>
    %c0_23 = arith.constant 0 : index
    %c8 = arith.constant 8 : index
    %57 = vector.load %arg1[%c0_23, %c8] : memref<64x32xbf16, #tpu.memory_space<vmem>>, vector<64x8xbf16>
    %58 = arith.truncf %54 : vector<32x64xf32> to vector<32x64xbf16>
    %cst_24 = arith.constant dense<0.000000e+00> : vector<32x8xf32>
    %59 = tpu.matmul %58, %57, %cst_24 {dimension_numbers = #tpu.dot_dimension_numbers<[1], [0], [0], [1], [0, 0, 1, 1], [], []>} : vector<32x64xbf16>, vector<64x8xbf16>, vector<32x8xf32> -> vector<32x8xf32>
    %60 = tpu.reciprocal %56 {approx = true} : vector<32x1xf32> -> vector<32x1xf32>
    %61 = vector.broadcast %60 : vector<32x1xf32> to vector<32x8xf32>
    %62 = arith.mulf %59, %61 : vector<32x8xf32>
    %63 = vector.extract_strided_slice %3 {offsets = [0, 2], sizes = [32, 1], strides = [1, 1]} : vector<32x4xf32> to vector<32x1xf32>
    %64 = vector.extract_strided_slice %4 {offsets = [2, 0], sizes = [1, 64], strides = [1, 1]} : vector<4x64xf32> to vector<1x64xf32>
    %65 = vector.broadcast %63 : vector<32x1xf32> to vector<32x64xf32>
    %66 = vector.broadcast %64 : vector<1x64xf32> to vector<32x64xf32>
    %67 = arith.addf %65, %66 : vector<32x64xf32>
    %c2 = arith.constant 2 : index
    %c0_25 = arith.constant 0 : index
    %c0_26 = arith.constant 0 : index
    %68 = vector.load %arg5[%c2, %c0_25, %c0_26] : memref<4x32x64xbf16, #tpu.memory_space<vmem>>, vector<1x32x64xbf16>
    %69 = vector.shape_cast %68 : vector<1x32x64xbf16> to vector<32x64xbf16>
    %70 = arith.extf %69 : vector<32x64xbf16> to vector<32x64xf32>
    %71 = arith.addf %67, %70 : vector<32x64xf32>
    %cst_27 = arith.constant 0.000000e+00 : f32
    %72 = vector.broadcast %cst_27 : f32 to vector<32x64xf32>
    %73 = arith.cmpf ogt, %71, %72 : vector<32x64xf32>
    %cst_28 = arith.constant 2.000000e-01 : f32
    %74 = vector.broadcast %cst_28 : f32 to vector<32x64xf32>
    %75 = arith.mulf %74, %71 : vector<32x64xf32>
    %76 = arith.select %73, %71, %75 : vector<32x64xi1>, vector<32x64xf32>
    %cst_29 = arith.constant -1.000000e+30 : f32
    %77 = vector.broadcast %cst_29 : f32 to vector<32x64xf32>
    %78 = arith.select %2, %76, %77 : vector<32x64xi1>, vector<32x64xf32>
    %cst_30 = arith.constant dense<0xFF800000> : vector<32xf32>
    %79 = vector.multi_reduction <maximumf>, %78, %cst_30 [1] : vector<32x64xf32> to vector<32xf32>
    %80 = vector.shape_cast %79 : vector<32xf32> to vector<32x1xf32>
    %81 = vector.broadcast %80 : vector<32x1xf32> to vector<32x64xf32>
    %82 = arith.subf %78, %81 : vector<32x64xf32>
    %83 = math.exp %82 : vector<32x64xf32>
    %cst_31 = arith.constant dense<0.000000e+00> : vector<32xf32>
    %84 = vector.multi_reduction <add>, %83, %cst_31 [1] : vector<32x64xf32> to vector<32xf32>
    %85 = vector.shape_cast %84 : vector<32xf32> to vector<32x1xf32>
    %c0_32 = arith.constant 0 : index
    %c16 = arith.constant 16 : index
    %86 = vector.load %arg1[%c0_32, %c16] : memref<64x32xbf16, #tpu.memory_space<vmem>>, vector<64x8xbf16>
    %87 = arith.truncf %83 : vector<32x64xf32> to vector<32x64xbf16>
    %cst_33 = arith.constant dense<0.000000e+00> : vector<32x8xf32>
    %88 = tpu.matmul %87, %86, %cst_33 {dimension_numbers = #tpu.dot_dimension_numbers<[1], [0], [0], [1], [0, 0, 1, 1], [], []>} : vector<32x64xbf16>, vector<64x8xbf16>, vector<32x8xf32> -> vector<32x8xf32>
    %89 = tpu.reciprocal %85 {approx = true} : vector<32x1xf32> -> vector<32x1xf32>
    %90 = vector.broadcast %89 : vector<32x1xf32> to vector<32x8xf32>
    %91 = arith.mulf %88, %90 : vector<32x8xf32>
    %92 = vector.extract_strided_slice %3 {offsets = [0, 3], sizes = [32, 1], strides = [1, 1]} : vector<32x4xf32> to vector<32x1xf32>
    %93 = vector.extract_strided_slice %4 {offsets = [3, 0], sizes = [1, 64], strides = [1, 1]} : vector<4x64xf32> to vector<1x64xf32>
    %94 = vector.broadcast %92 : vector<32x1xf32> to vector<32x64xf32>
    %95 = vector.broadcast %93 : vector<1x64xf32> to vector<32x64xf32>
    %96 = arith.addf %94, %95 : vector<32x64xf32>
    %c3 = arith.constant 3 : index
    %c0_34 = arith.constant 0 : index
    %c0_35 = arith.constant 0 : index
    %97 = vector.load %arg5[%c3, %c0_34, %c0_35] : memref<4x32x64xbf16, #tpu.memory_space<vmem>>, vector<1x32x64xbf16>
    %98 = vector.shape_cast %97 : vector<1x32x64xbf16> to vector<32x64xbf16>
    %99 = arith.extf %98 : vector<32x64xbf16> to vector<32x64xf32>
    %100 = arith.addf %96, %99 : vector<32x64xf32>
    %cst_36 = arith.constant 0.000000e+00 : f32
    %101 = vector.broadcast %cst_36 : f32 to vector<32x64xf32>
    %102 = arith.cmpf ogt, %100, %101 : vector<32x64xf32>
    %cst_37 = arith.constant 2.000000e-01 : f32
    %103 = vector.broadcast %cst_37 : f32 to vector<32x64xf32>
    %104 = arith.mulf %103, %100 : vector<32x64xf32>
    %105 = arith.select %102, %100, %104 : vector<32x64xi1>, vector<32x64xf32>
    %cst_38 = arith.constant -1.000000e+30 : f32
    %106 = vector.broadcast %cst_38 : f32 to vector<32x64xf32>
    %107 = arith.select %2, %105, %106 : vector<32x64xi1>, vector<32x64xf32>
    %cst_39 = arith.constant dense<0xFF800000> : vector<32xf32>
    %108 = vector.multi_reduction <maximumf>, %107, %cst_39 [1] : vector<32x64xf32> to vector<32xf32>
    %109 = vector.shape_cast %108 : vector<32xf32> to vector<32x1xf32>
    %110 = vector.broadcast %109 : vector<32x1xf32> to vector<32x64xf32>
    %111 = arith.subf %107, %110 : vector<32x64xf32>
    %112 = math.exp %111 : vector<32x64xf32>
    %cst_40 = arith.constant dense<0.000000e+00> : vector<32xf32>
    %113 = vector.multi_reduction <add>, %112, %cst_40 [1] : vector<32x64xf32> to vector<32xf32>
    %114 = vector.shape_cast %113 : vector<32xf32> to vector<32x1xf32>
    %c0_41 = arith.constant 0 : index
    %c24 = arith.constant 24 : index
    %115 = vector.load %arg1[%c0_41, %c24] : memref<64x32xbf16, #tpu.memory_space<vmem>>, vector<64x8xbf16>
    %116 = arith.truncf %112 : vector<32x64xf32> to vector<32x64xbf16>
    %cst_42 = arith.constant dense<0.000000e+00> : vector<32x8xf32>
    %117 = tpu.matmul %116, %115, %cst_42 {dimension_numbers = #tpu.dot_dimension_numbers<[1], [0], [0], [1], [0, 0, 1, 1], [], []>} : vector<32x64xbf16>, vector<64x8xbf16>, vector<32x8xf32> -> vector<32x8xf32>
    %118 = tpu.reciprocal %114 {approx = true} : vector<32x1xf32> -> vector<32x1xf32>
    %119 = vector.broadcast %118 : vector<32x1xf32> to vector<32x8xf32>
    %120 = arith.mulf %117, %119 : vector<32x8xf32>
    %c0_43 = arith.constant 0 : index
    %c0_44 = arith.constant 0 : index
    %121 = vector.load %arg6[%c0_43, %c0_44] : memref<1x32xf32, #tpu.memory_space<vmem>>, vector<1x32xf32>
    %122 = tpu.concatenate %33, %62, %91, %120 in 1 : vector<32x8xf32>, vector<32x8xf32>, vector<32x8xf32>, vector<32x8xf32> -> vector<32x32xf32>
    %123 = vector.broadcast %121 : vector<1x32xf32> to vector<32x32xf32>
    %124 = arith.addf %122, %123 : vector<32x32xf32>
    %c0_45 = arith.constant 0 : index
    %c0_46 = arith.constant 0 : index
    %125 = vector.load %arg7[%c0_45, %c0_46] : memref<32x32xf32, #tpu.memory_space<vmem>>, vector<32x32xf32>
    tpu.vector_store %arg7[%c0_45, %c0_46], %124 {strides = array<i32>} : memref<32x32xf32, #tpu.memory_space<vmem>>, vector<32x32xf32>,
    return
  }
  func.func @transform_0(%arg0: i32) -> (i32, i32) {
    %c0_i32 = arith.constant 0 : i32
    %c0_i32_0 = arith.constant 0 : i32
    %c0_i32_1 = arith.constant 0 : i32
    return %c0_i32, %c0_i32_0 : i32, i32
  }
  func.func @transform_1(%arg0: i32) -> (i32, i32) {
    %c0_i32 = arith.constant 0 : i32
    %c0_i32_0 = arith.constant 0 : i32
    %c0_i32_1 = arith.constant 0 : i32
    return %c0_i32, %c0_i32_0 : i32, i32
  }
  func.func @transform_2(%arg0: i32) -> (i32, i32) {
    %c0_i32 = arith.constant 0 : i32
    %c0_i32_0 = arith.constant 0 : i32
    return %arg0, %c0_i32 : i32, i32
  }
  func.func @transform_3(%arg0: i32) -> (i32, i32) {
    %c0_i32 = arith.constant 0 : i32
    %c0_i32_0 = arith.constant 0 : i32
    return %arg0, %c0_i32 : i32, i32
  }
  func.func @transform_4(%arg0: i32) -> (i32, i32, i32) {
    %c0_i32 = arith.constant 0 : i32
    %c0_i32_0 = arith.constant 0 : i32
    %c0_i32_1 = arith.constant 0 : i32
    return %c0_i32, %arg0, %c0_i32_0 : i32, i32, i32
  }
  func.func @transform_5(%arg0: i32) -> (i32, i32) {
    %c0_i32 = arith.constant 0 : i32
    %c0_i32_0 = arith.constant 0 : i32
    %c0_i32_1 = arith.constant 0 : i32
    return %c0_i32, %c0_i32_0 : i32, i32
  }
  func.func @transform_6(%arg0: i32) -> (i32, i32) {
    %c0_i32 = arith.constant 0 : i32
    %c0_i32_0 = arith.constant 0 : i32
    return %arg0, %c0_i32 : i32, i32
  }
}

module attributes {stable_mosaic.version = 11 : i64} {
  func.func @project_kernel(%arg0: i32, %arg1: memref<32x32xf32, #tpu.memory_space<vmem>>, %arg2: memref<32x40xf32, #tpu.memory_space<vmem>>, %arg3: memref<32x32xbf16, #tpu.memory_space<vmem>>, %arg4: memref<32x8xf32, #tpu.memory_space<vmem>>) attributes {dimension_semantics = [#tpu.dimension_semantics<parallel>], iteration_bounds = array<i64: 2>, scalar_prefetch = 0 : i64, scratch_operands = 0 : i64, tpu.core_type = #tpu.core_type<tc>, window_params = [{transform_indices = @transform_0, window_bounds = array<i64: 32, 32>}, {pipeline_mode = #tpu.pipeline_mode<synchronous>, transform_indices = @transform_1, window_bounds = array<i64: 32, 40>}, {transform_indices = @transform_2, window_bounds = array<i64: 32, 32>}, {transform_indices = @transform_3, window_bounds = array<i64: 32, 8>}]} {
    %c0 = arith.constant 0 : index
    %c0_0 = arith.constant 0 : index
    %0 = vector.load %arg1[%c0, %c0_0] : memref<32x32xf32, #tpu.memory_space<vmem>>, vector<32x32xf32>
    %c0_1 = arith.constant 0 : index
    %c0_2 = arith.constant 0 : index
    %1 = vector.load %arg2[%c0_1, %c0_2] : memref<32x40xf32, #tpu.memory_space<vmem>>, vector<32x40xf32>
    %cst = arith.constant dense<0.000000e+00> : vector<32x40xf32>
    %2 = tpu.matmul %0, %1, %cst {dimension_numbers = #tpu.dot_dimension_numbers<[1], [0], [0], [1], [0, 0, 1, 1], [], []>} : vector<32x32xf32>, vector<32x40xf32>, vector<32x40xf32> -> vector<32x40xf32>
    %3 = vector.extract_strided_slice %2 {offsets = [0, 0], sizes = [32, 32], strides = [1, 1]} : vector<32x40xf32> to vector<32x32xf32>
    %4 = arith.truncf %3 : vector<32x32xf32> to vector<32x32xbf16>
    %c0_3 = arith.constant 0 : index
    %c0_4 = arith.constant 0 : index
    %5 = vector.load %arg3[%c0_3, %c0_4] : memref<32x32xbf16, #tpu.memory_space<vmem>>, vector<32x32xbf16>
    tpu.vector_store %arg3[%c0_3, %c0_4], %4 {strides = array<i32>} : memref<32x32xbf16, #tpu.memory_space<vmem>>, vector<32x32xbf16>,
    %6 = vector.extract_strided_slice %2 {offsets = [0, 32], sizes = [32, 8], strides = [1, 1]} : vector<32x40xf32> to vector<32x8xf32>
    %c0_5 = arith.constant 0 : index
    %c0_6 = arith.constant 0 : index
    %7 = vector.load %arg4[%c0_5, %c0_6] : memref<32x8xf32, #tpu.memory_space<vmem>>, vector<32x8xf32>
    tpu.vector_store %arg4[%c0_5, %c0_6], %6 {strides = array<i32>} : memref<32x8xf32, #tpu.memory_space<vmem>>, vector<32x8xf32>,
    return
  }
  func.func @transform_0(%arg0: i32) -> (i32, i32) {
    %c0_i32 = arith.constant 0 : i32
    %c0_i32_0 = arith.constant 0 : i32
    return %arg0, %c0_i32 : i32, i32
  }
  func.func @transform_1(%arg0: i32) -> (i32, i32) {
    %c0_i32 = arith.constant 0 : i32
    %c0_i32_0 = arith.constant 0 : i32
    %c0_i32_1 = arith.constant 0 : i32
    return %c0_i32, %c0_i32_0 : i32, i32
  }
  func.func @transform_2(%arg0: i32) -> (i32, i32) {
    %c0_i32 = arith.constant 0 : i32
    %c0_i32_0 = arith.constant 0 : i32
    return %arg0, %c0_i32 : i32, i32
  }
  func.func @transform_3(%arg0: i32) -> (i32, i32) {
    %c0_i32 = arith.constant 0 : i32
    %c0_i32_0 = arith.constant 0 : i32
    return %arg0, %c0_i32 : i32, i32
  }
}

module attributes {stable_mosaic.version = 11 : i64} {
  func.func @gat_attn_kernel(%arg0: i32, %arg1: memref<64x32xbf16, #tpu.memory_space<vmem>>, %arg2: memref<4x64xf32, #tpu.memory_space<vmem>>, %arg3: memref<32x4xf32, #tpu.memory_space<vmem>>, %arg4: memref<32x64xbf16, #tpu.memory_space<vmem>>, %arg5: memref<4x32x64xbf16, #tpu.memory_space<vmem>>, %arg6: memref<1x32xf32, #tpu.memory_space<vmem>>, %arg7: memref<32x32xf32, #tpu.memory_space<vmem>>, %arg8: memref<32x32xf32, #tpu.memory_space<vmem>>) attributes {dimension_semantics = [#tpu.dimension_semantics<parallel>], iteration_bounds = array<i64: 2>, scalar_prefetch = 0 : i64, scratch_operands = 0 : i64, tpu.core_type = #tpu.core_type<tc>, window_params = [{pipeline_mode = #tpu.pipeline_mode<synchronous>, transform_indices = @transform_0, window_bounds = array<i64: 64, 32>}, {pipeline_mode = #tpu.pipeline_mode<synchronous>, transform_indices = @transform_1, window_bounds = array<i64: 4, 64>}, {transform_indices = @transform_2, window_bounds = array<i64: 32, 4>}, {transform_indices = @transform_3, window_bounds = array<i64: 32, 64>}, {transform_indices = @transform_4, window_bounds = array<i64: 4, 32, 64>}, {pipeline_mode = #tpu.pipeline_mode<synchronous>, transform_indices = @transform_5, window_bounds = array<i64: 1, 32>}, {transform_indices = @transform_6, window_bounds = array<i64: 32, 32>}, {transform_indices = @transform_7, window_bounds = array<i64: 32, 32>}]} {
    %c0 = arith.constant 0 : index
    %c0_0 = arith.constant 0 : index
    %0 = vector.load %arg4[%c0, %c0_0] : memref<32x64xbf16, #tpu.memory_space<vmem>>, vector<32x64xbf16>
    %cst = arith.constant 0.000000e+00 : bf16
    %1 = vector.broadcast %cst : bf16 to vector<32x64xbf16>
    %2 = arith.cmpf ogt, %0, %1 : vector<32x64xbf16>
    %c0_1 = arith.constant 0 : index
    %c0_2 = arith.constant 0 : index
    %3 = vector.load %arg3[%c0_1, %c0_2] : memref<32x4xf32, #tpu.memory_space<vmem>>, vector<32x4xf32>
    %c0_3 = arith.constant 0 : index
    %c0_4 = arith.constant 0 : index
    %4 = vector.load %arg2[%c0_3, %c0_4] : memref<4x64xf32, #tpu.memory_space<vmem>>, vector<4x64xf32>
    %5 = vector.extract_strided_slice %3 {offsets = [0, 0], sizes = [32, 1], strides = [1, 1]} : vector<32x4xf32> to vector<32x1xf32>
    %6 = vector.extract_strided_slice %4 {offsets = [0, 0], sizes = [1, 64], strides = [1, 1]} : vector<4x64xf32> to vector<1x64xf32>
    %7 = vector.broadcast %5 : vector<32x1xf32> to vector<32x64xf32>
    %8 = vector.broadcast %6 : vector<1x64xf32> to vector<32x64xf32>
    %9 = arith.addf %7, %8 : vector<32x64xf32>
    %c0_5 = arith.constant 0 : index
    %c0_6 = arith.constant 0 : index
    %c0_7 = arith.constant 0 : index
    %10 = vector.load %arg5[%c0_5, %c0_6, %c0_7] : memref<4x32x64xbf16, #tpu.memory_space<vmem>>, vector<1x32x64xbf16>
    %11 = vector.shape_cast %10 : vector<1x32x64xbf16> to vector<32x64xbf16>
    %12 = arith.extf %11 : vector<32x64xbf16> to vector<32x64xf32>
    %13 = arith.addf %9, %12 : vector<32x64xf32>
    %cst_8 = arith.constant 0.000000e+00 : f32
    %14 = vector.broadcast %cst_8 : f32 to vector<32x64xf32>
    %15 = arith.cmpf ogt, %13, %14 : vector<32x64xf32>
    %cst_9 = arith.constant 2.000000e-01 : f32
    %16 = vector.broadcast %cst_9 : f32 to vector<32x64xf32>
    %17 = arith.mulf %16, %13 : vector<32x64xf32>
    %18 = arith.select %15, %13, %17 : vector<32x64xi1>, vector<32x64xf32>
    %cst_10 = arith.constant -1.000000e+30 : f32
    %19 = vector.broadcast %cst_10 : f32 to vector<32x64xf32>
    %20 = arith.select %2, %18, %19 : vector<32x64xi1>, vector<32x64xf32>
    %cst_11 = arith.constant dense<0xFF800000> : vector<32xf32>
    %21 = vector.multi_reduction <maximumf>, %20, %cst_11 [1] : vector<32x64xf32> to vector<32xf32>
    %22 = vector.shape_cast %21 : vector<32xf32> to vector<32x1xf32>
    %23 = vector.broadcast %22 : vector<32x1xf32> to vector<32x64xf32>
    %24 = arith.subf %20, %23 : vector<32x64xf32>
    %25 = math.exp %24 : vector<32x64xf32>
    %cst_12 = arith.constant dense<0.000000e+00> : vector<32xf32>
    %26 = vector.multi_reduction <add>, %25, %cst_12 [1] : vector<32x64xf32> to vector<32xf32>
    %27 = vector.shape_cast %26 : vector<32xf32> to vector<32x1xf32>
    %c0_13 = arith.constant 0 : index
    %c0_14 = arith.constant 0 : index
    %28 = vector.load %arg1[%c0_13, %c0_14] : memref<64x32xbf16, #tpu.memory_space<vmem>>, vector<64x8xbf16>
    %29 = arith.truncf %25 : vector<32x64xf32> to vector<32x64xbf16>
    %cst_15 = arith.constant dense<0.000000e+00> : vector<32x8xf32>
    %30 = tpu.matmul %29, %28, %cst_15 {dimension_numbers = #tpu.dot_dimension_numbers<[1], [0], [0], [1], [0, 0, 1, 1], [], []>} : vector<32x64xbf16>, vector<64x8xbf16>, vector<32x8xf32> -> vector<32x8xf32>
    %31 = tpu.reciprocal %27 {approx = true} : vector<32x1xf32> -> vector<32x1xf32>
    %32 = vector.broadcast %31 : vector<32x1xf32> to vector<32x8xf32>
    %33 = arith.mulf %30, %32 : vector<32x8xf32>
    %34 = vector.extract_strided_slice %3 {offsets = [0, 1], sizes = [32, 1], strides = [1, 1]} : vector<32x4xf32> to vector<32x1xf32>
    %35 = vector.extract_strided_slice %4 {offsets = [1, 0], sizes = [1, 64], strides = [1, 1]} : vector<4x64xf32> to vector<1x64xf32>
    %36 = vector.broadcast %34 : vector<32x1xf32> to vector<32x64xf32>
    %37 = vector.broadcast %35 : vector<1x64xf32> to vector<32x64xf32>
    %38 = arith.addf %36, %37 : vector<32x64xf32>
    %c1 = arith.constant 1 : index
    %c0_16 = arith.constant 0 : index
    %c0_17 = arith.constant 0 : index
    %39 = vector.load %arg5[%c1, %c0_16, %c0_17] : memref<4x32x64xbf16, #tpu.memory_space<vmem>>, vector<1x32x64xbf16>
    %40 = vector.shape_cast %39 : vector<1x32x64xbf16> to vector<32x64xbf16>
    %41 = arith.extf %40 : vector<32x64xbf16> to vector<32x64xf32>
    %42 = arith.addf %38, %41 : vector<32x64xf32>
    %cst_18 = arith.constant 0.000000e+00 : f32
    %43 = vector.broadcast %cst_18 : f32 to vector<32x64xf32>
    %44 = arith.cmpf ogt, %42, %43 : vector<32x64xf32>
    %cst_19 = arith.constant 2.000000e-01 : f32
    %45 = vector.broadcast %cst_19 : f32 to vector<32x64xf32>
    %46 = arith.mulf %45, %42 : vector<32x64xf32>
    %47 = arith.select %44, %42, %46 : vector<32x64xi1>, vector<32x64xf32>
    %cst_20 = arith.constant -1.000000e+30 : f32
    %48 = vector.broadcast %cst_20 : f32 to vector<32x64xf32>
    %49 = arith.select %2, %47, %48 : vector<32x64xi1>, vector<32x64xf32>
    %cst_21 = arith.constant dense<0xFF800000> : vector<32xf32>
    %50 = vector.multi_reduction <maximumf>, %49, %cst_21 [1] : vector<32x64xf32> to vector<32xf32>
    %51 = vector.shape_cast %50 : vector<32xf32> to vector<32x1xf32>
    %52 = vector.broadcast %51 : vector<32x1xf32> to vector<32x64xf32>
    %53 = arith.subf %49, %52 : vector<32x64xf32>
    %54 = math.exp %53 : vector<32x64xf32>
    %cst_22 = arith.constant dense<0.000000e+00> : vector<32xf32>
    %55 = vector.multi_reduction <add>, %54, %cst_22 [1] : vector<32x64xf32> to vector<32xf32>
    %56 = vector.shape_cast %55 : vector<32xf32> to vector<32x1xf32>
    %c0_23 = arith.constant 0 : index
    %c8 = arith.constant 8 : index
    %57 = vector.load %arg1[%c0_23, %c8] : memref<64x32xbf16, #tpu.memory_space<vmem>>, vector<64x8xbf16>
    %58 = arith.truncf %54 : vector<32x64xf32> to vector<32x64xbf16>
    %cst_24 = arith.constant dense<0.000000e+00> : vector<32x8xf32>
    %59 = tpu.matmul %58, %57, %cst_24 {dimension_numbers = #tpu.dot_dimension_numbers<[1], [0], [0], [1], [0, 0, 1, 1], [], []>} : vector<32x64xbf16>, vector<64x8xbf16>, vector<32x8xf32> -> vector<32x8xf32>
    %60 = tpu.reciprocal %56 {approx = true} : vector<32x1xf32> -> vector<32x1xf32>
    %61 = vector.broadcast %60 : vector<32x1xf32> to vector<32x8xf32>
    %62 = arith.mulf %59, %61 : vector<32x8xf32>
    %63 = vector.extract_strided_slice %3 {offsets = [0, 2], sizes = [32, 1], strides = [1, 1]} : vector<32x4xf32> to vector<32x1xf32>
    %64 = vector.extract_strided_slice %4 {offsets = [2, 0], sizes = [1, 64], strides = [1, 1]} : vector<4x64xf32> to vector<1x64xf32>
    %65 = vector.broadcast %63 : vector<32x1xf32> to vector<32x64xf32>
    %66 = vector.broadcast %64 : vector<1x64xf32> to vector<32x64xf32>
    %67 = arith.addf %65, %66 : vector<32x64xf32>
    %c2 = arith.constant 2 : index
    %c0_25 = arith.constant 0 : index
    %c0_26 = arith.constant 0 : index
    %68 = vector.load %arg5[%c2, %c0_25, %c0_26] : memref<4x32x64xbf16, #tpu.memory_space<vmem>>, vector<1x32x64xbf16>
    %69 = vector.shape_cast %68 : vector<1x32x64xbf16> to vector<32x64xbf16>
    %70 = arith.extf %69 : vector<32x64xbf16> to vector<32x64xf32>
    %71 = arith.addf %67, %70 : vector<32x64xf32>
    %cst_27 = arith.constant 0.000000e+00 : f32
    %72 = vector.broadcast %cst_27 : f32 to vector<32x64xf32>
    %73 = arith.cmpf ogt, %71, %72 : vector<32x64xf32>
    %cst_28 = arith.constant 2.000000e-01 : f32
    %74 = vector.broadcast %cst_28 : f32 to vector<32x64xf32>
    %75 = arith.mulf %74, %71 : vector<32x64xf32>
    %76 = arith.select %73, %71, %75 : vector<32x64xi1>, vector<32x64xf32>
    %cst_29 = arith.constant -1.000000e+30 : f32
    %77 = vector.broadcast %cst_29 : f32 to vector<32x64xf32>
    %78 = arith.select %2, %76, %77 : vector<32x64xi1>, vector<32x64xf32>
    %cst_30 = arith.constant dense<0xFF800000> : vector<32xf32>
    %79 = vector.multi_reduction <maximumf>, %78, %cst_30 [1] : vector<32x64xf32> to vector<32xf32>
    %80 = vector.shape_cast %79 : vector<32xf32> to vector<32x1xf32>
    %81 = vector.broadcast %80 : vector<32x1xf32> to vector<32x64xf32>
    %82 = arith.subf %78, %81 : vector<32x64xf32>
    %83 = math.exp %82 : vector<32x64xf32>
    %cst_31 = arith.constant dense<0.000000e+00> : vector<32xf32>
    %84 = vector.multi_reduction <add>, %83, %cst_31 [1] : vector<32x64xf32> to vector<32xf32>
    %85 = vector.shape_cast %84 : vector<32xf32> to vector<32x1xf32>
    %c0_32 = arith.constant 0 : index
    %c16 = arith.constant 16 : index
    %86 = vector.load %arg1[%c0_32, %c16] : memref<64x32xbf16, #tpu.memory_space<vmem>>, vector<64x8xbf16>
    %87 = arith.truncf %83 : vector<32x64xf32> to vector<32x64xbf16>
    %cst_33 = arith.constant dense<0.000000e+00> : vector<32x8xf32>
    %88 = tpu.matmul %87, %86, %cst_33 {dimension_numbers = #tpu.dot_dimension_numbers<[1], [0], [0], [1], [0, 0, 1, 1], [], []>} : vector<32x64xbf16>, vector<64x8xbf16>, vector<32x8xf32> -> vector<32x8xf32>
    %89 = tpu.reciprocal %85 {approx = true} : vector<32x1xf32> -> vector<32x1xf32>
    %90 = vector.broadcast %89 : vector<32x1xf32> to vector<32x8xf32>
    %91 = arith.mulf %88, %90 : vector<32x8xf32>
    %92 = vector.extract_strided_slice %3 {offsets = [0, 3], sizes = [32, 1], strides = [1, 1]} : vector<32x4xf32> to vector<32x1xf32>
    %93 = vector.extract_strided_slice %4 {offsets = [3, 0], sizes = [1, 64], strides = [1, 1]} : vector<4x64xf32> to vector<1x64xf32>
    %94 = vector.broadcast %92 : vector<32x1xf32> to vector<32x64xf32>
    %95 = vector.broadcast %93 : vector<1x64xf32> to vector<32x64xf32>
    %96 = arith.addf %94, %95 : vector<32x64xf32>
    %c3 = arith.constant 3 : index
    %c0_34 = arith.constant 0 : index
    %c0_35 = arith.constant 0 : index
    %97 = vector.load %arg5[%c3, %c0_34, %c0_35] : memref<4x32x64xbf16, #tpu.memory_space<vmem>>, vector<1x32x64xbf16>
    %98 = vector.shape_cast %97 : vector<1x32x64xbf16> to vector<32x64xbf16>
    %99 = arith.extf %98 : vector<32x64xbf16> to vector<32x64xf32>
    %100 = arith.addf %96, %99 : vector<32x64xf32>
    %cst_36 = arith.constant 0.000000e+00 : f32
    %101 = vector.broadcast %cst_36 : f32 to vector<32x64xf32>
    %102 = arith.cmpf ogt, %100, %101 : vector<32x64xf32>
    %cst_37 = arith.constant 2.000000e-01 : f32
    %103 = vector.broadcast %cst_37 : f32 to vector<32x64xf32>
    %104 = arith.mulf %103, %100 : vector<32x64xf32>
    %105 = arith.select %102, %100, %104 : vector<32x64xi1>, vector<32x64xf32>
    %cst_38 = arith.constant -1.000000e+30 : f32
    %106 = vector.broadcast %cst_38 : f32 to vector<32x64xf32>
    %107 = arith.select %2, %105, %106 : vector<32x64xi1>, vector<32x64xf32>
    %cst_39 = arith.constant dense<0xFF800000> : vector<32xf32>
    %108 = vector.multi_reduction <maximumf>, %107, %cst_39 [1] : vector<32x64xf32> to vector<32xf32>
    %109 = vector.shape_cast %108 : vector<32xf32> to vector<32x1xf32>
    %110 = vector.broadcast %109 : vector<32x1xf32> to vector<32x64xf32>
    %111 = arith.subf %107, %110 : vector<32x64xf32>
    %112 = math.exp %111 : vector<32x64xf32>
    %cst_40 = arith.constant dense<0.000000e+00> : vector<32xf32>
    %113 = vector.multi_reduction <add>, %112, %cst_40 [1] : vector<32x64xf32> to vector<32xf32>
    %114 = vector.shape_cast %113 : vector<32xf32> to vector<32x1xf32>
    %c0_41 = arith.constant 0 : index
    %c24 = arith.constant 24 : index
    %115 = vector.load %arg1[%c0_41, %c24] : memref<64x32xbf16, #tpu.memory_space<vmem>>, vector<64x8xbf16>
    %116 = arith.truncf %112 : vector<32x64xf32> to vector<32x64xbf16>
    %cst_42 = arith.constant dense<0.000000e+00> : vector<32x8xf32>
    %117 = tpu.matmul %116, %115, %cst_42 {dimension_numbers = #tpu.dot_dimension_numbers<[1], [0], [0], [1], [0, 0, 1, 1], [], []>} : vector<32x64xbf16>, vector<64x8xbf16>, vector<32x8xf32> -> vector<32x8xf32>
    %118 = tpu.reciprocal %114 {approx = true} : vector<32x1xf32> -> vector<32x1xf32>
    %119 = vector.broadcast %118 : vector<32x1xf32> to vector<32x8xf32>
    %120 = arith.mulf %117, %119 : vector<32x8xf32>
    %c0_43 = arith.constant 0 : index
    %c0_44 = arith.constant 0 : index
    %121 = vector.load %arg6[%c0_43, %c0_44] : memref<1x32xf32, #tpu.memory_space<vmem>>, vector<1x32xf32>
    %122 = tpu.concatenate %33, %62, %91, %120 in 1 : vector<32x8xf32>, vector<32x8xf32>, vector<32x8xf32>, vector<32x8xf32> -> vector<32x32xf32>
    %123 = vector.broadcast %121 : vector<1x32xf32> to vector<32x32xf32>
    %124 = arith.addf %122, %123 : vector<32x32xf32>
    %cst_45 = arith.constant 0.000000e+00 : f32
    %125 = vector.broadcast %cst_45 : f32 to vector<32x32xf32>
    %126 = arith.maximumf %124, %125 : vector<32x32xf32>
    %c0_46 = arith.constant 0 : index
    %c0_47 = arith.constant 0 : index
    %127 = vector.load %arg7[%c0_46, %c0_47] : memref<32x32xf32, #tpu.memory_space<vmem>>, vector<32x32xf32>
    %128 = arith.addf %126, %127 : vector<32x32xf32>
    %c0_48 = arith.constant 0 : index
    %c0_49 = arith.constant 0 : index
    %129 = vector.load %arg8[%c0_48, %c0_49] : memref<32x32xf32, #tpu.memory_space<vmem>>, vector<32x32xf32>
    tpu.vector_store %arg8[%c0_48, %c0_49], %128 {strides = array<i32>} : memref<32x32xf32, #tpu.memory_space<vmem>>, vector<32x32xf32>,
    return
  }
  func.func @transform_0(%arg0: i32) -> (i32, i32) {
    %c0_i32 = arith.constant 0 : i32
    %c0_i32_0 = arith.constant 0 : i32
    %c0_i32_1 = arith.constant 0 : i32
    return %c0_i32, %c0_i32_0 : i32, i32
  }
  func.func @transform_1(%arg0: i32) -> (i32, i32) {
    %c0_i32 = arith.constant 0 : i32
    %c0_i32_0 = arith.constant 0 : i32
    %c0_i32_1 = arith.constant 0 : i32
    return %c0_i32, %c0_i32_0 : i32, i32
  }
  func.func @transform_2(%arg0: i32) -> (i32, i32) {
    %c0_i32 = arith.constant 0 : i32
    %c0_i32_0 = arith.constant 0 : i32
    return %arg0, %c0_i32 : i32, i32
  }
  func.func @transform_3(%arg0: i32) -> (i32, i32) {
    %c0_i32 = arith.constant 0 : i32
    %c0_i32_0 = arith.constant 0 : i32
    return %arg0, %c0_i32 : i32, i32
  }
  func.func @transform_4(%arg0: i32) -> (i32, i32, i32) {
    %c0_i32 = arith.constant 0 : i32
    %c0_i32_0 = arith.constant 0 : i32
    %c0_i32_1 = arith.constant 0 : i32
    return %c0_i32, %arg0, %c0_i32_0 : i32, i32, i32
  }
  func.func @transform_5(%arg0: i32) -> (i32, i32) {
    %c0_i32 = arith.constant 0 : i32
    %c0_i32_0 = arith.constant 0 : i32
    %c0_i32_1 = arith.constant 0 : i32
    return %c0_i32, %c0_i32_0 : i32, i32
  }
  func.func @transform_6(%arg0: i32) -> (i32, i32) {
    %c0_i32 = arith.constant 0 : i32
    %c0_i32_0 = arith.constant 0 : i32
    return %arg0, %c0_i32 : i32, i32
  }
  func.func @transform_7(%arg0: i32) -> (i32, i32) {
    %c0_i32 = arith.constant 0 : i32
    %c0_i32_0 = arith.constant 0 : i32
    return %arg0, %c0_i32 : i32, i32
  }
}

module attributes {stable_mosaic.version = 11 : i64} {
  func.func @gat_attn_kernel(%arg0: i32, %arg1: memref<64x32xbf16, #tpu.memory_space<vmem>>, %arg2: memref<4x64xf32, #tpu.memory_space<vmem>>, %arg3: memref<32x4xf32, #tpu.memory_space<vmem>>, %arg4: memref<32x64xbf16, #tpu.memory_space<vmem>>, %arg5: memref<1x8xf32, #tpu.memory_space<vmem>>, %arg6: memref<32x8xf32, #tpu.memory_space<vmem>>) attributes {dimension_semantics = [#tpu.dimension_semantics<parallel>], iteration_bounds = array<i64: 2>, scalar_prefetch = 0 : i64, scratch_operands = 0 : i64, tpu.core_type = #tpu.core_type<tc>, window_params = [{pipeline_mode = #tpu.pipeline_mode<synchronous>, transform_indices = @transform_0, window_bounds = array<i64: 64, 32>}, {pipeline_mode = #tpu.pipeline_mode<synchronous>, transform_indices = @transform_1, window_bounds = array<i64: 4, 64>}, {transform_indices = @transform_2, window_bounds = array<i64: 32, 4>}, {transform_indices = @transform_3, window_bounds = array<i64: 32, 64>}, {pipeline_mode = #tpu.pipeline_mode<synchronous>, transform_indices = @transform_4, window_bounds = array<i64: 1, 8>}, {transform_indices = @transform_5, window_bounds = array<i64: 32, 8>}]} {
    %c0 = arith.constant 0 : index
    %c0_0 = arith.constant 0 : index
    %0 = vector.load %arg4[%c0, %c0_0] : memref<32x64xbf16, #tpu.memory_space<vmem>>, vector<32x64xbf16>
    %cst = arith.constant 0.000000e+00 : bf16
    %1 = vector.broadcast %cst : bf16 to vector<32x64xbf16>
    %2 = arith.cmpf ogt, %0, %1 : vector<32x64xbf16>
    %c0_1 = arith.constant 0 : index
    %c0_2 = arith.constant 0 : index
    %3 = vector.load %arg3[%c0_1, %c0_2] : memref<32x4xf32, #tpu.memory_space<vmem>>, vector<32x4xf32>
    %c0_3 = arith.constant 0 : index
    %c0_4 = arith.constant 0 : index
    %4 = vector.load %arg2[%c0_3, %c0_4] : memref<4x64xf32, #tpu.memory_space<vmem>>, vector<4x64xf32>
    %5 = vector.extract_strided_slice %3 {offsets = [0, 0], sizes = [32, 1], strides = [1, 1]} : vector<32x4xf32> to vector<32x1xf32>
    %6 = vector.extract_strided_slice %4 {offsets = [0, 0], sizes = [1, 64], strides = [1, 1]} : vector<4x64xf32> to vector<1x64xf32>
    %7 = vector.broadcast %5 : vector<32x1xf32> to vector<32x64xf32>
    %8 = vector.broadcast %6 : vector<1x64xf32> to vector<32x64xf32>
    %9 = arith.addf %7, %8 : vector<32x64xf32>
    %cst_5 = arith.constant 0.000000e+00 : f32
    %10 = vector.broadcast %cst_5 : f32 to vector<32x64xf32>
    %11 = arith.cmpf ogt, %9, %10 : vector<32x64xf32>
    %cst_6 = arith.constant 2.000000e-01 : f32
    %12 = vector.broadcast %cst_6 : f32 to vector<32x64xf32>
    %13 = arith.mulf %12, %9 : vector<32x64xf32>
    %14 = arith.select %11, %9, %13 : vector<32x64xi1>, vector<32x64xf32>
    %cst_7 = arith.constant -1.000000e+30 : f32
    %15 = vector.broadcast %cst_7 : f32 to vector<32x64xf32>
    %16 = arith.select %2, %14, %15 : vector<32x64xi1>, vector<32x64xf32>
    %cst_8 = arith.constant dense<0xFF800000> : vector<32xf32>
    %17 = vector.multi_reduction <maximumf>, %16, %cst_8 [1] : vector<32x64xf32> to vector<32xf32>
    %18 = vector.shape_cast %17 : vector<32xf32> to vector<32x1xf32>
    %19 = vector.broadcast %18 : vector<32x1xf32> to vector<32x64xf32>
    %20 = arith.subf %16, %19 : vector<32x64xf32>
    %21 = math.exp %20 : vector<32x64xf32>
    %cst_9 = arith.constant dense<0.000000e+00> : vector<32xf32>
    %22 = vector.multi_reduction <add>, %21, %cst_9 [1] : vector<32x64xf32> to vector<32xf32>
    %23 = vector.shape_cast %22 : vector<32xf32> to vector<32x1xf32>
    %c0_10 = arith.constant 0 : index
    %c0_11 = arith.constant 0 : index
    %24 = vector.load %arg1[%c0_10, %c0_11] : memref<64x32xbf16, #tpu.memory_space<vmem>>, vector<64x8xbf16>
    %25 = arith.truncf %21 : vector<32x64xf32> to vector<32x64xbf16>
    %cst_12 = arith.constant dense<0.000000e+00> : vector<32x8xf32>
    %26 = tpu.matmul %25, %24, %cst_12 {dimension_numbers = #tpu.dot_dimension_numbers<[1], [0], [0], [1], [0, 0, 1, 1], [], []>} : vector<32x64xbf16>, vector<64x8xbf16>, vector<32x8xf32> -> vector<32x8xf32>
    %27 = tpu.reciprocal %23 {approx = true} : vector<32x1xf32> -> vector<32x1xf32>
    %28 = vector.broadcast %27 : vector<32x1xf32> to vector<32x8xf32>
    %29 = arith.mulf %26, %28 : vector<32x8xf32>
    %30 = vector.extract_strided_slice %3 {offsets = [0, 1], sizes = [32, 1], strides = [1, 1]} : vector<32x4xf32> to vector<32x1xf32>
    %31 = vector.extract_strided_slice %4 {offsets = [1, 0], sizes = [1, 64], strides = [1, 1]} : vector<4x64xf32> to vector<1x64xf32>
    %32 = vector.broadcast %30 : vector<32x1xf32> to vector<32x64xf32>
    %33 = vector.broadcast %31 : vector<1x64xf32> to vector<32x64xf32>
    %34 = arith.addf %32, %33 : vector<32x64xf32>
    %cst_13 = arith.constant 0.000000e+00 : f32
    %35 = vector.broadcast %cst_13 : f32 to vector<32x64xf32>
    %36 = arith.cmpf ogt, %34, %35 : vector<32x64xf32>
    %cst_14 = arith.constant 2.000000e-01 : f32
    %37 = vector.broadcast %cst_14 : f32 to vector<32x64xf32>
    %38 = arith.mulf %37, %34 : vector<32x64xf32>
    %39 = arith.select %36, %34, %38 : vector<32x64xi1>, vector<32x64xf32>
    %cst_15 = arith.constant -1.000000e+30 : f32
    %40 = vector.broadcast %cst_15 : f32 to vector<32x64xf32>
    %41 = arith.select %2, %39, %40 : vector<32x64xi1>, vector<32x64xf32>
    %cst_16 = arith.constant dense<0xFF800000> : vector<32xf32>
    %42 = vector.multi_reduction <maximumf>, %41, %cst_16 [1] : vector<32x64xf32> to vector<32xf32>
    %43 = vector.shape_cast %42 : vector<32xf32> to vector<32x1xf32>
    %44 = vector.broadcast %43 : vector<32x1xf32> to vector<32x64xf32>
    %45 = arith.subf %41, %44 : vector<32x64xf32>
    %46 = math.exp %45 : vector<32x64xf32>
    %cst_17 = arith.constant dense<0.000000e+00> : vector<32xf32>
    %47 = vector.multi_reduction <add>, %46, %cst_17 [1] : vector<32x64xf32> to vector<32xf32>
    %48 = vector.shape_cast %47 : vector<32xf32> to vector<32x1xf32>
    %c0_18 = arith.constant 0 : index
    %c8 = arith.constant 8 : index
    %49 = vector.load %arg1[%c0_18, %c8] : memref<64x32xbf16, #tpu.memory_space<vmem>>, vector<64x8xbf16>
    %50 = arith.truncf %46 : vector<32x64xf32> to vector<32x64xbf16>
    %cst_19 = arith.constant dense<0.000000e+00> : vector<32x8xf32>
    %51 = tpu.matmul %50, %49, %cst_19 {dimension_numbers = #tpu.dot_dimension_numbers<[1], [0], [0], [1], [0, 0, 1, 1], [], []>} : vector<32x64xbf16>, vector<64x8xbf16>, vector<32x8xf32> -> vector<32x8xf32>
    %52 = tpu.reciprocal %48 {approx = true} : vector<32x1xf32> -> vector<32x1xf32>
    %53 = vector.broadcast %52 : vector<32x1xf32> to vector<32x8xf32>
    %54 = arith.mulf %51, %53 : vector<32x8xf32>
    %55 = vector.extract_strided_slice %3 {offsets = [0, 2], sizes = [32, 1], strides = [1, 1]} : vector<32x4xf32> to vector<32x1xf32>
    %56 = vector.extract_strided_slice %4 {offsets = [2, 0], sizes = [1, 64], strides = [1, 1]} : vector<4x64xf32> to vector<1x64xf32>
    %57 = vector.broadcast %55 : vector<32x1xf32> to vector<32x64xf32>
    %58 = vector.broadcast %56 : vector<1x64xf32> to vector<32x64xf32>
    %59 = arith.addf %57, %58 : vector<32x64xf32>
    %cst_20 = arith.constant 0.000000e+00 : f32
    %60 = vector.broadcast %cst_20 : f32 to vector<32x64xf32>
    %61 = arith.cmpf ogt, %59, %60 : vector<32x64xf32>
    %cst_21 = arith.constant 2.000000e-01 : f32
    %62 = vector.broadcast %cst_21 : f32 to vector<32x64xf32>
    %63 = arith.mulf %62, %59 : vector<32x64xf32>
    %64 = arith.select %61, %59, %63 : vector<32x64xi1>, vector<32x64xf32>
    %cst_22 = arith.constant -1.000000e+30 : f32
    %65 = vector.broadcast %cst_22 : f32 to vector<32x64xf32>
    %66 = arith.select %2, %64, %65 : vector<32x64xi1>, vector<32x64xf32>
    %cst_23 = arith.constant dense<0xFF800000> : vector<32xf32>
    %67 = vector.multi_reduction <maximumf>, %66, %cst_23 [1] : vector<32x64xf32> to vector<32xf32>
    %68 = vector.shape_cast %67 : vector<32xf32> to vector<32x1xf32>
    %69 = vector.broadcast %68 : vector<32x1xf32> to vector<32x64xf32>
    %70 = arith.subf %66, %69 : vector<32x64xf32>
    %71 = math.exp %70 : vector<32x64xf32>
    %cst_24 = arith.constant dense<0.000000e+00> : vector<32xf32>
    %72 = vector.multi_reduction <add>, %71, %cst_24 [1] : vector<32x64xf32> to vector<32xf32>
    %73 = vector.shape_cast %72 : vector<32xf32> to vector<32x1xf32>
    %c0_25 = arith.constant 0 : index
    %c16 = arith.constant 16 : index
    %74 = vector.load %arg1[%c0_25, %c16] : memref<64x32xbf16, #tpu.memory_space<vmem>>, vector<64x8xbf16>
    %75 = arith.truncf %71 : vector<32x64xf32> to vector<32x64xbf16>
    %cst_26 = arith.constant dense<0.000000e+00> : vector<32x8xf32>
    %76 = tpu.matmul %75, %74, %cst_26 {dimension_numbers = #tpu.dot_dimension_numbers<[1], [0], [0], [1], [0, 0, 1, 1], [], []>} : vector<32x64xbf16>, vector<64x8xbf16>, vector<32x8xf32> -> vector<32x8xf32>
    %77 = tpu.reciprocal %73 {approx = true} : vector<32x1xf32> -> vector<32x1xf32>
    %78 = vector.broadcast %77 : vector<32x1xf32> to vector<32x8xf32>
    %79 = arith.mulf %76, %78 : vector<32x8xf32>
    %80 = vector.extract_strided_slice %3 {offsets = [0, 3], sizes = [32, 1], strides = [1, 1]} : vector<32x4xf32> to vector<32x1xf32>
    %81 = vector.extract_strided_slice %4 {offsets = [3, 0], sizes = [1, 64], strides = [1, 1]} : vector<4x64xf32> to vector<1x64xf32>
    %82 = vector.broadcast %80 : vector<32x1xf32> to vector<32x64xf32>
    %83 = vector.broadcast %81 : vector<1x64xf32> to vector<32x64xf32>
    %84 = arith.addf %82, %83 : vector<32x64xf32>
    %cst_27 = arith.constant 0.000000e+00 : f32
    %85 = vector.broadcast %cst_27 : f32 to vector<32x64xf32>
    %86 = arith.cmpf ogt, %84, %85 : vector<32x64xf32>
    %cst_28 = arith.constant 2.000000e-01 : f32
    %87 = vector.broadcast %cst_28 : f32 to vector<32x64xf32>
    %88 = arith.mulf %87, %84 : vector<32x64xf32>
    %89 = arith.select %86, %84, %88 : vector<32x64xi1>, vector<32x64xf32>
    %cst_29 = arith.constant -1.000000e+30 : f32
    %90 = vector.broadcast %cst_29 : f32 to vector<32x64xf32>
    %91 = arith.select %2, %89, %90 : vector<32x64xi1>, vector<32x64xf32>
    %cst_30 = arith.constant dense<0xFF800000> : vector<32xf32>
    %92 = vector.multi_reduction <maximumf>, %91, %cst_30 [1] : vector<32x64xf32> to vector<32xf32>
    %93 = vector.shape_cast %92 : vector<32xf32> to vector<32x1xf32>
    %94 = vector.broadcast %93 : vector<32x1xf32> to vector<32x64xf32>
    %95 = arith.subf %91, %94 : vector<32x64xf32>
    %96 = math.exp %95 : vector<32x64xf32>
    %cst_31 = arith.constant dense<0.000000e+00> : vector<32xf32>
    %97 = vector.multi_reduction <add>, %96, %cst_31 [1] : vector<32x64xf32> to vector<32xf32>
    %98 = vector.shape_cast %97 : vector<32xf32> to vector<32x1xf32>
    %c0_32 = arith.constant 0 : index
    %c24 = arith.constant 24 : index
    %99 = vector.load %arg1[%c0_32, %c24] : memref<64x32xbf16, #tpu.memory_space<vmem>>, vector<64x8xbf16>
    %100 = arith.truncf %96 : vector<32x64xf32> to vector<32x64xbf16>
    %cst_33 = arith.constant dense<0.000000e+00> : vector<32x8xf32>
    %101 = tpu.matmul %100, %99, %cst_33 {dimension_numbers = #tpu.dot_dimension_numbers<[1], [0], [0], [1], [0, 0, 1, 1], [], []>} : vector<32x64xbf16>, vector<64x8xbf16>, vector<32x8xf32> -> vector<32x8xf32>
    %102 = tpu.reciprocal %98 {approx = true} : vector<32x1xf32> -> vector<32x1xf32>
    %103 = vector.broadcast %102 : vector<32x1xf32> to vector<32x8xf32>
    %104 = arith.mulf %101, %103 : vector<32x8xf32>
    %c0_34 = arith.constant 0 : index
    %c0_35 = arith.constant 0 : index
    %105 = vector.load %arg5[%c0_34, %c0_35] : memref<1x8xf32, #tpu.memory_space<vmem>>, vector<1x8xf32>
    %106 = arith.addf %29, %54 : vector<32x8xf32>
    %107 = arith.addf %106, %79 : vector<32x8xf32>
    %108 = arith.addf %107, %104 : vector<32x8xf32>
    %cst_36 = arith.constant 2.500000e-01 : f32
    %109 = vector.broadcast %cst_36 : f32 to vector<32x8xf32>
    %110 = arith.mulf %108, %109 : vector<32x8xf32>
    %111 = vector.broadcast %105 : vector<1x8xf32> to vector<32x8xf32>
    %112 = arith.addf %110, %111 : vector<32x8xf32>
    %c0_37 = arith.constant 0 : index
    %c0_38 = arith.constant 0 : index
    %113 = vector.load %arg6[%c0_37, %c0_38] : memref<32x8xf32, #tpu.memory_space<vmem>>, vector<32x8xf32>
    tpu.vector_store %arg6[%c0_37, %c0_38], %112 {strides = array<i32>} : memref<32x8xf32, #tpu.memory_space<vmem>>, vector<32x8xf32>,
    return
  }
  func.func @transform_0(%arg0: i32) -> (i32, i32) {
    %c0_i32 = arith.constant 0 : i32
    %c0_i32_0 = arith.constant 0 : i32
    %c0_i32_1 = arith.constant 0 : i32
    return %c0_i32, %c0_i32_0 : i32, i32
  }
  func.func @transform_1(%arg0: i32) -> (i32, i32) {
    %c0_i32 = arith.constant 0 : i32
    %c0_i32_0 = arith.constant 0 : i32
    %c0_i32_1 = arith.constant 0 : i32
    return %c0_i32, %c0_i32_0 : i32, i32
  }
  func.func @transform_2(%arg0: i32) -> (i32, i32) {
    %c0_i32 = arith.constant 0 : i32
    %c0_i32_0 = arith.constant 0 : i32
    return %arg0, %c0_i32 : i32, i32
  }
  func.func @transform_3(%arg0: i32) -> (i32, i32) {
    %c0_i32 = arith.constant 0 : i32
    %c0_i32_0 = arith.constant 0 : i32
    return %arg0, %c0_i32 : i32, i32
  }
  func.func @transform_4(%arg0: i32) -> (i32, i32) {
    %c0_i32 = arith.constant 0 : i32
    %c0_i32_0 = arith.constant 0 : i32
    %c0_i32_1 = arith.constant 0 : i32
    return %c0_i32, %c0_i32_0 : i32, i32
  }
  func.func @transform_5(%arg0: i32) -> (i32, i32) {
    %c0_i32 = arith.constant 0 : i32
    %c0_i32_0 = arith.constant 0 : i32
    return %arg0, %c0_i32 : i32, i32
  }
}

module attributes {stable_mosaic.version = 11 : i64} {
  func.func @gat_attn_kernel(%arg0: i32, %arg1: memref<64x32xbf16, #tpu.memory_space<vmem>>, %arg2: memref<4x64xf32, #tpu.memory_space<vmem>>, %arg3: memref<32x4xf32, #tpu.memory_space<vmem>>, %arg4: memref<32x64xbf16, #tpu.memory_space<vmem>>, %arg5: memref<1x32xf32, #tpu.memory_space<vmem>>, %arg6: memref<32x32xf32, #tpu.memory_space<vmem>>, %arg7: memref<32x32xf32, #tpu.memory_space<vmem>>) attributes {dimension_semantics = [#tpu.dimension_semantics<parallel>], iteration_bounds = array<i64: 2>, scalar_prefetch = 0 : i64, scratch_operands = 0 : i64, tpu.core_type = #tpu.core_type<tc>, window_params = [{pipeline_mode = #tpu.pipeline_mode<synchronous>, transform_indices = @transform_0, window_bounds = array<i64: 64, 32>}, {pipeline_mode = #tpu.pipeline_mode<synchronous>, transform_indices = @transform_1, window_bounds = array<i64: 4, 64>}, {transform_indices = @transform_2, window_bounds = array<i64: 32, 4>}, {transform_indices = @transform_3, window_bounds = array<i64: 32, 64>}, {pipeline_mode = #tpu.pipeline_mode<synchronous>, transform_indices = @transform_4, window_bounds = array<i64: 1, 32>}, {transform_indices = @transform_5, window_bounds = array<i64: 32, 32>}, {transform_indices = @transform_6, window_bounds = array<i64: 32, 32>}]} {
    %c0 = arith.constant 0 : index
    %c0_0 = arith.constant 0 : index
    %0 = vector.load %arg4[%c0, %c0_0] : memref<32x64xbf16, #tpu.memory_space<vmem>>, vector<32x64xbf16>
    %cst = arith.constant 0.000000e+00 : bf16
    %1 = vector.broadcast %cst : bf16 to vector<32x64xbf16>
    %2 = arith.cmpf ogt, %0, %1 : vector<32x64xbf16>
    %c0_1 = arith.constant 0 : index
    %c0_2 = arith.constant 0 : index
    %3 = vector.load %arg3[%c0_1, %c0_2] : memref<32x4xf32, #tpu.memory_space<vmem>>, vector<32x4xf32>
    %c0_3 = arith.constant 0 : index
    %c0_4 = arith.constant 0 : index
    %4 = vector.load %arg2[%c0_3, %c0_4] : memref<4x64xf32, #tpu.memory_space<vmem>>, vector<4x64xf32>
    %5 = vector.extract_strided_slice %3 {offsets = [0, 0], sizes = [32, 1], strides = [1, 1]} : vector<32x4xf32> to vector<32x1xf32>
    %6 = vector.extract_strided_slice %4 {offsets = [0, 0], sizes = [1, 64], strides = [1, 1]} : vector<4x64xf32> to vector<1x64xf32>
    %7 = vector.broadcast %5 : vector<32x1xf32> to vector<32x64xf32>
    %8 = vector.broadcast %6 : vector<1x64xf32> to vector<32x64xf32>
    %9 = arith.addf %7, %8 : vector<32x64xf32>
    %cst_5 = arith.constant 0.000000e+00 : f32
    %10 = vector.broadcast %cst_5 : f32 to vector<32x64xf32>
    %11 = arith.cmpf ogt, %9, %10 : vector<32x64xf32>
    %cst_6 = arith.constant 2.000000e-01 : f32
    %12 = vector.broadcast %cst_6 : f32 to vector<32x64xf32>
    %13 = arith.mulf %12, %9 : vector<32x64xf32>
    %14 = arith.select %11, %9, %13 : vector<32x64xi1>, vector<32x64xf32>
    %cst_7 = arith.constant -1.000000e+30 : f32
    %15 = vector.broadcast %cst_7 : f32 to vector<32x64xf32>
    %16 = arith.select %2, %14, %15 : vector<32x64xi1>, vector<32x64xf32>
    %cst_8 = arith.constant dense<0xFF800000> : vector<32xf32>
    %17 = vector.multi_reduction <maximumf>, %16, %cst_8 [1] : vector<32x64xf32> to vector<32xf32>
    %18 = vector.shape_cast %17 : vector<32xf32> to vector<32x1xf32>
    %19 = vector.broadcast %18 : vector<32x1xf32> to vector<32x64xf32>
    %20 = arith.subf %16, %19 : vector<32x64xf32>
    %21 = math.exp %20 : vector<32x64xf32>
    %cst_9 = arith.constant dense<0.000000e+00> : vector<32xf32>
    %22 = vector.multi_reduction <add>, %21, %cst_9 [1] : vector<32x64xf32> to vector<32xf32>
    %23 = vector.shape_cast %22 : vector<32xf32> to vector<32x1xf32>
    %c0_10 = arith.constant 0 : index
    %c0_11 = arith.constant 0 : index
    %24 = vector.load %arg1[%c0_10, %c0_11] : memref<64x32xbf16, #tpu.memory_space<vmem>>, vector<64x8xbf16>
    %25 = arith.truncf %21 : vector<32x64xf32> to vector<32x64xbf16>
    %cst_12 = arith.constant dense<0.000000e+00> : vector<32x8xf32>
    %26 = tpu.matmul %25, %24, %cst_12 {dimension_numbers = #tpu.dot_dimension_numbers<[1], [0], [0], [1], [0, 0, 1, 1], [], []>} : vector<32x64xbf16>, vector<64x8xbf16>, vector<32x8xf32> -> vector<32x8xf32>
    %27 = tpu.reciprocal %23 {approx = true} : vector<32x1xf32> -> vector<32x1xf32>
    %28 = vector.broadcast %27 : vector<32x1xf32> to vector<32x8xf32>
    %29 = arith.mulf %26, %28 : vector<32x8xf32>
    %30 = vector.extract_strided_slice %3 {offsets = [0, 1], sizes = [32, 1], strides = [1, 1]} : vector<32x4xf32> to vector<32x1xf32>
    %31 = vector.extract_strided_slice %4 {offsets = [1, 0], sizes = [1, 64], strides = [1, 1]} : vector<4x64xf32> to vector<1x64xf32>
    %32 = vector.broadcast %30 : vector<32x1xf32> to vector<32x64xf32>
    %33 = vector.broadcast %31 : vector<1x64xf32> to vector<32x64xf32>
    %34 = arith.addf %32, %33 : vector<32x64xf32>
    %cst_13 = arith.constant 0.000000e+00 : f32
    %35 = vector.broadcast %cst_13 : f32 to vector<32x64xf32>
    %36 = arith.cmpf ogt, %34, %35 : vector<32x64xf32>
    %cst_14 = arith.constant 2.000000e-01 : f32
    %37 = vector.broadcast %cst_14 : f32 to vector<32x64xf32>
    %38 = arith.mulf %37, %34 : vector<32x64xf32>
    %39 = arith.select %36, %34, %38 : vector<32x64xi1>, vector<32x64xf32>
    %cst_15 = arith.constant -1.000000e+30 : f32
    %40 = vector.broadcast %cst_15 : f32 to vector<32x64xf32>
    %41 = arith.select %2, %39, %40 : vector<32x64xi1>, vector<32x64xf32>
    %cst_16 = arith.constant dense<0xFF800000> : vector<32xf32>
    %42 = vector.multi_reduction <maximumf>, %41, %cst_16 [1] : vector<32x64xf32> to vector<32xf32>
    %43 = vector.shape_cast %42 : vector<32xf32> to vector<32x1xf32>
    %44 = vector.broadcast %43 : vector<32x1xf32> to vector<32x64xf32>
    %45 = arith.subf %41, %44 : vector<32x64xf32>
    %46 = math.exp %45 : vector<32x64xf32>
    %cst_17 = arith.constant dense<0.000000e+00> : vector<32xf32>
    %47 = vector.multi_reduction <add>, %46, %cst_17 [1] : vector<32x64xf32> to vector<32xf32>
    %48 = vector.shape_cast %47 : vector<32xf32> to vector<32x1xf32>
    %c0_18 = arith.constant 0 : index
    %c8 = arith.constant 8 : index
    %49 = vector.load %arg1[%c0_18, %c8] : memref<64x32xbf16, #tpu.memory_space<vmem>>, vector<64x8xbf16>
    %50 = arith.truncf %46 : vector<32x64xf32> to vector<32x64xbf16>
    %cst_19 = arith.constant dense<0.000000e+00> : vector<32x8xf32>
    %51 = tpu.matmul %50, %49, %cst_19 {dimension_numbers = #tpu.dot_dimension_numbers<[1], [0], [0], [1], [0, 0, 1, 1], [], []>} : vector<32x64xbf16>, vector<64x8xbf16>, vector<32x8xf32> -> vector<32x8xf32>
    %52 = tpu.reciprocal %48 {approx = true} : vector<32x1xf32> -> vector<32x1xf32>
    %53 = vector.broadcast %52 : vector<32x1xf32> to vector<32x8xf32>
    %54 = arith.mulf %51, %53 : vector<32x8xf32>
    %55 = vector.extract_strided_slice %3 {offsets = [0, 2], sizes = [32, 1], strides = [1, 1]} : vector<32x4xf32> to vector<32x1xf32>
    %56 = vector.extract_strided_slice %4 {offsets = [2, 0], sizes = [1, 64], strides = [1, 1]} : vector<4x64xf32> to vector<1x64xf32>
    %57 = vector.broadcast %55 : vector<32x1xf32> to vector<32x64xf32>
    %58 = vector.broadcast %56 : vector<1x64xf32> to vector<32x64xf32>
    %59 = arith.addf %57, %58 : vector<32x64xf32>
    %cst_20 = arith.constant 0.000000e+00 : f32
    %60 = vector.broadcast %cst_20 : f32 to vector<32x64xf32>
    %61 = arith.cmpf ogt, %59, %60 : vector<32x64xf32>
    %cst_21 = arith.constant 2.000000e-01 : f32
    %62 = vector.broadcast %cst_21 : f32 to vector<32x64xf32>
    %63 = arith.mulf %62, %59 : vector<32x64xf32>
    %64 = arith.select %61, %59, %63 : vector<32x64xi1>, vector<32x64xf32>
    %cst_22 = arith.constant -1.000000e+30 : f32
    %65 = vector.broadcast %cst_22 : f32 to vector<32x64xf32>
    %66 = arith.select %2, %64, %65 : vector<32x64xi1>, vector<32x64xf32>
    %cst_23 = arith.constant dense<0xFF800000> : vector<32xf32>
    %67 = vector.multi_reduction <maximumf>, %66, %cst_23 [1] : vector<32x64xf32> to vector<32xf32>
    %68 = vector.shape_cast %67 : vector<32xf32> to vector<32x1xf32>
    %69 = vector.broadcast %68 : vector<32x1xf32> to vector<32x64xf32>
    %70 = arith.subf %66, %69 : vector<32x64xf32>
    %71 = math.exp %70 : vector<32x64xf32>
    %cst_24 = arith.constant dense<0.000000e+00> : vector<32xf32>
    %72 = vector.multi_reduction <add>, %71, %cst_24 [1] : vector<32x64xf32> to vector<32xf32>
    %73 = vector.shape_cast %72 : vector<32xf32> to vector<32x1xf32>
    %c0_25 = arith.constant 0 : index
    %c16 = arith.constant 16 : index
    %74 = vector.load %arg1[%c0_25, %c16] : memref<64x32xbf16, #tpu.memory_space<vmem>>, vector<64x8xbf16>
    %75 = arith.truncf %71 : vector<32x64xf32> to vector<32x64xbf16>
    %cst_26 = arith.constant dense<0.000000e+00> : vector<32x8xf32>
    %76 = tpu.matmul %75, %74, %cst_26 {dimension_numbers = #tpu.dot_dimension_numbers<[1], [0], [0], [1], [0, 0, 1, 1], [], []>} : vector<32x64xbf16>, vector<64x8xbf16>, vector<32x8xf32> -> vector<32x8xf32>
    %77 = tpu.reciprocal %73 {approx = true} : vector<32x1xf32> -> vector<32x1xf32>
    %78 = vector.broadcast %77 : vector<32x1xf32> to vector<32x8xf32>
    %79 = arith.mulf %76, %78 : vector<32x8xf32>
    %80 = vector.extract_strided_slice %3 {offsets = [0, 3], sizes = [32, 1], strides = [1, 1]} : vector<32x4xf32> to vector<32x1xf32>
    %81 = vector.extract_strided_slice %4 {offsets = [3, 0], sizes = [1, 64], strides = [1, 1]} : vector<4x64xf32> to vector<1x64xf32>
    %82 = vector.broadcast %80 : vector<32x1xf32> to vector<32x64xf32>
    %83 = vector.broadcast %81 : vector<1x64xf32> to vector<32x64xf32>
    %84 = arith.addf %82, %83 : vector<32x64xf32>
    %cst_27 = arith.constant 0.000000e+00 : f32
    %85 = vector.broadcast %cst_27 : f32 to vector<32x64xf32>
    %86 = arith.cmpf ogt, %84, %85 : vector<32x64xf32>
    %cst_28 = arith.constant 2.000000e-01 : f32
    %87 = vector.broadcast %cst_28 : f32 to vector<32x64xf32>
    %88 = arith.mulf %87, %84 : vector<32x64xf32>
    %89 = arith.select %86, %84, %88 : vector<32x64xi1>, vector<32x64xf32>
    %cst_29 = arith.constant -1.000000e+30 : f32
    %90 = vector.broadcast %cst_29 : f32 to vector<32x64xf32>
    %91 = arith.select %2, %89, %90 : vector<32x64xi1>, vector<32x64xf32>
    %cst_30 = arith.constant dense<0xFF800000> : vector<32xf32>
    %92 = vector.multi_reduction <maximumf>, %91, %cst_30 [1] : vector<32x64xf32> to vector<32xf32>
    %93 = vector.shape_cast %92 : vector<32xf32> to vector<32x1xf32>
    %94 = vector.broadcast %93 : vector<32x1xf32> to vector<32x64xf32>
    %95 = arith.subf %91, %94 : vector<32x64xf32>
    %96 = math.exp %95 : vector<32x64xf32>
    %cst_31 = arith.constant dense<0.000000e+00> : vector<32xf32>
    %97 = vector.multi_reduction <add>, %96, %cst_31 [1] : vector<32x64xf32> to vector<32xf32>
    %98 = vector.shape_cast %97 : vector<32xf32> to vector<32x1xf32>
    %c0_32 = arith.constant 0 : index
    %c24 = arith.constant 24 : index
    %99 = vector.load %arg1[%c0_32, %c24] : memref<64x32xbf16, #tpu.memory_space<vmem>>, vector<64x8xbf16>
    %100 = arith.truncf %96 : vector<32x64xf32> to vector<32x64xbf16>
    %cst_33 = arith.constant dense<0.000000e+00> : vector<32x8xf32>
    %101 = tpu.matmul %100, %99, %cst_33 {dimension_numbers = #tpu.dot_dimension_numbers<[1], [0], [0], [1], [0, 0, 1, 1], [], []>} : vector<32x64xbf16>, vector<64x8xbf16>, vector<32x8xf32> -> vector<32x8xf32>
    %102 = tpu.reciprocal %98 {approx = true} : vector<32x1xf32> -> vector<32x1xf32>
    %103 = vector.broadcast %102 : vector<32x1xf32> to vector<32x8xf32>
    %104 = arith.mulf %101, %103 : vector<32x8xf32>
    %c0_34 = arith.constant 0 : index
    %c0_35 = arith.constant 0 : index
    %105 = vector.load %arg5[%c0_34, %c0_35] : memref<1x32xf32, #tpu.memory_space<vmem>>, vector<1x32xf32>
    %106 = tpu.concatenate %29, %54, %79, %104 in 1 : vector<32x8xf32>, vector<32x8xf32>, vector<32x8xf32>, vector<32x8xf32> -> vector<32x32xf32>
    %107 = vector.broadcast %105 : vector<1x32xf32> to vector<32x32xf32>
    %108 = arith.addf %106, %107 : vector<32x32xf32>
    %cst_36 = arith.constant 0.000000e+00 : f32
    %109 = vector.broadcast %cst_36 : f32 to vector<32x32xf32>
    %110 = arith.maximumf %108, %109 : vector<32x32xf32>
    %c0_37 = arith.constant 0 : index
    %c0_38 = arith.constant 0 : index
    %111 = vector.load %arg6[%c0_37, %c0_38] : memref<32x32xf32, #tpu.memory_space<vmem>>, vector<32x32xf32>
    %112 = arith.addf %110, %111 : vector<32x32xf32>
    %c0_39 = arith.constant 0 : index
    %c0_40 = arith.constant 0 : index
    %113 = vector.load %arg7[%c0_39, %c0_40] : memref<32x32xf32, #tpu.memory_space<vmem>>, vector<32x32xf32>
    tpu.vector_store %arg7[%c0_39, %c0_40], %112 {strides = array<i32>} : memref<32x32xf32, #tpu.memory_space<vmem>>, vector<32x32xf32>,
    return
  }
  func.func @transform_0(%arg0: i32) -> (i32, i32) {
    %c0_i32 = arith.constant 0 : i32
    %c0_i32_0 = arith.constant 0 : i32
    %c0_i32_1 = arith.constant 0 : i32
    return %c0_i32, %c0_i32_0 : i32, i32
  }
  func.func @transform_1(%arg0: i32) -> (i32, i32) {
    %c0_i32 = arith.constant 0 : i32
    %c0_i32_0 = arith.constant 0 : i32
    %c0_i32_1 = arith.constant 0 : i32
    return %c0_i32, %c0_i32_0 : i32, i32
  }
  func.func @transform_2(%arg0: i32) -> (i32, i32) {
    %c0_i32 = arith.constant 0 : i32
    %c0_i32_0 = arith.constant 0 : i32
    return %arg0, %c0_i32 : i32, i32
  }
  func.func @transform_3(%arg0: i32) -> (i32, i32) {
    %c0_i32 = arith.constant 0 : i32
    %c0_i32_0 = arith.constant 0 : i32
    return %arg0, %c0_i32 : i32, i32
  }
  func.func @transform_4(%arg0: i32) -> (i32, i32) {
    %c0_i32 = arith.constant 0 : i32
    %c0_i32_0 = arith.constant 0 : i32
    %c0_i32_1 = arith.constant 0 : i32
    return %c0_i32, %c0_i32_0 : i32, i32
  }
  func.func @transform_5(%arg0: i32) -> (i32, i32) {
    %c0_i32 = arith.constant 0 : i32
    %c0_i32_0 = arith.constant 0 : i32
    return %arg0, %c0_i32 : i32, i32
  }
  func.func @transform_6(%arg0: i32) -> (i32, i32) {
    %c0_i32 = arith.constant 0 : i32
    %c0_i32_0 = arith.constant 0 : i32
    return %arg0, %c0_i32 : i32, i32
  }
}

</mosaic_0001>

<bundles_post_ra>
// kernel: gat_forward.12
= control target key start
LH: loop header
LB: loop body
LE: loop exit
PB: predicated region body
PF: predicated region fallthrough
CT: control target
= control target key end

     0   :  { %s500_s12 = smov 0   ;;  %s539_s0 = inlined_call_operand.vmem [shape: f32[64,8], index: 0, kind: input, shape index: {}]   ;;  %s540_s1 = inlined_call_operand.vmem [shape: f32[8,40], index: 1, kind: input, shape index: {}]   ;;  %s541_s2 = inlined_call_operand.vmem [shape: bf16[64,32], index: 2, kind: output, shape index: {0}]   ;;  %s542_s3 = inlined_call_operand.vmem [shape: f32[64,8], index: 3, kind: output, shape index: {1}]  }
   0x1 LB: > { %s422_s13 = sadd.s32 4294967295, %s477_s12   ;;  %p426_p0 = scmp.ge.s32.totalorder %s477_s12, 1  ;;  %s477_s12 = sphi %s500_s12, %s14_s12  }
   0x2   : > { %p141_p1 = scmp.lt.s32.totalorder %s477_s12, 3 }
   0x4   : > { %p142_p2 = pnand %p426_p0, %p141_p1 }
   0x5   : > { %s427_s16 = sshll.u32 (!%p142_p2), %s422_s13, 2  ;;  %s479_s25 = smov (!%p142_p2), 96  }
   0x6   : > { %145 = sbr.rel (%p142_p2) target bundleno = 331 (0x14b), region = 28  ;;  %p171_p3 = scmp.lt.s32.totalorder (!%p142_p2), %s427_s16, 7 }
   0xb   : > { %v192_v0 = vld [vmem:[%s540_s1] sm:$0xff]  ;;  %s544_s16 = smov (!%p171_p3, %s427_s16), 7  ;;  %vm193_vm0 = vcmask 64512   ;;  %vm307_vm1 = vcmask 257024  }
   0xc   : > { %452 = vmatprep.subr.mxu0 %v192_v0  ;;  %460 = vmatprep.subr.mxu1 %v192_v0  ;;  %s428_s17 = sshll.u32 %s544_s16, 3  ;;  %s430_s21 = sshll.u32 %s544_s16, 2 }
   0xd   : > { %453 = vmatpush3.msra.mxu0 %v192_v0  ;;  %461 = vmatpush3.msra.mxu1 %v192_v0  ;;  %s174_s20 = scalar_lea.vmem %s539_s0, %s428_s17  ;;  %s180_s24 = scalar_lea.vmem %s541_s2, %s430_s21 }
   0xe   : > { %v188_v1 = vld [vmem:[%s174_s20] sm:$0xff]  ;;  %v190_v2 = vld [vmem:[%s174_s20 + $0x10] sm:$0xff]  ;;  %v189_v3 = vld [vmem:[%s174_s20 + $0x8] sm:$0xff]  ;;  %s186_s28 = scalar_lea.vmem %s542_s3, %s428_s17 }
   0xf   : > { %454 = vmatprep.mubr.msk.f32.mxu0 %vm193_vm0, %v188_v1  ;;  %457 = vmatprep.mubr.msk.f32.mxu1 %vm193_vm0, %v190_v2  ;;  %v191_v4 = vld [vmem:[%s174_s20 + $0x18] sm:$0xff] }
  0x10   : > { %455 = vmatmul.mubr.msk.f32.vlgmr.msra.gmra.mxu0 %vm193_vm0, %v189_v3  ;;  %458 = vmatmul.mubr.msk.f32.vlgmr.msra.gmra.mxu1 %vm193_vm0, %v191_v4 }
  0xd0   : > { %v456_v5 = vpop.f32.mrf.mxu0  ;;  %v459_v6 = vpop.f32.mrf.mxu1 }
  0xd1   : > { %v444_v10 = vpack.c.bf16 %v456_v5, %v456_v5  ;;  %v446_v12 = vpack.c.bf16 %v459_v6, %v459_v6 }
  0xd2   : > { %v272_v7 = vpop.f32.mrf.mxu0  ;;  %v282_v8 = vpop.f32.mrf.mxu1 }
  0xd3   : > { %v443_v9 = vpack.c.bf16 %v272_v7, %v272_v7  ;;  %320 = vrot.lane.b32.xlu1 %v282_v8, %s479_s25  ;;  %316 = vrot.lane.b32.xlu0 %v272_v7, %s479_s25  ;;  %v445_v11 = vpack.c.bf16 %v282_v8, %v282_v8  ;;  %309 = vst.msk [vmem:[%s180_s24 + $0x4] sm:$0xf] %vm307_vm1, %v444_v10  ;;  %311 = vst.msk [vmem:[%s180_s24 + $0xc] sm:$0xf] %vm307_vm1, %v446_v12 }
  0xd5   : > { %308 = vst.msk [vmem:[%s180_s24] sm:$0xf] %vm307_vm1, %v443_v9  ;;  %310 = vst.msk [vmem:[%s180_s24 + $0x8] sm:$0xf] %vm307_vm1, %v445_v11 }
  0xd7   : > { %322 = vrot.lane.b32.xlu1 %v459_v6, %s479_s25  ;;  %318 = vrot.lane.b32.xlu0 %v456_v5, %s479_s25 }
 0x145   : > { %v321_v13 = vpop.permute.xlu1 %320  ;;  %v317_v14 = vpop.permute.xlu0 %316 }
 0x146   : > { %328 = vst.msk [vmem:[%s186_s28] sm:$0xff] %vm193_vm0, %v317_v14  ;;  %330 = vst.msk [vmem:[%s186_s28 + $0x10] sm:$0xff] %vm193_vm0, %v321_v13 }
 0x149   : > { %v319_v15 = vpop.permute.xlu0 %318  ;;  %v323_v16 = vpop.permute.xlu1 %322 }
 0x14a   : > { %329 = vst.msk [vmem:[%s186_s28 + $0x8] sm:$0xff] %vm193_vm0, %v319_v15  ;;  %331 = vst.msk [vmem:[%s186_s28 + $0x18] sm:$0xff] %vm193_vm0, %v323_v16 }
 0x14b PF: > { %s14_s12 = sadd.s32 1, %s477_s12  }
 0x14c   : > { %p11_p4 = scmp.ge.s32.totalorder %s14_s12, 4  }
 0x14e   :  { %13 = sbr.rel (!%p11_p4) target bundleno = 1 (0x1), region = 70 }

// kernel: gat_forward.13
= control target key start
LH: loop header
LB: loop body
LE: loop exit
PB: predicated region body
PF: predicated region fallthrough
CT: control target
= control target key end

     0   :  { %s1616_s21 = smov 0   ;;  %s1618_s22 = smov 0   ;;  %s1996_s0 = inlined_call_operand.vmem [shape: bf16[64,32], index: 0, kind: input, shape index: {}]   ;;  %s1997_s1 = inlined_call_operand.vmem [shape: f32[4,64], index: 1, kind: input, shape index: {}]   ;;  %s1998_s2 = inlined_call_operand.vmem [shape: f32[64,4], index: 2, kind: input, shape index: {}]   ;;  %s1999_s3 = inlined_call_operand.vmem [shape: bf16[64,64], index: 3, kind: input, shape index: {}]   ;;  %s2000_s4 = inlined_call_operand.vmem [shape: bf16[4,64,64], index: 4, kind: input, shape index: {}]   ;;  %s2001_s5 = inlined_call_operand.vmem [shape: f32[1,32], index: 5, kind: input, shape index: {}]   ;;  %s2002_s6 = inlined_call_operand.vmem [shape: f32[64,32], index: 6, kind: output, shape index: {}]  }
   0x1   :  { %s1620_s23 = smov 0  }
   0x2 LB: > { %s1283_s24 = sadd.s32 4294967295, %s1569_s23   ;;  %s1633_s25 = sadd.s32 1, %s1569_s23   ;;  %s1569_s23 = sphi %s1620_s23, %s2013_s23   ;;  %s1565_s22 = sphi %s1618_s22, %s2012_s22   ;;  %s1561_s21 = sphi %s1616_s21, %s2011_s21  }
   0x3   : > { %s114_s26 = ssub.s32 %s1569_s23, %s1633_s25  ;;  %s117_s27 = sadd.s32 1, %s1565_s22 }
   0x4   : > { %p115_p0 = scmp.eq.s32.totalorder %s114_s26, 0  ;;  %p124_p1 = scmp.ne.s32.totalorder %s1565_s22, %s1561_s21 }
   0x5   : > { %p125_p2 = scmp.eq.s32.totalorder %s1569_s23, 0  ;;  %p1286_p4 = scmp.ge.s32.totalorder %s1569_s23, 2 }
   0x6   : > { %s1642_s28 = scalar_select %p115_p0, %s1565_s22, %s117_s27  }
   0x7   : > { %p126_p3 = por %p125_p2, %p124_p1  ;;  %206 = sbr.rel (%p1286_p4) target bundleno = 20 (0x14), region = 28 }
   0xc   : > { %227 = sbr.rel (!%p126_p3) target bundleno = 20 (0x14), region = 40  ;;  %s229_s29 = sand.u32 (%p126_p3), 1, %s1565_s22  }
   0xd   : > { %s1325_s30 = sshll.u32 (%p126_p3), %s1569_s23, 4  ;;  %s1287_s7 = sshll.u32 (%p126_p3), %s229_s29, 6 }
   0xe   : > { %s234_s10 = scalar_lea.vmem (%p126_p3), %s2000_s4, %s1325_s30  ;;  %s231_s11 = scalar_lea.vmem (%p126_p3), [#allocation2], %s1287_s7 }
   0xf   : > { %v251_v0 = vld [vmem:[%s234_s10] sm:$0xff] (%p126_p3)   ;;  %v255_v1 = vld [vmem:[%s234_s10 + $0x8] sm:$0xff] (%p126_p3)  }
  0x10   : > { %v259_v2 = vld [vmem:[%s234_s10 + $0x20] sm:$0xff] (%p126_p3)   ;;  %252 = vst [vmem:[%s231_s11] sm:$0xff] (%p126_p3), %v251_v0   ;;  %256 = vst [vmem:[%s231_s11 + $0x8] sm:$0xff] (%p126_p3), %v255_v1   ;;  %v263_v3 = vld [vmem:[%s234_s10 + $0x28] sm:$0xff] (%p126_p3)  }
  0x11   : > { %260 = vst [vmem:[%s231_s11 + $0x10] sm:$0xff] %v259_v2   ;;  %v267_v4 = vld [vmem:[%s234_s10 + $0x40] sm:$0xff]   ;;  %v271_v5 = vld [vmem:[%s234_s10 + $0x48] sm:$0xff]   ;;  %264 = vst [vmem:[%s231_s11 + $0x18] sm:$0xff] %v263_v3  }
  0x12   : > { %268 = vst [vmem:[%s231_s11 + $0x20] sm:$0xff] %v267_v4   ;;  %272 = vst [vmem:[%s231_s11 + $0x28] sm:$0xff] %v271_v5   ;;  %v275_v6 = vld [vmem:[%s234_s10 + $0x60] sm:$0xff]   ;;  %v279_v7 = vld [vmem:[%s234_s10 + $0x68] sm:$0xff]  }
  0x13   : > { %276 = vst [vmem:[%s231_s11 + $0x30] sm:$0xff] %v275_v6   ;;  %280 = vst [vmem:[%s231_s11 + $0x38] sm:$0xff] %v279_v7  }
  0x14 PF: > { %p1290_p5 = scmp.ge.s32.totalorder %s1569_s23, 1  ;;  %p337_p6 = scmp.lt.s32.totalorder %s1569_s23, 3 }
  0x16   : > { %p338_p7 = pnand %p1290_p5, %p337_p6 }
  0x17   : > { %s1292_s12 = sshll.u32 (!%p338_p7), %s1283_s24, 2  ;;  %s1575_s9 = smov (!%p338_p7), 120  }
  0x18   : > { %341 = sbr.rel (%p338_p7) target bundleno = 687 (0x2af), region = 81  ;;  %p384_p8 = scmp.lt.s32.totalorder (!%p338_p7), %s1292_s12, 7 }
  0x19   : > { %s1576_s10 = smov (!%p338_p7), 112   ;;  %s1577_s11 = smov (!%p338_p7), 104  }
  0x1a   : > { %s344_s13 = sand.u32 (!%p338_p7), 1, %s1561_s21   ;;  %s1578_s21 = smov (!%p338_p7), 8  }
  0x1b   : > { %s1291_s14 = sshll.u32 (!%p338_p7), %s344_s13, 6  ;;  %s1579_s19 = smov (!%p338_p7), 16  }
  0x1c   : > { %s1720_s18 = scalar_lea.vmem (!%p338_p7), [#allocation2], %s1291_s14 }
  0x1d   : > { %v1571_v8 = vmov 0   ;;  %v1657_v9 = vld [vmem:[%s1996_s0 + $0x18] sm:$0xff]   ;;  %s2015_s12 = smov (!%p384_p8, %s1292_s12), 7  ;;  %v1664_v10 = vld [vmem:[%s1996_s0 + $0x10] sm:$0xff]   ;;  %v1481_v13 = vld [vmem:[%s1996_s0 + $0x8] sm:$0xff]   ;;  %v1572_v25 = vmov 1   ;;  %v438_v28 = vlaneseq }
  0x1e   : > { %1472 = vset.pattern.permute.xlu1 %v1571_v8  ;;  %1471 = vset.pattern.permute.xlu0 %v1571_v8  ;;  %s1293_s17 = sshll.u32 %s2015_s12, 3  ;;  %s1295_s23 = sshll.u32 %s2015_s12, 2  ;;  %v1686_v20 = vld [vmem:[%s1996_s0] sm:$0xff]   ;;  %v1573_v26 = vmov 2   ;;  %v1574_v27 = vmov 3   ;;  %v1358_v32 = vld [vmem:[%s1720_s18 + $0x8] sm:$0xff]  }
  0x1f   : > { %1389 = vmatprep.subr.bf16.mxu0 %v1657_v9  ;;  %s387_s20 = scalar_lea.vmem %s1998_s2, %s1293_s17  ;;  %s393_s30 = scalar_lea.vmem %s1999_s3, %s1295_s23  ;;  %v1712_v29 = vshrl.u32 %v438_v28, 7  ;;  %v1718_v31 = vld [vmem:[%s1997_s1] sm:$0xf]  ;;  %v1332_v35 = vunpack.c.l.bf16 %v1358_v32  ;;  %v1333_v43 = vunpack.c.h.bf16 %v1358_v32  ;;  %v1359_v48 = vld [vmem:[%s1720_s18 + $0x10] sm:$0xff]   ;;  %vm486_vm6 = vcmask 523264   ;;  %v1360_v1 = vld [vmem:[%s1720_s18 + $0x18] sm:$0xff]  }
  0x20   : > { %1390 = vmatpush3.bf16.msra.mxu0 %v1657_v9  ;;  %v415_v11 = vld [vmem:[%s387_s20 + $0x10] sm:$0xff]  ;;  %v413_v12 = vld [vmem:[%s387_s20] sm:$0xff]  ;;  %v416_v14 = vld [vmem:[%s387_s20 + $0x18] sm:$0xff]  ;;  %v1337_v58 = vunpack.c.h.bf16 %v1359_v48  ;;  %v1336_v59 = vunpack.c.l.bf16 %v1359_v48  ;;  %s400_s29 = scalar_lea.vmem %s2002_s6, %s1293_s17 }
  0x21   : > { %1391 = vmatprep.subr.bf16.mxu0 %v1664_v10  ;;  %430 = vperm.xlu1 %1472, %v415_v11   ;;  %v414_v15 = vld [vmem:[%s387_s20 + $0x8] sm:$0xff]  ;;  %v405_v16 = vld [vmem:[%s393_s30] sm:$0xf]  ;;  %v406_v17 = vld [vmem:[%s393_s30 + $0x4] sm:$0xf]  ;;  %v440_v30 = vsub.s32 0, %v1712_v29 }
  0x22   : > { %420 = vperm.xlu0 %1471, %v413_v12   ;;  %v408_v18 = vld [vmem:[%s393_s30 + $0xc] sm:$0xf]  ;;  %v407_v19 = vld [vmem:[%s393_s30 + $0x8] sm:$0xf]  ;;  %vm409_vm0 = vcmp.gt.bf16.partialorder %v405_v16, 0  ;;  %vm410_vm1 = vcmp.gt.bf16.partialorder %v406_v17, 0 }
  0x23   : > { %v1688_v21 = vsel %vm409_vm0, 65537, %v1571_v8  ;;  %v1690_v22 = vsel %vm410_vm1, 65537, %v1571_v8  ;;  %vm412_vm2 = vcmp.gt.bf16.partialorder %v408_v18, 0  ;;  %vm411_vm3 = vcmp.gt.bf16.partialorder %v407_v19, 0  ;;  %v1327_v33 = vld [vmem:[%s1720_s18] sm:$0xff]   ;;  %s1580_s20 = smov 24  }
  0x24   : > { %1392 = vmatpush3.bf16.msra.mxu0 %v1664_v10  ;;  %v1692_v23 = vsel %vm412_vm2, 65537, %v1571_v8  ;;  %v1694_v24 = vsel %vm411_vm3, 65537, %v1571_v8  ;;  %v441_v34 = vrot.slane %v1718_v31, %v440_v30  ;;  %v1328_v36 = vunpack.c.l.bf16 %v1327_v33 }
  0x25   : > { %1393 = vmatprep.subr.bf16.mxu0 %v1481_v13  ;;  %435 = vperm.xlu1 %1472, %v416_v14   ;;  %v638_v37 = vsub.s32 1, %v1712_v29  ;;  %v474_v40 = vunpack.c.l.b16 %v1688_v21  ;;  %v1329_v46 = vunpack.c.h.bf16 %v1327_v33  ;;  %v475_v52 = vunpack.c.l.b16 %v1690_v22 }
  0x26   : > { %425 = vperm.xlu0 %1471, %v414_v15   ;;  %v477_v53 = vunpack.c.l.b16 %v1692_v23  ;;  %v476_v54 = vunpack.c.l.b16 %v1694_v24  ;;  %v804_v16 = vsub.s32 2, %v1712_v29 }
  0x27   : > { %v639_v47 = vrot.slane %v1718_v31, %v638_v37  ;;  %vm1729_vm4 = vcmp.ne.s32.totalorder %v474_v40, 0  ;;  %vm1741_vm8 = vcmp.ne.s32.totalorder %v475_v52, 0 }
  0x28   : > { %1394 = vmatpush3.bf16.msra.mxu0 %v1481_v13  ;;  %vm1745_vm9 = vcmp.ne.s32.totalorder %v477_v53, 0  ;;  %vm1749_vm10 = vcmp.ne.s32.totalorder %v476_v54, 0  ;;  %v805_v33 = vrot.slane %v1718_v31, %v804_v16  ;;  %v1792_v53 = vld [vmem:[%s1720_s18 + $0x30] sm:$0xff]  }
  0x29   : > { %1395 = vmatprep.subr.bf16.mxu0 %v1686_v20  ;;  %1474 = vset.pattern.permute.xlu1 %v1572_v25 }
  0x2a   : > { %1473 = vset.pattern.permute.xlu0 %v1572_v25  ;;  %625 = vperm.xlu1 %1474, %v414_v15  }
  0x2b   : > { %621 = vperm.xlu0 %1473, %v413_v12  }
  0x2c   : > { %1396 = vmatpush3.bf16.msra.mxu0 %v1686_v20 }
  0x2e   : > { %629 = vperm.xlu1 %1474, %v415_v11  }
  0x2f   : > { %633 = vperm.xlu0 %1473, %v416_v14  }
  0x32   : > { %1475 = vset.pattern.permute.xlu1 %v1573_v26 }
  0x33   : > { %1476 = vset.pattern.permute.xlu0 %v1573_v26  ;;  %787 = vperm.xlu1 %1475, %v413_v12   ;;  %v1361_v26 = vld [vmem:[%s1720_s18 + $0x20] sm:$0xff]  }
  0x34   : > { %791 = vperm.xlu0 %1476, %v414_v15   ;;  %v1345_v40 = vunpack.c.h.bf16 %v1361_v26 }
  0x37   : > { %795 = vperm.xlu1 %1475, %v415_v11  }
  0x38   : > { %1477 = vset.pattern.permute.xlu0 %v1574_v27 }
  0x39   : > { %953 = vperm.xlu0 %1477, %v413_v12  }
  0x3b   : > { %799 = vperm.xlu1 %1475, %v416_v14  }
  0x3d   : > { %965 = vperm.xlu0 %1477, %v416_v14   ;;  %v1341_v14 = vunpack.c.h.bf16 %v1360_v1 }
  0x3f   : > { %1478 = vset.pattern.permute.xlu1 %v1574_v27 }
  0x40   : > { %957 = vperm.xlu1 %1478, %v414_v15  }
  0x41   : > { %717 = vrot.lane.b32.xlu0 %v1657_v9, %s1575_s9 }
  0x44   : > { %961 = vperm.xlu1 %1478, %v415_v11  }
  0x45   : > { %713 = vrot.lane.b32.xlu0 %v1481_v13, %s1575_s9 }
  0x48   : > { %715 = vrot.lane.b32.xlu1 %v1664_v10, %s1575_s9 }
  0x49   : > { %711 = vrot.lane.b32.xlu0 %v1686_v20, %s1575_s9 }
  0x4c   : > { %883 = vrot.lane.b32.xlu1 %v1657_v9, %s1576_s10 }
  0x4d   : > { %1049 = vrot.lane.b32.xlu0 %v1657_v9, %s1577_s11 }
  0x50   : > { %881 = vrot.lane.b32.xlu1 %v1664_v10, %s1576_s10 }
  0x51   : > { %1047 = vrot.lane.b32.xlu0 %v1664_v10, %s1577_s11 }
  0x54   : > { %879 = vrot.lane.b32.xlu1 %v1481_v13, %s1576_s10 }
  0x55   : > { %1045 = vrot.lane.b32.xlu0 %v1481_v13, %s1577_s11  ;;  %v1340_v13 = vunpack.c.l.bf16 %v1360_v1 }
  0x9c   : > { %v431_v38 = vpop.permute.xlu1 %430 }
  0x9d   : > { %v421_v39 = vpop.permute.xlu0 %420  ;;  %v444_v41 = vadd.f32 %v441_v34, %v431_v38  ;;  %v1344_v38 = vunpack.c.l.bf16 %v1361_v26 }
  0x9e   : > { %v442_v42 = vadd.f32 %v441_v34, %v421_v39  ;;  %v970_v39 = vsub.s32 3, %v1712_v29 }
  0x9f   : > { %v456_v44 = vadd.f32 %v1332_v35, %v444_v41 }
  0xa0   : > { %v454_v45 = vadd.f32 %v1328_v36, %v442_v42  ;;  %v436_v49 = vpop.permute.xlu1 %435 }
  0xa1   : > { %v426_v50 = vpop.permute.xlu0 %425  ;;  %v445_v55 = vadd.f32 %v441_v34, %v436_v49  ;;  %v464_v60 = vmul.f32 0.2, %v456_v44  ;;  %vm460_vm7 = vcmp.gt.f32.partialorder %v456_v44, 0.0 }
  0xa2   : > { %v443_v56 = vadd.f32 %v441_v34, %v426_v50  ;;  %vm458_vm5 = vcmp.gt.f32.partialorder %v454_v45, 0.0  ;;  %v462_v57 = vmul.f32 0.2, %v454_v45 }
  0xa3   : > { %v457_v61 = vadd.f32 %v1333_v43, %v445_v55  ;;  %v468_v12 = vsel %vm460_vm7, %v456_v44, %v464_v60  ;;  %v1362_v43 = vld [vmem:[%s1720_s18 + $0x28] sm:$0xff]  }
  0xa4   : > { %v455_v62 = vadd.f32 %v1329_v46, %v443_v56  ;;  %v466_v63 = vsel %vm458_vm5, %v454_v45, %v462_v57  ;;  %v1770_v27 = vsel %vm1749_vm10, %v468_v12, -1e+30  ;;  %v1795_v56 = vrot.slane %v1718_v31, %v970_v39 }
  0xa5   : > { %v1738_v0 = vsel %vm1729_vm4, %v466_v63, -1e+30  ;;  %v626_v5 = vpop.permute.xlu1 %625  ;;  %vm461_vm12 = vcmp.gt.f32.partialorder %v457_v61, 0.0  ;;  %v465_v11 = vmul.f32 0.2, %v457_v61  ;;  %v493_v41 = vsel %vm486_vm6, %v1770_v27, -inf }
  0xa6   : > { %v622_v6 = vpop.permute.xlu0 %621  ;;  %v487_v7 = vsel %vm486_vm6, %v1738_v0, -inf  ;;  %vm459_vm11 = vcmp.gt.f32.partialorder %v455_v62, 0.0  ;;  %v463_v8 = vmul.f32 0.2, %v455_v62  ;;  %v641_v9 = vadd.f32 %v639_v47, %v626_v5 }
  0xa7   : > { %v640_v10 = vadd.f32 %v639_v47, %v622_v6  ;;  %488 = vmax.xlane.f32.xlu1 %v487_v7  ;;  %v469_v21 = vsel %vm461_vm12, %v457_v61, %v465_v11  ;;  %v1352_v63 = vunpack.c.l.bf16 %v1792_v53 }
  0xa8   : > { %v467_v15 = vsel %vm459_vm11, %v455_v62, %v463_v8  ;;  %v654_v17 = vadd.f32 %v1337_v58, %v641_v9  ;;  %v1765_v25 = vsel %vm1745_vm9, %v469_v21, -1e+30  ;;  %v1349_v8 = vunpack.c.h.bf16 %v1362_v43 }
  0xa9   : > { %v653_v18 = vadd.f32 %v1336_v59, %v640_v10  ;;  %v1759_v19 = vsel %vm1741_vm8, %v467_v15, -1e+30  ;;  %v630_v22 = vpop.permute.xlu1 %629  ;;  %v496_v32 = vsel %vm486_vm6, %v1765_v25, -inf  ;;  %v1348_v59 = vunpack.c.l.bf16 %v1362_v43 }
  0xaa   : > { %v634_v23 = vpop.permute.xlu0 %633  ;;  %v490_v24 = vsel %vm486_vm6, %v1759_v19, -inf  ;;  %v642_v28 = vadd.f32 %v639_v47, %v630_v22  ;;  %vm658_vm13 = vcmp.gt.f32.partialorder %v654_v17, 0.0  ;;  %v662_v34 = vmul.f32 0.2, %v654_v17 }
  0xab   : > { %v643_v30 = vadd.f32 %v639_v47, %v634_v23  ;;  %491 = vmax.xlane.f32.xlu0 %v490_v24  ;;  %497 = vmax.xlane.f32.xlu1 %v496_v32  ;;  %vm657_vm14 = vcmp.gt.f32.partialorder %v653_v18, 0.0  ;;  %v661_v35 = vmul.f32 0.2, %v653_v18  ;;  %v1364_v23 = vld [vmem:[%s1720_s18 + $0x38] sm:$0xff]  }
  0xac   : > { %v655_v36 = vadd.f32 %v1340_v13, %v642_v28  ;;  %v666_v42 = vsel %vm658_vm13, %v654_v17, %v662_v34  ;;  %v1353_v34 = vunpack.c.h.bf16 %v1792_v53 }
  0xad   : > { %v656_v37 = vadd.f32 %v1341_v14, %v643_v30  ;;  %v665_v44 = vsel %vm657_vm14, %v653_v18, %v661_v35  ;;  %v1781_v47 = vsel %vm1741_vm8, %v666_v42, -1e+30 }
  0xae   : > { %v788_v45 = vpop.permute.xlu1 %787  ;;  %v1785_v48 = vsel %vm1729_vm4, %v665_v44, -1e+30  ;;  %vm659_vm0 = vcmp.gt.f32.partialorder %v655_v36, 0.0  ;;  %v676_v50 = vsel %vm486_vm6, %v1781_v47, -inf  ;;  %v663_v55 = vmul.f32 0.2, %v655_v36 }
  0xaf   : > { %v792_v46 = vpop.permute.xlu0 %791  ;;  %494 = vmax.xlane.f32.xlu0 %v493_v41  ;;  %vm660_vm15 = vcmp.gt.f32.partialorder %v656_v37, 0.0  ;;  %v806_v29 = vadd.f32 %v805_v33, %v788_v45  ;;  %v673_v52 = vsel %vm486_vm6, %v1785_v48, -inf  ;;  %677 = vmax.xlane.f32.xlu1 %v676_v50  ;;  %v664_v54 = vmul.f32 0.2, %v656_v37 }
  0xb0   : > { %v807_v49 = vadd.f32 %v805_v33, %v792_v46  ;;  %v667_v62 = vsel %vm659_vm0, %v655_v36, %v663_v55  ;;  %v1357_v36 = vunpack.c.h.bf16 %v1364_v23  ;;  %v1356_v50 = vunpack.c.l.bf16 %v1364_v23 }
  0xb1   : > { %v819_v57 = vadd.f32 %v1344_v38, %v806_v29  ;;  %v668_v61 = vsel %vm660_vm15, %v656_v37, %v664_v54  ;;  %v1806_v31 = vsel %vm1749_vm10, %v667_v62, -1e+30 }
  0xb2   : > { %v820_v58 = vadd.f32 %v1345_v40, %v807_v49  ;;  %v796_v60 = vpop.permute.xlu1 %795  ;;  %v1802_v5 = vsel %vm1745_vm9, %v668_v61, -1e+30  ;;  %v679_v12 = vsel %vm486_vm6, %v1806_v31, -inf }
  0xb3   : > { %674 = vmax.xlane.f32.xlu0 %v673_v52  ;;  %v808_v1 = vadd.f32 %v805_v33, %v796_v60  ;;  %v682_v7 = vsel %vm486_vm6, %v1802_v5, -inf  ;;  %vm823_vm2 = vcmp.gt.f32.partialorder %v819_v57, 0.0  ;;  %v827_v13 = vmul.f32 0.2, %v819_v57 }
  0xb4   : > { %v954_v6 = vpop.permute.xlu0 %953  ;;  %vm824_vm1 = vcmp.gt.f32.partialorder %v820_v58, 0.0  ;;  %v828_v10 = vmul.f32 0.2, %v820_v58  ;;  %683 = vmax.xlane.f32.xlu1 %v682_v7 }
  0xb5   : > { %v972_v9 = vadd.f32 %v1795_v56, %v954_v6  ;;  %v821_v11 = vadd.f32 %v1348_v59, %v808_v1  ;;  %v831_v21 = vsel %vm823_vm2, %v819_v57, %v827_v13 }
  0xb6   : > { %v800_v14 = vpop.permute.xlu1 %799  ;;  %v832_v16 = vsel %vm824_vm1, %v820_v58, %v828_v10  ;;  %v1822_v26 = vsel %vm1729_vm4, %v831_v21, -1e+30 }
  0xb7   : > { %680 = vmax.xlane.f32.xlu0 %v679_v12  ;;  %v985_v15 = vadd.f32 %v1352_v63, %v972_v9  ;;  %v809_v17 = vadd.f32 %v805_v33, %v800_v14  ;;  %v1815_v18 = vsel %vm1741_vm8, %v832_v16, -1e+30  ;;  %vm825_vm3 = vcmp.gt.f32.partialorder %v821_v11, 0.0 }
  0xb8   : > { %v966_v22 = vpop.permute.xlu0 %965  ;;  %v842_v24 = vsel %vm486_vm6, %v1815_v18, -inf  ;;  %v829_v28 = vmul.f32 0.2, %v821_v11  ;;  %v839_v32 = vsel %vm486_vm6, %v1822_v26, -inf }
  0xb9   : > { %v822_v30 = vadd.f32 %v1349_v8, %v809_v17  ;;  %843 = vmax.xlane.f32.xlu1 %v842_v24  ;;  %vm989_vm5 = vcmp.gt.f32.partialorder %v985_v15, 0.0  ;;  %v993_v33 = vmul.f32 0.2, %v985_v15  ;;  %v975_v35 = vadd.f32 %v1795_v56, %v966_v22 }
  0xba   : > { %v833_v37 = vsel %vm825_vm3, %v821_v11, %v829_v28 }
  0xbb   : > { %840 = vmax.xlane.f32.xlu0 %v839_v32  ;;  %v958_v38 = vpop.permute.xlu1 %957  ;;  %v1830_v39 = vsel %vm1749_vm10, %v833_v37, -1e+30  ;;  %vm826_vm7 = vcmp.gt.f32.partialorder %v822_v30, 0.0  ;;  %v830_v40 = vmul.f32 0.2, %v822_v30  ;;  %v997_v41 = vsel %vm989_vm5, %v985_v15, %v993_v33 }
  0xbc   : > { %v718_v42 = vpop.permute.xlu0 %717  ;;  %v973_v43 = vadd.f32 %v1795_v56, %v958_v38  ;;  %v1835_v44 = vsel %vm1729_vm4, %v997_v41, -1e+30  ;;  %v845_v45 = vsel %vm486_vm6, %v1830_v39, -inf  ;;  %v988_v49 = vadd.f32 %v1357_v36, %v975_v35 }
  0xbd   : > { %1401 = vmatprep.subr.bf16.mxu1 %v718_v42  ;;  %v834_v46 = vsel %vm826_vm7, %v822_v30, %v830_v40  ;;  %v1005_v54 = vsel %vm486_vm6, %v1835_v44, -inf }
  0xbe   : > { %1402 = vmatpush3.bf16.msra.mxu1 %v718_v42  ;;  %v986_v29 = vadd.f32 %v1353_v34, %v973_v43  ;;  %v1841_v52 = vsel %vm1745_vm9, %v834_v46, -1e+30  ;;  %v996_v61 = vmul.f32 0.2, %v988_v49  ;;  %vm992_vm11 = vcmp.gt.f32.partialorder %v988_v49, 0.0 }
  0xbf   : > { %846 = vmax.xlane.f32.xlu0 %v845_v45  ;;  %v962_v53 = vpop.permute.xlu1 %961  ;;  %v848_v51 = vsel %vm486_vm6, %v1841_v52, -inf }
  0xc0   : > { %v714_v55 = vpop.permute.xlu0 %713  ;;  %v974_v57 = vadd.f32 %v1795_v56, %v962_v53  ;;  %849 = vmax.xlane.f32.xlu1 %v848_v51  ;;  %vm990_vm4 = vcmp.gt.f32.partialorder %v986_v29, 0.0  ;;  %v994_v58 = vmul.f32 0.2, %v986_v29  ;;  %v1000_v8 = vsel %vm992_vm11, %v988_v49, %v996_v61 }
  0xc1   : > { %v1865_v11 = vsel %vm1745_vm9, %v1000_v8, -1e+30  ;;  %vm1172_vm9 = vcmask 130048  }
  0xc2   : > { %v987_v59 = vadd.f32 %v1356_v50, %v974_v57  ;;  %v998_v60 = vsel %vm990_vm4, %v986_v29, %v994_v58  ;;  %v1014_v4 = vsel %vm486_vm6, %v1865_v11, -inf }
  0xc3   : > { %1006 = vmax.xlane.f32.xlu0 %v1005_v54  ;;  %v1850_v62 = vsel %vm1741_vm8, %v998_v60, -1e+30  ;;  %v716_v63 = vpop.permute.xlu1 %715  ;;  %vm1177_vm8 = vcmask 195584  }
  0xc4   : > { %v1008_v1 = vsel %vm486_vm6, %v1850_v62, -inf  ;;  %vm991_vm12 = vcmp.gt.f32.partialorder %v987_v59, 0.0  ;;  %v995_v6 = vmul.f32 0.2, %v987_v59  ;;  %1403 = vmatprep.subr.bf16.mxu1 %v716_v63  ;;  %v712_v56 = vpop.permute.xlu0 %711 }
  0xc5   : > { %1009 = vmax.xlane.f32.xlu1 %v1008_v1  ;;  %1404 = vmatpush3.bf16.msra.mxu1 %v716_v63 }
  0xc6   : > { %v999_v7 = vsel %vm991_vm12, %v987_v59, %v995_v6  ;;  %1405 = vmatprep.subr.bf16.mxu1 %v714_v55 }
  0xc7   : > { %v1856_v9 = vsel %vm1749_vm10, %v999_v7, -1e+30  ;;  %v1858_v2 = vpop.permute.xlu1 %883  ;;  %vm1192_vm10 = vcmask 261120  }
  0xc8   : > { %v1011_v10 = vsel %vm486_vm6, %v1856_v9, -inf  ;;  %1413 = vmatprep.subr.bf16.mxu0 %v1858_v2  ;;  %v1867_v12 = vpop.permute.xlu0 %1049 }
  0xc9   : > { %1012 = vmax.xlane.f32.xlu1 %v1011_v10  ;;  %1406 = vmatpush3.bf16.msra.mxu1 %v714_v55 }
  0xca   : > { %1407 = vmatprep.subr.bf16.mxu1 %v712_v56 }
  0xcb   : > { %v1876_v3 = vpop.permute.xlu1 %881 }
  0xcc   : > { %v1878_v13 = vpop.permute.xlu0 %1047 }
  0xcd   : > { %1015 = vmax.xlane.f32.xlu1 %v1014_v4  ;;  %1408 = vmatpush3.bf16.msra.mxu1 %v712_v56 }
  0xce   : > { %1425 = vmatprep.subr.bf16.mxu1 %v1867_v12 }
  0xcf   : > { %v1880_v14 = vpop.permute.xlu1 %879 }
  0xd0   : > { %v1882_v15 = vpop.permute.xlu0 %1045 }
  0xd9   : > { %1043 = vrot.lane.b32.xlu0 %v1686_v20, %s1577_s11 }
  0xde   : > { %877 = vrot.lane.b32.xlu1 %v1686_v20, %s1576_s10 }
 0x130   : > { %v489_v16 = vpop.xlane.xlu1 %488 }
 0x131   : > { %v499_v17 = vsub.f32 %v1738_v0, %v489_v16 }
 0x133   : > { %v503_v21 = vmul.f32 1.442695, %v499_v17 }
 0x134   : > { %v492_v22 = vpop.xlane.xlu0 %491  ;;  %v498_v24 = vpop.xlane.xlu1 %497 }
 0x135   : > { %v500_v23 = vsub.f32 %v1759_v19, %v492_v22  ;;  %v502_v28 = vsub.f32 %v1765_v25, %v498_v24  ;;  %1483 = vpow2.f32 %v503_v21 }
 0x137   : > { %v505_v30 = vmul.f32 1.442695, %v500_v23  ;;  %v509_v20 = vmul.f32 1.442695, %v502_v28 }
 0x138   : > { %v495_v32 = vpop.xlane.xlu0 %494  ;;  %v678_v34 = vpop.xlane.xlu1 %677 }
 0x139   : > { %1485 = vpow2.f32 %v505_v30  ;;  %v501_v33 = vsub.f32 %v1770_v27, %v495_v32  ;;  %v686_v36 = vsub.f32 %v1781_v47, %v678_v34 }
 0x13a   : > { %1487 = vpow2.f32 %v509_v20 }
 0x13b   : > { %v507_v35 = vmul.f32 1.442695, %v501_v33  ;;  %v691_v37 = vmul.f32 1.442695, %v686_v36 }
 0x13c   : > { %v675_v0 = vpop.xlane.xlu0 %674 }
 0x13d   : > { %1489 = vpow2.f32 %v507_v35  ;;  %v685_v19 = vsub.f32 %v1785_v48, %v675_v0  ;;  %v684_v25 = vpop.xlane.xlu1 %683 }
 0x13e   : > { %1491 = vpow2.f32 %v691_v37  ;;  %v688_v40 = vsub.f32 %v1802_v5, %v684_v25 }
 0x13f   : > { %v689_v38 = vmul.f32 1.442695, %v685_v19 }
 0x140   : > { %v681_v41 = vpop.xlane.xlu0 %680  ;;  %v695_v27 = vmul.f32 1.442695, %v688_v40 }
 0x141   : > { %1493 = vpow2.f32 %v689_v38  ;;  %v687_v42 = vsub.f32 %v1806_v31, %v681_v41 }
 0x142   : > { %v844_v45 = vpop.xlane.xlu1 %843  ;;  %1495 = vpow2.f32 %v695_v27  ;;  %v1893_v29 = vpop.eup %1483 }
 0x143   : > { %v693_v43 = vmul.f32 1.442695, %v687_v42  ;;  %v852_v47 = vsub.f32 %v1815_v18, %v844_v45  ;;  %v511_v27 = vsel %vm486_vm6, %v1893_v29, 0.0 }
 0x144   : > { %v841_v46 = vpop.xlane.xlu0 %840 }
 0x145   : > { %1497 = vpow2.f32 %v693_v43  ;;  %v851_v48 = vsub.f32 %v1822_v26, %v841_v46  ;;  %v857_v50 = vmul.f32 1.442695, %v852_v47 }
 0x146   : > { %v1896_v49 = vpop.eup %1485 }
 0x147   : > { %v855_v5 = vmul.f32 1.442695, %v851_v48  ;;  %v531_v53 = vpack.c.bf16 %v1896_v49, %v1893_v29  ;;  %1499 = vpow2.f32 %v857_v50  ;;  %v1900_v51 = vpop.eup %1487  ;;  %v514_v43 = vsel %vm486_vm6, %v1896_v49, 0.0 }
 0x148   : > { %v847_v31 = vpop.xlane.xlu0 %846  ;;  %v520_v47 = vsel %vm486_vm6, %v1900_v51, 0.0 }
 0x149   : > { %1501 = vpow2.f32 %v855_v5  ;;  %v853_v18 = vsub.f32 %v1830_v39, %v847_v31  ;;  %1397 = vmatprep.mubr.msk.bf16.mxu0 %vm486_vm6, %v531_v53  ;;  %v850_v55 = vpop.xlane.xlu1 %849 }
 0x14a   : > { %v1904_v54 = vpop.eup %1489  ;;  %v854_v57 = vsub.f32 %v1841_v52, %v850_v55 }
 0x14b   : > { %v859_v26 = vmul.f32 1.442695, %v853_v18  ;;  %v532_v58 = vpack.c.bf16 %v1900_v51, %v1904_v54  ;;  %v1492_v59 = vpop.eup %1491  ;;  %v517_v45 = vsel %vm486_vm6, %v1904_v54, 0.0 }
 0x14c   : > { %v1007_v60 = vpop.xlane.xlu0 %1006  ;;  %v861_v61 = vmul.f32 1.442695, %v854_v57  ;;  %v700_v39 = vsel %vm486_vm6, %v1492_v59, 0.0 }
 0x14d   : > { %v1017_v63 = vsub.f32 %v1835_v44, %v1007_v60  ;;  %1398 = vmatmul.mubr.msk.bf16.vlgmr.msra.gmra.mxu0 %vm486_vm6, %v532_v58  ;;  %1503 = vpow2.f32 %v859_v26  ;;  %701 = vadd.xlane.f32.xlu0 %v700_v39 }
 0x14e   : > { %v1494_v1 = vpop.eup %1493  ;;  %1414 = vmatpush3.bf16.msra.mxu0 %v1858_v2  ;;  %1505 = vpow2.f32 %v861_v61  ;;  %v1010_v52 = vpop.xlane.xlu1 %1009 }
 0x14f   : > { %v1021_v6 = vmul.f32 1.442695, %v1017_v63  ;;  %1415 = vmatprep.subr.bf16.mxu0 %v1876_v3  ;;  %v697_v56 = vsel %vm486_vm6, %v1494_v1, 0.0  ;;  %v709_v7 = vpack.c.bf16 %v1492_v59, %v1494_v1  ;;  %v1018_v8 = vsub.f32 %v1850_v62, %v1010_v52  ;;  %v1496_v44 = vpop.eup %1495 }
 0x150   : > { %698 = vadd.xlane.f32.xlu1 %v697_v56  ;;  %v1044_v33 = vpop.permute.xlu0 %1043 }
 0x151   : > { %1507 = vpow2.f32 %v1021_v6  ;;  %1409 = vmatprep.mubr.msk.bf16.mxu1 %vm486_vm6, %v709_v7  ;;  %v1023_v4 = vmul.f32 1.442695, %v1018_v8 }
 0x152   : > { %v1498_v10 = vpop.eup %1497  ;;  %1416 = vmatpush3.bf16.msra.mxu0 %v1876_v3  ;;  %v1013_v2 = vpop.xlane.xlu1 %1012 }
 0x153   : > { %1417 = vmatprep.subr.bf16.mxu0 %v1880_v14  ;;  %v703_v16 = vsel %vm486_vm6, %v1498_v10, 0.0  ;;  %v710_v17 = vpack.c.bf16 %v1496_v44, %v1498_v10  ;;  %1509 = vpow2.f32 %v1023_v4  ;;  %v1019_v21 = vsub.f32 %v1856_v9, %v1013_v2 }
 0x154   : > { %704 = vadd.xlane.f32.xlu1 %v703_v16  ;;  %v1500_v62 = vpop.eup %1499 }
 0x155   : > { %1410 = vmatmul.mubr.msk.bf16.vlgmr.msra.gmra.mxu1 %vm486_vm6, %v710_v17  ;;  %v1025_v23 = vmul.f32 1.442695, %v1019_v21 }
 0x156   : > { %v1502_v22 = vpop.eup %1501  ;;  %1418 = vmatpush3.bf16.msra.mxu0 %v1880_v14  ;;  %1426 = vmatpush3.bf16.msra.mxu1 %v1867_v12  ;;  %v1016_v3 = vpop.xlane.xlu1 %1015  ;;  %v866_v12 = vsel %vm486_vm6, %v1500_v62, 0.0 }
 0x157   : > { %1427 = vmatprep.subr.bf16.mxu1 %v1878_v13  ;;  %v863_v24 = vsel %vm486_vm6, %v1502_v22, 0.0  ;;  %v875_v28 = vpack.c.bf16 %v1500_v62, %v1502_v22  ;;  %1511 = vpow2.f32 %v1025_v23  ;;  %v1020_v30 = vsub.f32 %v1865_v11, %v1016_v3 }
 0x158   : > { %864 = vadd.xlane.f32.xlu0 %v863_v24 }
 0x159   : > { %1421 = vmatprep.mubr.msk.bf16.mxu0 %vm486_vm6, %v875_v28  ;;  %v1027_v9 = vmul.f32 1.442695, %v1020_v30 }
 0x15a   : > { %1428 = vmatpush3.bf16.msra.mxu1 %v1878_v13  ;;  %v1504_v20 = vpop.eup %1503  ;;  %v878_v14 = vpop.permute.xlu1 %877  ;;  %v706_v13 = vsel %vm486_vm6, %v1496_v44, 0.0 }
 0x15b   : > { %1429 = vmatprep.subr.bf16.mxu1 %v1882_v15  ;;  %v1506_v32 = vpop.eup %1505  ;;  %1513 = vpow2.f32 %v1027_v9  ;;  %1419 = vmatprep.subr.bf16.mxu0 %v878_v14  ;;  %v869_v19 = vsel %vm486_vm6, %v1504_v20, 0.0 }
 0x15c   : > { %867 = vadd.xlane.f32.xlu0 %v866_v12  ;;  %1420 = vmatpush3.bf16.msra.mxu0 %v878_v14  ;;  %v876_v34 = vpack.c.bf16 %v1506_v32, %v1504_v20  ;;  %v872_v25 = vsel %vm486_vm6, %v1506_v32, 0.0 }
 0x15e   : > { %v1508_v11 = vpop.eup %1507  ;;  %1430 = vmatpush3.bf16.msra.mxu1 %v1882_v15 }
 0x15f   : > { %v1029_v35 = vsel %vm486_vm6, %v1508_v11, 0.0  ;;  %1431 = vmatprep.subr.bf16.mxu1 %v1044_v33  ;;  %1422 = vmatmul.mubr.msk.bf16.vlgmr.msra.gmra.mxu0 %vm486_vm6, %v876_v34 }
 0x160   : > { %1030 = vadd.xlane.f32.xlu1 %v1029_v35  ;;  %707 = vadd.xlane.f32.xlu0 %v706_v13  ;;  %v1510_v36 = vpop.eup %1509 }
 0x161   : > { %v1041_v0 = vpack.c.bf16 %v1510_v36, %v1508_v11  ;;  %v1032_v37 = vsel %vm486_vm6, %v1510_v36, 0.0 }
 0x162   : > { %1432 = vmatpush3.bf16.msra.mxu1 %v1044_v33 }
 0x163   : > { %1433 = vmatprep.mubr.msk.bf16.mxu1 %vm486_vm6, %v1041_v0 }
 0x164   : > { %870 = vadd.xlane.f32.xlu1 %v869_v19  ;;  %v1512_v15 = vpop.eup %1511  ;;  %1033 = vadd.xlane.f32.xlu0 %v1032_v37 }
 0x165   : > { %v1035_v38 = vsel %vm486_vm6, %v1512_v15, 0.0 }
 0x168   : > { %873 = vadd.xlane.f32.xlu1 %v872_v25  ;;  %v1514_v40 = vpop.eup %1513  ;;  %1036 = vadd.xlane.f32.xlu0 %v1035_v38 }
 0x169   : > { %v1042_v41 = vpack.c.bf16 %v1514_v40, %v1512_v15  ;;  %v1038_v42 = vsel %vm486_vm6, %v1514_v40, 0.0 }
 0x16b   : > { %1434 = vmatmul.mubr.msk.bf16.vlgmr.msra.gmra.mxu1 %vm486_vm6, %v1042_v41  ;;  %vm1167_vm6 = vcmask 64512  }
 0x16c   : > { %1039 = vadd.xlane.f32.xlu1 %v1038_v42  ;;  %512 = vadd.xlane.f32.xlu0 %v511_v27 }
 0x170   : > { %515 = vadd.xlane.f32.xlu1 %v514_v43  ;;  %518 = vadd.xlane.f32.xlu0 %v517_v45 }
 0x174   : > { %521 = vadd.xlane.f32.xlu1 %v520_v47 }
 0x1d6   : > { %v702_v46 = vpop.xlane.xlu0 %701 }
 0x1d9   : > { %v699_v50 = vpop.xlane.xlu1 %698 }
 0x1dd   : > { %v705_v5 = vpop.xlane.xlu1 %704 }
 0x1de   : > { %1515 = vrcp.f32 %v705_v5 }
 0x1df   : > { %1517 = vrcp.f32 %v699_v50 }
 0x1e1   : > { %v865_v48 = vpop.xlane.xlu0 %864 }
 0x1e5   : > { %v868_v29 = vpop.xlane.xlu0 %867 }
 0x1e9   : > { %v708_v53 = vpop.xlane.xlu0 %707  ;;  %v1031_v31 = vpop.xlane.xlu1 %1030 }
 0x1ea   : > { %1519 = vrcp.f32 %v708_v53 }
 0x1eb   : > { %1521 = vrcp.f32 %v702_v46  ;;  %v1516_v54 = vpop.eup %1515 }
 0x1ec   : > { %v1518_v58 = vpop.eup %1517 }
 0x1ed   : > { %v871_v49 = vpop.xlane.xlu1 %870  ;;  %v1034_v56 = vpop.xlane.xlu0 %1033 }
 0x1ee   : > { %1523 = vrcp.f32 %v871_v49 }
 0x1ef   : > { %1525 = vrcp.f32 %v865_v48  ;;  %v1322_v48 = vld [vmem:[%s2001_s5] ss:$0 sm:$0xff] }
 0x1f0   : > { %1527 = vrcp.f32 %v868_v29 }
 0x1f1   : > { %v874_v8 = vpop.xlane.xlu1 %873  ;;  %1529 = vrcp.f32 %v1031_v31  ;;  %v1037_v21 = vpop.xlane.xlu0 %1036 }
 0x1f2   : > { %1531 = vrcp.f32 %v1034_v56 }
 0x1f3   : > { %1533 = vrcp.f32 %v874_v8 }
 0x1f4   : > { %1535 = vrcp.f32 %v1037_v21 }
 0x1f5   : > { %v1040_v22 = vpop.xlane.xlu1 %1039  ;;  %v513_v19 = vpop.xlane.xlu0 %512 }
 0x1f6   : > { %1537 = vrcp.f32 %v1040_v22 }
 0x1f7   : > { %v1520_v59 = vpop.eup %1519  ;;  %1539 = vrcp.f32 %v513_v19 }
 0x1f8   : > { %v1522_v6 = vpop.eup %1521 }
 0x1f9   : > { %v516_v37 = vpop.xlane.xlu1 %515  ;;  %v519_v38 = vpop.xlane.xlu0 %518 }
 0x1fa   : > { %1541 = vrcp.f32 %v516_v37 }
 0x1fb   : > { %v1524_v44 = vpop.eup %1523  ;;  %1543 = vrcp.f32 %v519_v38 }
 0x1fc   : > { %v1526_v2 = vpop.eup %1525 }
 0x1fd   : > { %v1528_v23 = vpop.eup %1527  ;;  %v522_v15 = vpop.xlane.xlu1 %521 }
 0x1fe   : > { %v1530_v30 = vpop.eup %1529  ;;  %1545 = vrcp.f32 %v522_v15 }
 0x1ff   : > { %v1532_v12 = vpop.eup %1531 }
 0x200   : > { %v1534_v32 = vpop.eup %1533 }
 0x201   : > { %v1536_v35 = vpop.eup %1535 }
 0x203   : > { %v1538_v13 = vpop.eup %1537 }
 0x204   : > { %v1540_v43 = vpop.eup %1539 }
 0x207   : > { %v1542_v50 = vpop.eup %1541 }
 0x20d   : > { %v1950_v18 = vpop.f32.mrf.mxu0 }
 0x20f   : > { %v1952_v26 = vpop.f32.mrf.mxu0 }
 0x210   : > { %v616_v47 = vmul.f32 %v1540_v43, %v1952_v26 }
 0x211   : > { %v1954_v39 = vpop.f32.mrf.mxu0 }
 0x213   : > { %v1956_v7 = vpop.f32.mrf.mxu0 }
 0x214   : > { %v617_v31 = vmul.f32 %v1542_v50, %v1956_v7 }
 0x215   : > { %v1411_v55 = vpop.f32.mrf.mxu1 }
 0x216   : > { %v784_v51 = vmul.f32 %v1516_v54, %v1411_v55  ;;  %v1544_v55 = vpop.eup %1543 }
 0x217   : > { %v763_v57 = vpop.f32.mrf.mxu1  ;;  %v1546_v26 = vpop.eup %1545 }
 0x218   : > { %1127 = vrot.lane.b32.xlu0 %v784_v51, %s1578_s21  ;;  %v782_v61 = vmul.f32 %v1518_v58, %v763_v57 }
 0x219   : > { %v1412_v60 = vpop.f32.mrf.mxu1 }
 0x21a   : > { %v785_v63 = vmul.f32 %v1520_v59, %v1412_v60  ;;  %v618_v60 = vmul.f32 %v1544_v55, %v1950_v18 }
 0x21b   : > { %v766_v1 = vpop.f32.mrf.mxu1 }
 0x21c   : > { %1129 = vrot.lane.b32.xlu1 %v785_v63, %s1578_s21  ;;  %1123 = vrot.lane.b32.xlu0 %v782_v61, %s1578_s21  ;;  %v783_v52 = vmul.f32 %v1522_v6, %v766_v1  ;;  %v619_v61 = vmul.f32 %v1546_v26, %v1954_v39 }
 0x21f   : > { %v1423_v10 = vpop.f32.mrf.mxu0 }
 0x220   : > { %1125 = vrot.lane.b32.xlu1 %v783_v52, %s1578_s21  ;;  %v950_v4 = vmul.f32 %v1524_v44, %v1423_v10 }
 0x221   : > { %v929_v16 = vpop.f32.mrf.mxu0 }
 0x222   : > { %v948_v17 = vmul.f32 %v1526_v2, %v929_v16  ;;  %1143 = vrot.lane.b32.xlu0 %v950_v4, %s1579_s19 }
 0x223   : > { %v1424_v62 = vpop.f32.mrf.mxu0 }
 0x224   : > { %1139 = vrot.lane.b32.xlu1 %v948_v17, %s1579_s19  ;;  %v951_v34 = vmul.f32 %v1534_v32, %v1424_v62 }
 0x225   : > { %v932_v3 = vpop.f32.mrf.mxu0 }
 0x226   : > { %v949_v24 = vmul.f32 %v1528_v23, %v932_v3 }
 0x228   : > { %1141 = vrot.lane.b32.xlu1 %v949_v24, %s1579_s19 }
 0x22b   : > { %v1435_v28 = vpop.f32.mrf.mxu1 }
 0x22c   : > { %v1116_v36 = vmul.f32 %v1536_v35, %v1435_v28 }
 0x22d   : > { %v1095_v9 = vpop.f32.mrf.mxu1 }
 0x22e   : > { %v1114_v20 = vmul.f32 %v1530_v30, %v1095_v9 }
 0x22f   : > { %v1436_v14 = vpop.f32.mrf.mxu1 }
 0x230   : > { %1155 = vrot.lane.b32.xlu0 %v1114_v20, %s1580_s20  ;;  %v1117_v0 = vmul.f32 %v1538_v13, %v1436_v14 }
 0x231   : > { %v1098_v33 = vpop.f32.mrf.mxu1 }
 0x232   : > { %v1115_v11 = vmul.f32 %v1532_v12, %v1098_v33 }
 0x234   : > { %1157 = vrot.lane.b32.xlu1 %v1115_v11, %s1580_s20  ;;  %1145 = vrot.lane.b32.xlu0 %v951_v34, %s1579_s19 }
 0x238   : > { %1159 = vrot.lane.b32.xlu1 %v1116_v36, %s1580_s20  ;;  %1161 = vrot.lane.b32.xlu0 %v1117_v0, %s1580_s20 }
 0x28a   : > { %v1128_v40 = vpop.permute.xlu0 %1127 }
 0x28b   : > { %v1170_v6 = vsel %vm1167_vm6, %v618_v60, %v1128_v40 }
 0x28e   : > { %v1130_v25 = vpop.permute.xlu1 %1129  ;;  %v1124_v42 = vpop.permute.xlu0 %1123 }
 0x28f   : > { %v1168_v46 = vsel %vm1167_vm6, %v616_v47, %v1124_v42  ;;  %v1171_v52 = vsel %vm1167_vm6, %v619_v61, %v1130_v25 }
 0x292   : > { %v1126_v41 = vpop.permute.xlu1 %1125 }
 0x293   : > { %v1169_v51 = vsel %vm1167_vm6, %v617_v31, %v1126_v41 }
 0x294   : > { %v1144_v45 = vpop.permute.xlu0 %1143 }
 0x295   : > { %v1175_v56 = vsel %vm1172_vm9, %v1170_v6, %v1144_v45 }
 0x296   : > { %v1140_v27 = vpop.permute.xlu1 %1139 }
 0x297   : > { %v1173_v29 = vsel %vm1172_vm9, %v1168_v46, %v1140_v27 }
 0x29a   : > { %v1142_v5 = vpop.permute.xlu1 %1141 }
 0x29b   : > { %v1174_v57 = vsel %vm1172_vm9, %v1169_v51, %v1142_v5 }
 0x2a2   : > { %v1156_v53 = vpop.permute.xlu0 %1155 }
 0x2a3   : > { %v1178_v49 = vsel %vm1177_vm8, %v1173_v29, %v1156_v53 }
 0x2a4   : > { %v1188_v54 = vadd.f32 %v1322_v48, %v1178_v49 }
 0x2a6   : > { %1193 = vst.msk [vmem:[%s400_s29] sm:$0xff] %vm1192_vm10, %v1188_v54  ;;  %v1146_v58 = vpop.permute.xlu0 %1145  ;;  %v1158_v59 = vpop.permute.xlu1 %1157 }
 0x2a7   : > { %v1179_v63 = vsel %vm1177_vm8, %v1174_v57, %v1158_v59  ;;  %v1176_v7 = vsel %vm1172_vm9, %v1171_v52, %v1146_v58 }
 0x2a8   : > { %v1189_v1 = vadd.f32 %v1322_v48, %v1179_v63 }
 0x2aa   : > { %1194 = vst.msk [vmem:[%s400_s29 + $0x8] sm:$0xff] %vm1192_vm10, %v1189_v1  ;;  %v1162_v8 = vpop.permute.xlu0 %1161  ;;  %v1160_v44 = vpop.permute.xlu1 %1159 }
 0x2ab   : > { %v1181_v10 = vsel %vm1177_vm8, %v1176_v7, %v1162_v8  ;;  %v1180_v18 = vsel %vm1177_vm8, %v1175_v56, %v1160_v44 }
 0x2ac   : > { %v1191_v39 = vadd.f32 %v1322_v48, %v1181_v10  ;;  %v1190_v4 = vadd.f32 %v1322_v48, %v1180_v18 }
 0x2ae   : > { %1195 = vst.msk [vmem:[%s400_s29 + $0x10] sm:$0xff] %vm1192_vm10, %v1190_v4  ;;  %1196 = vst.msk [vmem:[%s400_s29 + $0x18] sm:$0xff] %vm1192_vm10, %v1191_v39 }
 0x2af PF: > { %p13_p9 = scmp.ge.s32.totalorder %s1633_s25, 4   ;;  %s2011_s21 = smov %s1565_s22 }
 0x2b0   : > { %s2012_s22 = smov %s1642_s28  ;;  %s2013_s23 = smov %s1633_s25 }
 0x2b1   :  { %15 = sbr.rel (!%p13_p9) target bundleno = 2 (0x2), region = 129 }

// kernel: gat_forward.14
= control target key start
LH: loop header
LB: loop body
LE: loop exit
PB: predicated region body
PF: predicated region fallthrough
CT: control target
= control target key end

     0   :  { %s519_s12 = smov 0   ;;  %s559_s0 = inlined_call_operand.vmem [shape: f32[64,32], index: 0, kind: input, shape index: {}]   ;;  %s560_s1 = inlined_call_operand.vmem [shape: f32[32,40], index: 1, kind: input, shape index: {}]   ;;  %s561_s2 = inlined_call_operand.vmem [shape: bf16[64,32], index: 2, kind: output, shape index: {0}]   ;;  %s562_s3 = inlined_call_operand.vmem [shape: f32[64,8], index: 3, kind: output, shape index: {1}]  }
   0x1 LB: > { %s426_s13 = sadd.s32 4294967295, %s496_s12   ;;  %p430_p0 = scmp.ge.s32.totalorder %s496_s12, 1  ;;  %s496_s12 = sphi %s519_s12, %s14_s12  }
   0x2   : > { %p141_p1 = scmp.lt.s32.totalorder %s496_s12, 3 }
   0x4   : > { %p142_p2 = pnand %p430_p0, %p141_p1 }
   0x5   : > { %s431_s18 = sshll.u32 (!%p142_p2), %s426_s13, 2  ;;  %s498_s4 = smov (!%p142_p2), 96  }
   0x6   : > { %145 = sbr.rel (%p142_p2) target bundleno = 336 (0x150), region = 28  ;;  %p171_p3 = scmp.lt.s32.totalorder (!%p142_p2), %s431_s18, 7 }
   0xb   : > { %v195_v0 = vld [vmem:[%s560_s1 + $0x18] sm:$0xff]  ;;  %v194_v1 = vld [vmem:[%s560_s1 + $0x10] sm:$0xff]  ;;  %v193_v2 = vld [vmem:[%s560_s1 + $0x8] sm:$0xff]  ;;  %s564_s18 = smov (!%p171_p3, %s431_s18), 7  ;;  %vm196_vm0 = vcmask 261120   ;;  %vm310_vm1 = vcmask 257024  }
   0xc   : > { %459 = vmatprep.subr.mxu0 %v195_v0  ;;  %473 = vmatprep.subr.mxu1 %v195_v0  ;;  %v192_v3 = vld [vmem:[%s560_s1] sm:$0xff]  ;;  %s432_s23 = sshll.u32 %s564_s18, 3  ;;  %s434_s27 = sshll.u32 %s564_s18, 2  ;;  %vm331_vm2 = vcmask 64512  }
   0xd   : > { %460 = vmatpush3.msra.mxu0 %v195_v0  ;;  %477 = vmatpush3.msra.mxu1 %v195_v0  ;;  %s174_s26 = scalar_lea.vmem %s559_s0, %s432_s23  ;;  %s180_s30 = scalar_lea.vmem %s561_s2, %s434_s27 }
   0xe   : > { %461 = vmatprep.subr.mxu0 %v194_v1  ;;  %474 = vmatprep.subr.mxu1 %v194_v1  ;;  %v188_v4 = vld [vmem:[%s174_s26] sm:$0xff]  ;;  %v190_v5 = vld [vmem:[%s174_s26 + $0x10] sm:$0xff]  ;;  %v189_v6 = vld [vmem:[%s174_s26 + $0x8] sm:$0xff]  ;;  %s186_s7 = scalar_lea.vmem %s562_s3, %s432_s23 }
   0xf   : > { %462 = vmatpush3.msra.mxu0 %v194_v1  ;;  %478 = vmatpush3.msra.mxu1 %v194_v1  ;;  %v191_v7 = vld [vmem:[%s174_s26 + $0x18] sm:$0xff] }
  0x10   : > { %463 = vmatprep.subr.mxu0 %v193_v2  ;;  %475 = vmatprep.subr.mxu1 %v193_v2 }
  0x11   : > { %464 = vmatpush3.msra.mxu0 %v193_v2  ;;  %479 = vmatpush3.msra.mxu1 %v193_v2 }
  0x12   : > { %465 = vmatprep.subr.mxu0 %v192_v3  ;;  %476 = vmatprep.subr.mxu1 %v192_v3 }
  0x13   : > { %466 = vmatpush3.msra.mxu0 %v192_v3  ;;  %480 = vmatpush3.msra.mxu1 %v192_v3 }
  0x14   : > { %467 = vmatprep.mubr.msk.f32.mxu0 %vm196_vm0, %v188_v4  ;;  %470 = vmatprep.mubr.msk.f32.mxu1 %vm196_vm0, %v190_v5 }
  0x15   : > { %468 = vmatmul.mubr.msk.f32.vlgmr.msra.gmra.mxu0 %vm196_vm0, %v189_v6  ;;  %471 = vmatmul.mubr.msk.f32.vlgmr.msra.gmra.mxu1 %vm196_vm0, %v191_v7 }
  0xd5   : > { %v469_v8 = vpop.f32.mrf.mxu0  ;;  %v472_v9 = vpop.f32.mrf.mxu1 }
  0xd6   : > { %v448_v13 = vpack.c.bf16 %v469_v8, %v469_v8  ;;  %v450_v15 = vpack.c.bf16 %v472_v9, %v472_v9 }
  0xd7   : > { %v275_v10 = vpop.f32.mrf.mxu0  ;;  %v285_v11 = vpop.f32.mrf.mxu1 }
  0xd8   : > { %v447_v12 = vpack.c.bf16 %v275_v10, %v275_v10  ;;  %323 = vrot.lane.b32.xlu1 %v285_v11, %s498_s4  ;;  %319 = vrot.lane.b32.xlu0 %v275_v10, %s498_s4  ;;  %v449_v14 = vpack.c.bf16 %v285_v11, %v285_v11  ;;  %312 = vst.msk [vmem:[%s180_s30 + $0x4] sm:$0xf] %vm310_vm1, %v448_v13  ;;  %314 = vst.msk [vmem:[%s180_s30 + $0xc] sm:$0xf] %vm310_vm1, %v450_v15 }
  0xda   : > { %311 = vst.msk [vmem:[%s180_s30] sm:$0xf] %vm310_vm1, %v447_v12  ;;  %313 = vst.msk [vmem:[%s180_s30 + $0x8] sm:$0xf] %vm310_vm1, %v449_v14 }
  0xdc   : > { %325 = vrot.lane.b32.xlu1 %v472_v9, %s498_s4  ;;  %321 = vrot.lane.b32.xlu0 %v469_v8, %s498_s4 }
 0x14a   : > { %v324_v16 = vpop.permute.xlu1 %323  ;;  %v320_v17 = vpop.permute.xlu0 %319 }
 0x14b   : > { %332 = vst.msk [vmem:[%s186_s7] sm:$0xff] %vm331_vm2, %v320_v17  ;;  %334 = vst.msk [vmem:[%s186_s7 + $0x10] sm:$0xff] %vm331_vm2, %v324_v16 }
 0x14e   : > { %v322_v18 = vpop.permute.xlu0 %321  ;;  %v326_v19 = vpop.permute.xlu1 %325 }
 0x14f   : > { %333 = vst.msk [vmem:[%s186_s7 + $0x8] sm:$0xff] %vm331_vm2, %v322_v18  ;;  %335 = vst.msk [vmem:[%s186_s7 + $0x18] sm:$0xff] %vm331_vm2, %v326_v19 }
 0x150 PF: > { %s14_s12 = sadd.s32 1, %s496_s12  }
 0x151   : > { %p11_p4 = scmp.ge.s32.totalorder %s14_s12, 4  }
 0x153   :  { %13 = sbr.rel (!%p11_p4) target bundleno = 1 (0x1), region = 70 }

// kernel: gat_forward.15
= control target key start
LH: loop header
LB: loop body
LE: loop exit
PB: predicated region body
PF: predicated region fallthrough
CT: control target
= control target key end

     0   :  { %s1696_s24 = smov 0   ;;  %s1698_s25 = smov 0   ;;  %s2082_s0 = inlined_call_operand.vmem [shape: bf16[64,32], index: 0, kind: input, shape index: {}]   ;;  %s2083_s1 = inlined_call_operand.vmem [shape: f32[4,64], index: 1, kind: input, shape index: {}]   ;;  %s2084_s2 = inlined_call_operand.vmem [shape: f32[64,4], index: 2, kind: input, shape index: {}]   ;;  %s2085_s3 = inlined_call_operand.vmem [shape: bf16[64,64], index: 3, kind: input, shape index: {}]   ;;  %s2086_s4 = inlined_call_operand.vmem [shape: bf16[4,64,64], index: 4, kind: input, shape index: {}]   ;;  %s2087_s5 = inlined_call_operand.vmem [shape: f32[1,32], index: 5, kind: input, shape index: {}]   ;;  %s2088_s6 = inlined_call_operand.vmem [shape: f32[64,32], index: 6, kind: input, shape index: {}]   ;;  %s2089_s7 = inlined_call_operand.vmem [shape: f32[64,32], index: 7, kind: output, shape index: {}]  }
   0x1   :  { %s1700_s26 = smov 0  }
   0x2 LB: > { %s1356_s27 = sadd.s32 4294967295, %s1644_s26   ;;  %s1713_s28 = sadd.s32 1, %s1644_s26   ;;  %s1644_s26 = sphi %s1700_s26, %s2100_s26   ;;  %s1640_s25 = sphi %s1698_s25, %s2099_s25   ;;  %s1636_s24 = sphi %s1696_s24, %s2098_s24  }
   0x3   : > { %s115_s29 = ssub.s32 %s1644_s26, %s1713_s28  ;;  %s118_s30 = sadd.s32 1, %s1640_s25 }
   0x4   : > { %p116_p0 = scmp.eq.s32.totalorder %s115_s29, 0  ;;  %p125_p1 = scmp.ne.s32.totalorder %s1640_s25, %s1636_s24 }
   0x5   : > { %p126_p2 = scmp.eq.s32.totalorder %s1644_s26, 0  ;;  %p1359_p4 = scmp.ge.s32.totalorder %s1644_s26, 2 }
   0x6   : > { %s1722_s8 = scalar_select %p116_p0, %s1640_s25, %s118_s30  }
   0x7   : > { %p127_p3 = por %p126_p2, %p125_p1  ;;  %233 = sbr.rel (%p1359_p4) target bundleno = 20 (0x14), region = 28 }
   0xc   : > { %254 = sbr.rel (!%p127_p3) target bundleno = 20 (0x14), region = 40  ;;  %s256_s9 = sand.u32 (%p127_p3), 1, %s1640_s25  }
   0xd   : > { %s1400_s10 = sshll.u32 (%p127_p3), %s1644_s26, 4  ;;  %s1360_s11 = sshll.u32 (%p127_p3), %s256_s9, 6 }
   0xe   : > { %s261_s14 = scalar_lea.vmem (%p127_p3), %s2086_s4, %s1400_s10  ;;  %s258_s15 = scalar_lea.vmem (%p127_p3), [#allocation2], %s1360_s11 }
   0xf   : > { %v278_v0 = vld [vmem:[%s261_s14] sm:$0xff] (%p127_p3)   ;;  %v282_v1 = vld [vmem:[%s261_s14 + $0x8] sm:$0xff] (%p127_p3)  }
  0x10   : > { %v286_v2 = vld [vmem:[%s261_s14 + $0x20] sm:$0xff] (%p127_p3)   ;;  %279 = vst [vmem:[%s258_s15] sm:$0xff] (%p127_p3), %v278_v0   ;;  %283 = vst [vmem:[%s258_s15 + $0x8] sm:$0xff] (%p127_p3), %v282_v1   ;;  %v290_v3 = vld [vmem:[%s261_s14 + $0x28] sm:$0xff] (%p127_p3)  }
  0x11   : > { %287 = vst [vmem:[%s258_s15 + $0x10] sm:$0xff] %v286_v2   ;;  %v294_v4 = vld [vmem:[%s261_s14 + $0x40] sm:$0xff]   ;;  %v298_v5 = vld [vmem:[%s261_s14 + $0x48] sm:$0xff]   ;;  %291 = vst [vmem:[%s258_s15 + $0x18] sm:$0xff] %v290_v3  }
  0x12   : > { %295 = vst [vmem:[%s258_s15 + $0x20] sm:$0xff] %v294_v4   ;;  %299 = vst [vmem:[%s258_s15 + $0x28] sm:$0xff] %v298_v5   ;;  %v302_v6 = vld [vmem:[%s261_s14 + $0x60] sm:$0xff]   ;;  %v306_v7 = vld [vmem:[%s261_s14 + $0x68] sm:$0xff]  }
  0x13   : > { %303 = vst [vmem:[%s258_s15 + $0x30] sm:$0xff] %v302_v6   ;;  %307 = vst [vmem:[%s258_s15 + $0x38] sm:$0xff] %v306_v7  }
  0x14 PF: > { %p1363_p5 = scmp.ge.s32.totalorder %s1644_s26, 1  ;;  %p373_p6 = scmp.lt.s32.totalorder %s1644_s26, 3 }
  0x16   : > { %p374_p7 = pnand %p1363_p5, %p373_p6 }
  0x17   : > { %s1365_s16 = sshll.u32 (!%p374_p7), %s1356_s27, 2  ;;  %s1650_s14 = smov (!%p374_p7), 120  }
  0x18   : > { %377 = sbr.rel (%p374_p7) target bundleno = 691 (0x2b3), region = 85  ;;  %p427_p8 = scmp.lt.s32.totalorder (!%p374_p7), %s1365_s16, 7 }
  0x19   : > { %s1651_s15 = smov (!%p374_p7), 112   ;;  %s380_s17 = sand.u32 (!%p374_p7), 1, %s1636_s24  }
  0x1a   : > { %s1364_s18 = sshll.u32 (!%p374_p7), %s380_s17, 6  ;;  %s1653_s24 = smov (!%p374_p7), 8  }
  0x1b   : > { %s1797_s22 = scalar_lea.vmem (!%p374_p7), [#allocation2], %s1364_s18  ;;  %s1654_s23 = smov (!%p374_p7), 16  }
  0x1d   : > { %v1646_v8 = vmov 0   ;;  %v1737_v9 = vld [vmem:[%s2082_s0 + $0x18] sm:$0xff]   ;;  %s2102_s16 = smov (!%p427_p8, %s1365_s16), 7  ;;  %v1742_v10 = vld [vmem:[%s2082_s0 + $0x10] sm:$0xff]   ;;  %v1556_v13 = vld [vmem:[%s2082_s0 + $0x8] sm:$0xff]   ;;  %v1647_v25 = vmov 1   ;;  %v487_v28 = vlaneseq }
  0x1e   : > { %1547 = vset.pattern.permute.xlu1 %v1646_v8  ;;  %1546 = vset.pattern.permute.xlu0 %v1646_v8  ;;  %s1745_s21 = sshll.u32 %s2102_s16, 3  ;;  %s1368_s27 = sshll.u32 %s2102_s16, 2  ;;  %v1763_v20 = vld [vmem:[%s2082_s0] sm:$0xff]   ;;  %v1648_v26 = vmov 2   ;;  %v1649_v27 = vmov 3   ;;  %v1433_v32 = vld [vmem:[%s1797_s22 + $0x8] sm:$0xff]  }
  0x1f   : > { %1464 = vmatprep.subr.bf16.mxu0 %v1737_v9  ;;  %s430_s26 = scalar_lea.vmem %s2084_s2, %s1745_s21  ;;  %s436_s11 = scalar_lea.vmem %s2085_s3, %s1368_s27  ;;  %v1789_v29 = vshrl.u32 %v487_v28, 7  ;;  %v1795_v31 = vld [vmem:[%s2083_s1] sm:$0xf]  ;;  %v1407_v35 = vunpack.c.l.bf16 %v1433_v32  ;;  %v1408_v43 = vunpack.c.h.bf16 %v1433_v32  ;;  %v1434_v48 = vld [vmem:[%s1797_s22 + $0x10] sm:$0xff]   ;;  %vm535_vm6 = vcmask 523264   ;;  %v1435_v1 = vld [vmem:[%s1797_s22 + $0x18] sm:$0xff]  }
  0x20   : > { %1465 = vmatpush3.bf16.msra.mxu0 %v1737_v9  ;;  %v464_v11 = vld [vmem:[%s430_s26 + $0x10] sm:$0xff]  ;;  %v462_v12 = vld [vmem:[%s430_s26] sm:$0xff]  ;;  %v465_v14 = vld [vmem:[%s430_s26 + $0x18] sm:$0xff]  ;;  %s1652_s16 = smov 104   ;;  %v1412_v58 = vunpack.c.h.bf16 %v1434_v48  ;;  %v1411_v59 = vunpack.c.l.bf16 %v1434_v48  ;;  %s2045_s10 = scalar_lea.vmem %s2088_s6, %s1745_s21 }
  0x21   : > { %1466 = vmatprep.subr.bf16.mxu0 %v1742_v10  ;;  %479 = vperm.xlu1 %1547, %v464_v11   ;;  %v463_v15 = vld [vmem:[%s430_s26 + $0x8] sm:$0xff]  ;;  %v454_v16 = vld [vmem:[%s436_s11] sm:$0xf]  ;;  %v455_v17 = vld [vmem:[%s436_s11 + $0x4] sm:$0xf]  ;;  %v489_v30 = vsub.s32 0, %v1789_v29  ;;  %s449_s13 = scalar_lea.vmem %s2089_s7, %s1745_s21 }
  0x22   : > { %469 = vperm.xlu0 %1546, %v462_v12   ;;  %v457_v18 = vld [vmem:[%s436_s11 + $0xc] sm:$0xf]  ;;  %v456_v19 = vld [vmem:[%s436_s11 + $0x8] sm:$0xf]  ;;  %vm458_vm0 = vcmp.gt.bf16.partialorder %v454_v16, 0  ;;  %vm459_vm1 = vcmp.gt.bf16.partialorder %v455_v17, 0 }
  0x23   : > { %v1765_v21 = vsel %vm458_vm0, 65537, %v1646_v8  ;;  %v1767_v22 = vsel %vm459_vm1, 65537, %v1646_v8  ;;  %vm461_vm2 = vcmp.gt.bf16.partialorder %v457_v18, 0  ;;  %vm460_vm3 = vcmp.gt.bf16.partialorder %v456_v19, 0  ;;  %v1402_v33 = vld [vmem:[%s1797_s22] sm:$0xff]   ;;  %s1655_s26 = smov 24  }
  0x24   : > { %1467 = vmatpush3.bf16.msra.mxu0 %v1742_v10  ;;  %v1769_v23 = vsel %vm461_vm2, 65537, %v1646_v8  ;;  %v1771_v24 = vsel %vm460_vm3, 65537, %v1646_v8  ;;  %v490_v34 = vrot.slane %v1795_v31, %v489_v30  ;;  %v1403_v36 = vunpack.c.l.bf16 %v1402_v33 }
  0x25   : > { %1468 = vmatprep.subr.bf16.mxu0 %v1556_v13  ;;  %484 = vperm.xlu1 %1547, %v465_v14   ;;  %v687_v37 = vsub.s32 1, %v1789_v29  ;;  %v523_v40 = vunpack.c.l.b16 %v1765_v21  ;;  %v1404_v46 = vunpack.c.h.bf16 %v1402_v33  ;;  %v524_v52 = vunpack.c.l.b16 %v1767_v22 }
  0x26   : > { %474 = vperm.xlu0 %1546, %v463_v15   ;;  %v526_v53 = vunpack.c.l.b16 %v1769_v23  ;;  %v525_v54 = vunpack.c.l.b16 %v1771_v24  ;;  %v853_v16 = vsub.s32 2, %v1789_v29 }
  0x27   : > { %v688_v47 = vrot.slane %v1795_v31, %v687_v37  ;;  %vm1806_vm4 = vcmp.ne.s32.totalorder %v523_v40, 0  ;;  %vm1818_vm8 = vcmp.ne.s32.totalorder %v524_v52, 0 }
  0x28   : > { %1469 = vmatpush3.bf16.msra.mxu0 %v1556_v13  ;;  %vm1822_vm9 = vcmp.ne.s32.totalorder %v526_v53, 0  ;;  %vm1826_vm10 = vcmp.ne.s32.totalorder %v525_v54, 0  ;;  %v854_v33 = vrot.slane %v1795_v31, %v853_v16  ;;  %v1869_v53 = vld [vmem:[%s1797_s22 + $0x30] sm:$0xff]  }
  0x29   : > { %1470 = vmatprep.subr.bf16.mxu0 %v1763_v20  ;;  %1549 = vset.pattern.permute.xlu1 %v1647_v25 }
  0x2a   : > { %1548 = vset.pattern.permute.xlu0 %v1647_v25  ;;  %674 = vperm.xlu1 %1549, %v463_v15  }
  0x2b   : > { %670 = vperm.xlu0 %1548, %v462_v12  }
  0x2c   : > { %1471 = vmatpush3.bf16.msra.mxu0 %v1763_v20 }
  0x2e   : > { %678 = vperm.xlu1 %1549, %v464_v11  }
  0x2f   : > { %682 = vperm.xlu0 %1548, %v465_v14  }
  0x32   : > { %1550 = vset.pattern.permute.xlu1 %v1648_v26 }
  0x33   : > { %1551 = vset.pattern.permute.xlu0 %v1648_v26  ;;  %836 = vperm.xlu1 %1550, %v462_v12   ;;  %v1436_v26 = vld [vmem:[%s1797_s22 + $0x20] sm:$0xff]  }
  0x34   : > { %840 = vperm.xlu0 %1551, %v463_v15   ;;  %v1420_v40 = vunpack.c.h.bf16 %v1436_v26 }
  0x37   : > { %844 = vperm.xlu1 %1550, %v464_v11  }
  0x38   : > { %1552 = vset.pattern.permute.xlu0 %v1649_v27 }
  0x39   : > { %1002 = vperm.xlu0 %1552, %v462_v12  }
  0x3b   : > { %848 = vperm.xlu1 %1550, %v465_v14  }
  0x3d   : > { %1014 = vperm.xlu0 %1552, %v465_v14   ;;  %v1416_v14 = vunpack.c.h.bf16 %v1435_v1 }
  0x3f   : > { %1553 = vset.pattern.permute.xlu1 %v1649_v27 }
  0x40   : > { %1006 = vperm.xlu1 %1553, %v463_v15  }
  0x41   : > { %766 = vrot.lane.b32.xlu0 %v1737_v9, %s1650_s14 }
  0x44   : > { %1010 = vperm.xlu1 %1553, %v464_v11  }
  0x45   : > { %762 = vrot.lane.b32.xlu0 %v1556_v13, %s1650_s14 }
  0x48   : > { %764 = vrot.lane.b32.xlu1 %v1742_v10, %s1650_s14 }
  0x49   : > { %760 = vrot.lane.b32.xlu0 %v1763_v20, %s1650_s14 }
  0x4c   : > { %932 = vrot.lane.b32.xlu1 %v1737_v9, %s1651_s15 }
  0x4d   : > { %1098 = vrot.lane.b32.xlu0 %v1737_v9, %s1652_s16 }
  0x50   : > { %930 = vrot.lane.b32.xlu1 %v1742_v10, %s1651_s15 }
  0x51   : > { %1096 = vrot.lane.b32.xlu0 %v1742_v10, %s1652_s16 }
  0x54   : > { %928 = vrot.lane.b32.xlu1 %v1556_v13, %s1651_s15 }
  0x55   : > { %1094 = vrot.lane.b32.xlu0 %v1556_v13, %s1652_s16  ;;  %v1415_v13 = vunpack.c.l.bf16 %v1435_v1 }
  0x9c   : > { %v480_v38 = vpop.permute.xlu1 %479 }
  0x9d   : > { %v470_v39 = vpop.permute.xlu0 %469  ;;  %v493_v41 = vadd.f32 %v490_v34, %v480_v38  ;;  %v1419_v38 = vunpack.c.l.bf16 %v1436_v26 }
  0x9e   : > { %v491_v42 = vadd.f32 %v490_v34, %v470_v39  ;;  %v1019_v39 = vsub.s32 3, %v1789_v29 }
  0x9f   : > { %v505_v44 = vadd.f32 %v1407_v35, %v493_v41 }
  0xa0   : > { %v503_v45 = vadd.f32 %v1403_v36, %v491_v42  ;;  %v485_v49 = vpop.permute.xlu1 %484 }
  0xa1   : > { %v475_v50 = vpop.permute.xlu0 %474  ;;  %v494_v55 = vadd.f32 %v490_v34, %v485_v49  ;;  %v513_v60 = vmul.f32 0.2, %v505_v44  ;;  %vm509_vm7 = vcmp.gt.f32.partialorder %v505_v44, 0.0 }
  0xa2   : > { %v492_v56 = vadd.f32 %v490_v34, %v475_v50  ;;  %vm507_vm5 = vcmp.gt.f32.partialorder %v503_v45, 0.0  ;;  %v511_v57 = vmul.f32 0.2, %v503_v45 }
  0xa3   : > { %v506_v61 = vadd.f32 %v1408_v43, %v494_v55  ;;  %v517_v12 = vsel %vm509_vm7, %v505_v44, %v513_v60  ;;  %v1437_v43 = vld [vmem:[%s1797_s22 + $0x28] sm:$0xff]  }
  0xa4   : > { %v504_v62 = vadd.f32 %v1404_v46, %v492_v56  ;;  %v515_v63 = vsel %vm507_vm5, %v503_v45, %v511_v57  ;;  %v1847_v27 = vsel %vm1826_vm10, %v517_v12, -1e+30  ;;  %v1872_v56 = vrot.slane %v1795_v31, %v1019_v39 }
  0xa5   : > { %v1815_v0 = vsel %vm1806_vm4, %v515_v63, -1e+30  ;;  %v675_v5 = vpop.permute.xlu1 %674  ;;  %vm510_vm12 = vcmp.gt.f32.partialorder %v506_v61, 0.0  ;;  %v514_v11 = vmul.f32 0.2, %v506_v61  ;;  %v542_v41 = vsel %vm535_vm6, %v1847_v27, -inf }
  0xa6   : > { %v671_v6 = vpop.permute.xlu0 %670  ;;  %v536_v7 = vsel %vm535_vm6, %v1815_v0, -inf  ;;  %vm508_vm11 = vcmp.gt.f32.partialorder %v504_v62, 0.0  ;;  %v512_v8 = vmul.f32 0.2, %v504_v62  ;;  %v690_v9 = vadd.f32 %v688_v47, %v675_v5 }
  0xa7   : > { %v689_v10 = vadd.f32 %v688_v47, %v671_v6  ;;  %537 = vmax.xlane.f32.xlu1 %v536_v7  ;;  %v518_v21 = vsel %vm510_vm12, %v506_v61, %v514_v11  ;;  %v1427_v63 = vunpack.c.l.bf16 %v1869_v53 }
  0xa8   : > { %v516_v15 = vsel %vm508_vm11, %v504_v62, %v512_v8  ;;  %v703_v17 = vadd.f32 %v1412_v58, %v690_v9  ;;  %v1842_v25 = vsel %vm1822_vm9, %v518_v21, -1e+30  ;;  %v1424_v8 = vunpack.c.h.bf16 %v1437_v43 }
  0xa9   : > { %v702_v18 = vadd.f32 %v1411_v59, %v689_v10  ;;  %v1836_v19 = vsel %vm1818_vm8, %v516_v15, -1e+30  ;;  %v679_v22 = vpop.permute.xlu1 %678  ;;  %v545_v32 = vsel %vm535_vm6, %v1842_v25, -inf  ;;  %v1423_v59 = vunpack.c.l.bf16 %v1437_v43 }
  0xaa   : > { %v683_v23 = vpop.permute.xlu0 %682  ;;  %v539_v24 = vsel %vm535_vm6, %v1836_v19, -inf  ;;  %v691_v28 = vadd.f32 %v688_v47, %v679_v22  ;;  %vm707_vm13 = vcmp.gt.f32.partialorder %v703_v17, 0.0  ;;  %v711_v34 = vmul.f32 0.2, %v703_v17 }
  0xab   : > { %v692_v30 = vadd.f32 %v688_v47, %v683_v23  ;;  %540 = vmax.xlane.f32.xlu0 %v539_v24  ;;  %546 = vmax.xlane.f32.xlu1 %v545_v32  ;;  %vm706_vm14 = vcmp.gt.f32.partialorder %v702_v18, 0.0  ;;  %v710_v35 = vmul.f32 0.2, %v702_v18  ;;  %v1439_v23 = vld [vmem:[%s1797_s22 + $0x38] sm:$0xff]  }
  0xac   : > { %v704_v36 = vadd.f32 %v1415_v13, %v691_v28  ;;  %v715_v42 = vsel %vm707_vm13, %v703_v17, %v711_v34  ;;  %v1428_v34 = vunpack.c.h.bf16 %v1869_v53 }
  0xad   : > { %v705_v37 = vadd.f32 %v1416_v14, %v692_v30  ;;  %v714_v44 = vsel %vm706_vm14, %v702_v18, %v710_v35  ;;  %v1858_v47 = vsel %vm1818_vm8, %v715_v42, -1e+30 }
  0xae   : > { %v837_v45 = vpop.permute.xlu1 %836  ;;  %v1862_v48 = vsel %vm1806_vm4, %v714_v44, -1e+30  ;;  %vm708_vm0 = vcmp.gt.f32.partialorder %v704_v36, 0.0  ;;  %v725_v50 = vsel %vm535_vm6, %v1858_v47, -inf  ;;  %v712_v55 = vmul.f32 0.2, %v704_v36 }
  0xaf   : > { %v841_v46 = vpop.permute.xlu0 %840  ;;  %543 = vmax.xlane.f32.xlu0 %v542_v41  ;;  %vm709_vm15 = vcmp.gt.f32.partialorder %v705_v37, 0.0  ;;  %v855_v29 = vadd.f32 %v854_v33, %v837_v45  ;;  %v722_v52 = vsel %vm535_vm6, %v1862_v48, -inf  ;;  %726 = vmax.xlane.f32.xlu1 %v725_v50  ;;  %v713_v54 = vmul.f32 0.2, %v705_v37 }
  0xb0   : > { %v856_v49 = vadd.f32 %v854_v33, %v841_v46  ;;  %v716_v62 = vsel %vm708_vm0, %v704_v36, %v712_v55  ;;  %v1432_v36 = vunpack.c.h.bf16 %v1439_v23  ;;  %v1431_v50 = vunpack.c.l.bf16 %v1439_v23 }
  0xb1   : > { %v868_v57 = vadd.f32 %v1419_v38, %v855_v29  ;;  %v717_v61 = vsel %vm709_vm15, %v705_v37, %v713_v54  ;;  %v1883_v31 = vsel %vm1826_vm10, %v716_v62, -1e+30 }
  0xb2   : > { %v869_v58 = vadd.f32 %v1420_v40, %v856_v49  ;;  %v845_v60 = vpop.permute.xlu1 %844  ;;  %v1879_v5 = vsel %vm1822_vm9, %v717_v61, -1e+30  ;;  %v728_v12 = vsel %vm535_vm6, %v1883_v31, -inf }
  0xb3   : > { %723 = vmax.xlane.f32.xlu0 %v722_v52  ;;  %v857_v1 = vadd.f32 %v854_v33, %v845_v60  ;;  %v731_v7 = vsel %vm535_vm6, %v1879_v5, -inf  ;;  %vm872_vm2 = vcmp.gt.f32.partialorder %v868_v57, 0.0  ;;  %v876_v13 = vmul.f32 0.2, %v868_v57 }
  0xb4   : > { %v1003_v6 = vpop.permute.xlu0 %1002  ;;  %vm873_vm1 = vcmp.gt.f32.partialorder %v869_v58, 0.0  ;;  %v877_v10 = vmul.f32 0.2, %v869_v58  ;;  %732 = vmax.xlane.f32.xlu1 %v731_v7 }
  0xb5   : > { %v1021_v9 = vadd.f32 %v1872_v56, %v1003_v6  ;;  %v870_v11 = vadd.f32 %v1423_v59, %v857_v1  ;;  %v880_v21 = vsel %vm872_vm2, %v868_v57, %v876_v13 }
  0xb6   : > { %v849_v14 = vpop.permute.xlu1 %848  ;;  %v881_v16 = vsel %vm873_vm1, %v869_v58, %v877_v10  ;;  %v1899_v26 = vsel %vm1806_vm4, %v880_v21, -1e+30 }
  0xb7   : > { %729 = vmax.xlane.f32.xlu0 %v728_v12  ;;  %v1034_v15 = vadd.f32 %v1427_v63, %v1021_v9  ;;  %v858_v17 = vadd.f32 %v854_v33, %v849_v14  ;;  %v1892_v18 = vsel %vm1818_vm8, %v881_v16, -1e+30  ;;  %vm874_vm3 = vcmp.gt.f32.partialorder %v870_v11, 0.0 }
  0xb8   : > { %v1015_v22 = vpop.permute.xlu0 %1014  ;;  %v891_v24 = vsel %vm535_vm6, %v1892_v18, -inf  ;;  %v878_v28 = vmul.f32 0.2, %v870_v11  ;;  %v888_v32 = vsel %vm535_vm6, %v1899_v26, -inf }
  0xb9   : > { %v871_v30 = vadd.f32 %v1424_v8, %v858_v17  ;;  %892 = vmax.xlane.f32.xlu1 %v891_v24  ;;  %vm1038_vm5 = vcmp.gt.f32.partialorder %v1034_v15, 0.0  ;;  %v1042_v33 = vmul.f32 0.2, %v1034_v15  ;;  %v1024_v35 = vadd.f32 %v1872_v56, %v1015_v22 }
  0xba   : > { %v882_v37 = vsel %vm874_vm3, %v870_v11, %v878_v28 }
  0xbb   : > { %889 = vmax.xlane.f32.xlu0 %v888_v32  ;;  %v1007_v38 = vpop.permute.xlu1 %1006  ;;  %v1907_v39 = vsel %vm1826_vm10, %v882_v37, -1e+30  ;;  %vm875_vm7 = vcmp.gt.f32.partialorder %v871_v30, 0.0  ;;  %v879_v40 = vmul.f32 0.2, %v871_v30  ;;  %v1046_v41 = vsel %vm1038_vm5, %v1034_v15, %v1042_v33 }
  0xbc   : > { %v767_v42 = vpop.permute.xlu0 %766  ;;  %v1022_v43 = vadd.f32 %v1872_v56, %v1007_v38  ;;  %v1912_v44 = vsel %vm1806_vm4, %v1046_v41, -1e+30  ;;  %v894_v45 = vsel %vm535_vm6, %v1907_v39, -inf  ;;  %v1037_v49 = vadd.f32 %v1432_v36, %v1024_v35 }
  0xbd   : > { %1476 = vmatprep.subr.bf16.mxu1 %v767_v42  ;;  %v883_v46 = vsel %vm875_vm7, %v871_v30, %v879_v40  ;;  %v1054_v54 = vsel %vm535_vm6, %v1912_v44, -inf }
  0xbe   : > { %1477 = vmatpush3.bf16.msra.mxu1 %v767_v42  ;;  %v1035_v29 = vadd.f32 %v1428_v34, %v1022_v43  ;;  %v1918_v52 = vsel %vm1822_vm9, %v883_v46, -1e+30  ;;  %v1045_v61 = vmul.f32 0.2, %v1037_v49  ;;  %vm1041_vm11 = vcmp.gt.f32.partialorder %v1037_v49, 0.0 }
  0xbf   : > { %895 = vmax.xlane.f32.xlu0 %v894_v45  ;;  %v1011_v53 = vpop.permute.xlu1 %1010  ;;  %v897_v51 = vsel %vm535_vm6, %v1918_v52, -inf }
  0xc0   : > { %v763_v55 = vpop.permute.xlu0 %762  ;;  %v1023_v57 = vadd.f32 %v1872_v56, %v1011_v53  ;;  %898 = vmax.xlane.f32.xlu1 %v897_v51  ;;  %vm1039_vm4 = vcmp.gt.f32.partialorder %v1035_v29, 0.0  ;;  %v1043_v58 = vmul.f32 0.2, %v1035_v29  ;;  %v1049_v8 = vsel %vm1041_vm11, %v1037_v49, %v1045_v61 }
  0xc1   : > { %v1942_v11 = vsel %vm1822_vm9, %v1049_v8, -1e+30  ;;  %vm1221_vm9 = vcmask 130048  }
  0xc2   : > { %v1036_v59 = vadd.f32 %v1431_v50, %v1023_v57  ;;  %v1047_v60 = vsel %vm1039_vm4, %v1035_v29, %v1043_v58  ;;  %v1063_v4 = vsel %vm535_vm6, %v1942_v11, -inf }
  0xc3   : > { %1055 = vmax.xlane.f32.xlu0 %v1054_v54  ;;  %v1927_v62 = vsel %vm1818_vm8, %v1047_v60, -1e+30  ;;  %v765_v63 = vpop.permute.xlu1 %764  ;;  %vm1226_vm8 = vcmask 195584  }
  0xc4   : > { %v1057_v1 = vsel %vm535_vm6, %v1927_v62, -inf  ;;  %vm1040_vm12 = vcmp.gt.f32.partialorder %v1036_v59, 0.0  ;;  %v1044_v6 = vmul.f32 0.2, %v1036_v59  ;;  %1478 = vmatprep.subr.bf16.mxu1 %v765_v63  ;;  %v761_v56 = vpop.permute.xlu0 %760 }
  0xc5   : > { %1058 = vmax.xlane.f32.xlu1 %v1057_v1  ;;  %1479 = vmatpush3.bf16.msra.mxu1 %v765_v63 }
  0xc6   : > { %v1048_v7 = vsel %vm1040_vm12, %v1036_v59, %v1044_v6  ;;  %1480 = vmatprep.subr.bf16.mxu1 %v763_v55 }
  0xc7   : > { %v1933_v9 = vsel %vm1826_vm10, %v1048_v7, -1e+30  ;;  %v1935_v2 = vpop.permute.xlu1 %932  ;;  %vm1253_vm10 = vcmask 261120  }
  0xc8   : > { %v1060_v10 = vsel %vm535_vm6, %v1933_v9, -inf  ;;  %1488 = vmatprep.subr.bf16.mxu0 %v1935_v2  ;;  %v1944_v12 = vpop.permute.xlu0 %1098 }
  0xc9   : > { %1061 = vmax.xlane.f32.xlu1 %v1060_v10  ;;  %1481 = vmatpush3.bf16.msra.mxu1 %v763_v55 }
  0xca   : > { %1482 = vmatprep.subr.bf16.mxu1 %v761_v56 }
  0xcb   : > { %v1953_v3 = vpop.permute.xlu1 %930 }
  0xcc   : > { %v1955_v13 = vpop.permute.xlu0 %1096 }
  0xcd   : > { %1064 = vmax.xlane.f32.xlu1 %v1063_v4  ;;  %1483 = vmatpush3.bf16.msra.mxu1 %v761_v56 }
  0xce   : > { %1500 = vmatprep.subr.bf16.mxu1 %v1944_v12 }
  0xcf   : > { %v1957_v14 = vpop.permute.xlu1 %928 }
  0xd0   : > { %v1959_v15 = vpop.permute.xlu0 %1094 }
  0xd9   : > { %1092 = vrot.lane.b32.xlu0 %v1763_v20, %s1652_s16 }
  0xde   : > { %926 = vrot.lane.b32.xlu1 %v1763_v20, %s1651_s15 }
 0x130   : > { %v538_v16 = vpop.xlane.xlu1 %537 }
 0x131   : > { %v548_v17 = vsub.f32 %v1815_v0, %v538_v16 }
 0x133   : > { %v552_v21 = vmul.f32 1.442695, %v548_v17 }
 0x134   : > { %v541_v22 = vpop.xlane.xlu0 %540  ;;  %v547_v24 = vpop.xlane.xlu1 %546 }
 0x135   : > { %v549_v23 = vsub.f32 %v1836_v19, %v541_v22  ;;  %v551_v28 = vsub.f32 %v1842_v25, %v547_v24  ;;  %1558 = vpow2.f32 %v552_v21 }
 0x137   : > { %v554_v30 = vmul.f32 1.442695, %v549_v23  ;;  %v558_v20 = vmul.f32 1.442695, %v551_v28 }
 0x138   : > { %v544_v32 = vpop.xlane.xlu0 %543  ;;  %v727_v34 = vpop.xlane.xlu1 %726 }
 0x139   : > { %1560 = vpow2.f32 %v554_v30  ;;  %v550_v33 = vsub.f32 %v1847_v27, %v544_v32  ;;  %v735_v36 = vsub.f32 %v1858_v47, %v727_v34 }
 0x13a   : > { %1562 = vpow2.f32 %v558_v20 }
 0x13b   : > { %v556_v35 = vmul.f32 1.442695, %v550_v33  ;;  %v740_v37 = vmul.f32 1.442695, %v735_v36 }
 0x13c   : > { %v724_v0 = vpop.xlane.xlu0 %723 }
 0x13d   : > { %1564 = vpow2.f32 %v556_v35  ;;  %v734_v19 = vsub.f32 %v1862_v48, %v724_v0  ;;  %v733_v25 = vpop.xlane.xlu1 %732 }
 0x13e   : > { %1566 = vpow2.f32 %v740_v37  ;;  %v737_v40 = vsub.f32 %v1879_v5, %v733_v25 }
 0x13f   : > { %v738_v38 = vmul.f32 1.442695, %v734_v19 }
 0x140   : > { %v730_v41 = vpop.xlane.xlu0 %729  ;;  %v744_v27 = vmul.f32 1.442695, %v737_v40 }
 0x141   : > { %1568 = vpow2.f32 %v738_v38  ;;  %v736_v42 = vsub.f32 %v1883_v31, %v730_v41 }
 0x142   : > { %v893_v45 = vpop.xlane.xlu1 %892  ;;  %1570 = vpow2.f32 %v744_v27  ;;  %v1970_v29 = vpop.eup %1558 }
 0x143   : > { %v742_v43 = vmul.f32 1.442695, %v736_v42  ;;  %v901_v47 = vsub.f32 %v1892_v18, %v893_v45  ;;  %v560_v27 = vsel %vm535_vm6, %v1970_v29, 0.0 }
 0x144   : > { %v890_v46 = vpop.xlane.xlu0 %889 }
 0x145   : > { %1572 = vpow2.f32 %v742_v43  ;;  %v900_v48 = vsub.f32 %v1899_v26, %v890_v46  ;;  %v906_v50 = vmul.f32 1.442695, %v901_v47 }
 0x146   : > { %v1973_v49 = vpop.eup %1560 }
 0x147   : > { %v904_v5 = vmul.f32 1.442695, %v900_v48  ;;  %v580_v53 = vpack.c.bf16 %v1973_v49, %v1970_v29  ;;  %1574 = vpow2.f32 %v906_v50  ;;  %v1977_v51 = vpop.eup %1562  ;;  %v563_v43 = vsel %vm535_vm6, %v1973_v49, 0.0 }
 0x148   : > { %v896_v31 = vpop.xlane.xlu0 %895  ;;  %v569_v47 = vsel %vm535_vm6, %v1977_v51, 0.0 }
 0x149   : > { %1576 = vpow2.f32 %v904_v5  ;;  %v902_v18 = vsub.f32 %v1907_v39, %v896_v31  ;;  %1472 = vmatprep.mubr.msk.bf16.mxu0 %vm535_vm6, %v580_v53  ;;  %v899_v55 = vpop.xlane.xlu1 %898 }
 0x14a   : > { %v1981_v54 = vpop.eup %1564  ;;  %v903_v57 = vsub.f32 %v1918_v52, %v899_v55 }
 0x14b   : > { %v908_v26 = vmul.f32 1.442695, %v902_v18  ;;  %v581_v58 = vpack.c.bf16 %v1977_v51, %v1981_v54  ;;  %v1567_v59 = vpop.eup %1566  ;;  %v566_v45 = vsel %vm535_vm6, %v1981_v54, 0.0 }
 0x14c   : > { %v1056_v60 = vpop.xlane.xlu0 %1055  ;;  %v910_v61 = vmul.f32 1.442695, %v903_v57  ;;  %v749_v39 = vsel %vm535_vm6, %v1567_v59, 0.0 }
 0x14d   : > { %v1066_v63 = vsub.f32 %v1912_v44, %v1056_v60  ;;  %1473 = vmatmul.mubr.msk.bf16.vlgmr.msra.gmra.mxu0 %vm535_vm6, %v581_v58  ;;  %1578 = vpow2.f32 %v908_v26  ;;  %750 = vadd.xlane.f32.xlu0 %v749_v39 }
 0x14e   : > { %v1569_v1 = vpop.eup %1568  ;;  %1489 = vmatpush3.bf16.msra.mxu0 %v1935_v2  ;;  %1580 = vpow2.f32 %v910_v61  ;;  %v1059_v52 = vpop.xlane.xlu1 %1058 }
 0x14f   : > { %v1070_v6 = vmul.f32 1.442695, %v1066_v63  ;;  %1490 = vmatprep.subr.bf16.mxu0 %v1953_v3  ;;  %v746_v56 = vsel %vm535_vm6, %v1569_v1, 0.0  ;;  %v758_v7 = vpack.c.bf16 %v1567_v59, %v1569_v1  ;;  %v1067_v8 = vsub.f32 %v1927_v62, %v1059_v52  ;;  %v1571_v44 = vpop.eup %1570 }
 0x150   : > { %747 = vadd.xlane.f32.xlu1 %v746_v56  ;;  %v1093_v33 = vpop.permute.xlu0 %1092 }
 0x151   : > { %1582 = vpow2.f32 %v1070_v6  ;;  %1484 = vmatprep.mubr.msk.bf16.mxu1 %vm535_vm6, %v758_v7  ;;  %v1072_v4 = vmul.f32 1.442695, %v1067_v8 }
 0x152   : > { %v1573_v10 = vpop.eup %1572  ;;  %1491 = vmatpush3.bf16.msra.mxu0 %v1953_v3  ;;  %v1062_v2 = vpop.xlane.xlu1 %1061 }
 0x153   : > { %1492 = vmatprep.subr.bf16.mxu0 %v1957_v14  ;;  %v752_v16 = vsel %vm535_vm6, %v1573_v10, 0.0  ;;  %v759_v17 = vpack.c.bf16 %v1571_v44, %v1573_v10  ;;  %1584 = vpow2.f32 %v1072_v4  ;;  %v1068_v21 = vsub.f32 %v1933_v9, %v1062_v2 }
 0x154   : > { %753 = vadd.xlane.f32.xlu1 %v752_v16  ;;  %v1575_v62 = vpop.eup %1574 }
 0x155   : > { %1485 = vmatmul.mubr.msk.bf16.vlgmr.msra.gmra.mxu1 %vm535_vm6, %v759_v17  ;;  %v1074_v23 = vmul.f32 1.442695, %v1068_v21 }
 0x156   : > { %v1577_v22 = vpop.eup %1576  ;;  %1493 = vmatpush3.bf16.msra.mxu0 %v1957_v14  ;;  %1501 = vmatpush3.bf16.msra.mxu1 %v1944_v12  ;;  %v1065_v3 = vpop.xlane.xlu1 %1064  ;;  %v915_v12 = vsel %vm535_vm6, %v1575_v62, 0.0 }
 0x157   : > { %1502 = vmatprep.subr.bf16.mxu1 %v1955_v13  ;;  %v912_v24 = vsel %vm535_vm6, %v1577_v22, 0.0  ;;  %v924_v28 = vpack.c.bf16 %v1575_v62, %v1577_v22  ;;  %1586 = vpow2.f32 %v1074_v23  ;;  %v1069_v30 = vsub.f32 %v1942_v11, %v1065_v3 }
 0x158   : > { %913 = vadd.xlane.f32.xlu0 %v912_v24 }
 0x159   : > { %1496 = vmatprep.mubr.msk.bf16.mxu0 %vm535_vm6, %v924_v28  ;;  %v1076_v9 = vmul.f32 1.442695, %v1069_v30 }
 0x15a   : > { %1503 = vmatpush3.bf16.msra.mxu1 %v1955_v13  ;;  %v1579_v20 = vpop.eup %1578  ;;  %v927_v14 = vpop.permute.xlu1 %926  ;;  %v755_v13 = vsel %vm535_vm6, %v1571_v44, 0.0 }
 0x15b   : > { %1504 = vmatprep.subr.bf16.mxu1 %v1959_v15  ;;  %v1581_v32 = vpop.eup %1580  ;;  %1588 = vpow2.f32 %v1076_v9  ;;  %1494 = vmatprep.subr.bf16.mxu0 %v927_v14  ;;  %v918_v19 = vsel %vm535_vm6, %v1579_v20, 0.0 }
 0x15c   : > { %916 = vadd.xlane.f32.xlu0 %v915_v12  ;;  %1495 = vmatpush3.bf16.msra.mxu0 %v927_v14  ;;  %v925_v34 = vpack.c.bf16 %v1581_v32, %v1579_v20  ;;  %v921_v25 = vsel %vm535_vm6, %v1581_v32, 0.0 }
 0x15e   : > { %v1583_v11 = vpop.eup %1582  ;;  %1505 = vmatpush3.bf16.msra.mxu1 %v1959_v15 }
 0x15f   : > { %v1078_v35 = vsel %vm535_vm6, %v1583_v11, 0.0  ;;  %1506 = vmatprep.subr.bf16.mxu1 %v1093_v33  ;;  %1497 = vmatmul.mubr.msk.bf16.vlgmr.msra.gmra.mxu0 %vm535_vm6, %v925_v34 }
 0x160   : > { %1079 = vadd.xlane.f32.xlu1 %v1078_v35  ;;  %756 = vadd.xlane.f32.xlu0 %v755_v13  ;;  %v1585_v36 = vpop.eup %1584 }
 0x161   : > { %v1090_v0 = vpack.c.bf16 %v1585_v36, %v1583_v11  ;;  %v1081_v37 = vsel %vm535_vm6, %v1585_v36, 0.0 }
 0x162   : > { %1507 = vmatpush3.bf16.msra.mxu1 %v1093_v33 }
 0x163   : > { %1508 = vmatprep.mubr.msk.bf16.mxu1 %vm535_vm6, %v1090_v0 }
 0x164   : > { %919 = vadd.xlane.f32.xlu1 %v918_v19  ;;  %v1587_v15 = vpop.eup %1586  ;;  %1082 = vadd.xlane.f32.xlu0 %v1081_v37 }
 0x165   : > { %v1084_v38 = vsel %vm535_vm6, %v1587_v15, 0.0 }
 0x168   : > { %922 = vadd.xlane.f32.xlu1 %v921_v25  ;;  %v1589_v40 = vpop.eup %1588  ;;  %1085 = vadd.xlane.f32.xlu0 %v1084_v38 }
 0x169   : > { %v1091_v41 = vpack.c.bf16 %v1589_v40, %v1587_v15  ;;  %v1087_v42 = vsel %vm535_vm6, %v1589_v40, 0.0 }
 0x16b   : > { %1509 = vmatmul.mubr.msk.bf16.vlgmr.msra.gmra.mxu1 %vm535_vm6, %v1091_v41  ;;  %vm1216_vm6 = vcmask 64512  }
 0x16c   : > { %1088 = vadd.xlane.f32.xlu1 %v1087_v42  ;;  %561 = vadd.xlane.f32.xlu0 %v560_v27 }
 0x170   : > { %564 = vadd.xlane.f32.xlu1 %v563_v43  ;;  %567 = vadd.xlane.f32.xlu0 %v566_v45 }
 0x174   : > { %570 = vadd.xlane.f32.xlu1 %v569_v47 }
 0x1d6   : > { %v751_v46 = vpop.xlane.xlu0 %750 }
 0x1d9   : > { %v748_v50 = vpop.xlane.xlu1 %747 }
 0x1dd   : > { %v754_v5 = vpop.xlane.xlu1 %753 }
 0x1de   : > { %1590 = vrcp.f32 %v754_v5 }
 0x1df   : > { %1592 = vrcp.f32 %v748_v50 }
 0x1e1   : > { %v914_v48 = vpop.xlane.xlu0 %913 }
 0x1e5   : > { %v917_v29 = vpop.xlane.xlu0 %916 }
 0x1e9   : > { %v757_v53 = vpop.xlane.xlu0 %756  ;;  %v1080_v31 = vpop.xlane.xlu1 %1079 }
 0x1ea   : > { %1594 = vrcp.f32 %v757_v53 }
 0x1eb   : > { %1596 = vrcp.f32 %v751_v46  ;;  %v1591_v54 = vpop.eup %1590 }
 0x1ec   : > { %v1593_v58 = vpop.eup %1592 }
 0x1ed   : > { %v920_v49 = vpop.xlane.xlu1 %919  ;;  %v1083_v56 = vpop.xlane.xlu0 %1082 }
 0x1ee   : > { %1598 = vrcp.f32 %v920_v49 }
 0x1ef   : > { %1600 = vrcp.f32 %v914_v48  ;;  %v1397_v48 = vld [vmem:[%s2087_s5] ss:$0 sm:$0xff] }
 0x1f0   : > { %1602 = vrcp.f32 %v917_v29 }
 0x1f1   : > { %v923_v8 = vpop.xlane.xlu1 %922  ;;  %1604 = vrcp.f32 %v1080_v31  ;;  %v1086_v21 = vpop.xlane.xlu0 %1085 }
 0x1f2   : > { %1606 = vrcp.f32 %v1083_v56 }
 0x1f3   : > { %1608 = vrcp.f32 %v923_v8 }
 0x1f4   : > { %1610 = vrcp.f32 %v1086_v21 }
 0x1f5   : > { %v1089_v22 = vpop.xlane.xlu1 %1088  ;;  %v562_v19 = vpop.xlane.xlu0 %561 }
 0x1f6   : > { %1612 = vrcp.f32 %v1089_v22 }
 0x1f7   : > { %v1595_v59 = vpop.eup %1594  ;;  %1614 = vrcp.f32 %v562_v19 }
 0x1f8   : > { %v1597_v6 = vpop.eup %1596 }
 0x1f9   : > { %v565_v37 = vpop.xlane.xlu1 %564  ;;  %v568_v38 = vpop.xlane.xlu0 %567 }
 0x1fa   : > { %1616 = vrcp.f32 %v565_v37 }
 0x1fb   : > { %v1599_v44 = vpop.eup %1598  ;;  %1618 = vrcp.f32 %v568_v38 }
 0x1fc   : > { %v1601_v2 = vpop.eup %1600 }
 0x1fd   : > { %v1603_v23 = vpop.eup %1602  ;;  %v571_v15 = vpop.xlane.xlu1 %570 }
 0x1fe   : > { %v1605_v30 = vpop.eup %1604  ;;  %1620 = vrcp.f32 %v571_v15 }
 0x1ff   : > { %v1607_v12 = vpop.eup %1606 }
 0x200   : > { %v1609_v32 = vpop.eup %1608 }
 0x201   : > { %v1611_v35 = vpop.eup %1610 }
 0x203   : > { %v1613_v13 = vpop.eup %1612 }
 0x204   : > { %v1615_v43 = vpop.eup %1614 }
 0x207   : > { %v1617_v50 = vpop.eup %1616 }
 0x20d   : > { %v2027_v18 = vpop.f32.mrf.mxu0 }
 0x20f   : > { %v2029_v26 = vpop.f32.mrf.mxu0 }
 0x210   : > { %v665_v47 = vmul.f32 %v1615_v43, %v2029_v26  ;;  %v1245_v26 = vld [vmem:[%s2045_s10] sm:$0xff] }
 0x211   : > { %v2031_v39 = vpop.f32.mrf.mxu0 }
 0x213   : > { %v2033_v7 = vpop.f32.mrf.mxu0 }
 0x214   : > { %v666_v31 = vmul.f32 %v1617_v50, %v2033_v7 }
 0x215   : > { %v1486_v55 = vpop.f32.mrf.mxu1 }
 0x216   : > { %v833_v51 = vmul.f32 %v1591_v54, %v1486_v55  ;;  %v1619_v55 = vpop.eup %1618 }
 0x217   : > { %v812_v57 = vpop.f32.mrf.mxu1 }
 0x218   : > { %1176 = vrot.lane.b32.xlu0 %v833_v51, %s1653_s24  ;;  %v831_v61 = vmul.f32 %v1593_v58, %v812_v57  ;;  %v1621_v57 = vpop.eup %1620 }
 0x219   : > { %v1487_v60 = vpop.f32.mrf.mxu1 }
 0x21a   : > { %v834_v63 = vmul.f32 %v1595_v59, %v1487_v60 }
 0x21b   : > { %v815_v1 = vpop.f32.mrf.mxu1 }
 0x21c   : > { %1178 = vrot.lane.b32.xlu1 %v834_v63, %s1653_s24  ;;  %1172 = vrot.lane.b32.xlu0 %v831_v61, %s1653_s24  ;;  %v832_v52 = vmul.f32 %v1597_v6, %v815_v1  ;;  %v667_v63 = vmul.f32 %v1619_v55, %v2027_v18  ;;  %v668_v1 = vmul.f32 %v1621_v57, %v2031_v39 }
 0x21f   : > { %v1498_v10 = vpop.f32.mrf.mxu0 }
 0x220   : > { %1174 = vrot.lane.b32.xlu1 %v832_v52, %s1653_s24  ;;  %v999_v4 = vmul.f32 %v1599_v44, %v1498_v10  ;;  %v1246_v44 = vld [vmem:[%s2045_s10 + $0x8] sm:$0xff] }
 0x221   : > { %v978_v16 = vpop.f32.mrf.mxu0 }
 0x222   : > { %v997_v17 = vmul.f32 %v1601_v2, %v978_v16  ;;  %1192 = vrot.lane.b32.xlu0 %v999_v4, %s1654_s23 }
 0x223   : > { %v1499_v62 = vpop.f32.mrf.mxu0 }
 0x224   : > { %1188 = vrot.lane.b32.xlu1 %v997_v17, %s1654_s23  ;;  %v1000_v34 = vmul.f32 %v1609_v32, %v1499_v62 }
 0x225   : > { %v981_v3 = vpop.f32.mrf.mxu0 }
 0x226   : > { %v998_v24 = vmul.f32 %v1603_v23, %v981_v3  ;;  %v1248_v23 = vld [vmem:[%s2045_s10 + $0x18] sm:$0xff]  ;;  %v1247_v3 = vld [vmem:[%s2045_s10 + $0x10] sm:$0xff] }
 0x228   : > { %1190 = vrot.lane.b32.xlu1 %v998_v24, %s1654_s23 }
 0x22b   : > { %v1510_v28 = vpop.f32.mrf.mxu1 }
 0x22c   : > { %v1165_v36 = vmul.f32 %v1611_v35, %v1510_v28 }
 0x22d   : > { %v1144_v9 = vpop.f32.mrf.mxu1 }
 0x22e   : > { %v1163_v20 = vmul.f32 %v1605_v30, %v1144_v9 }
 0x22f   : > { %v1511_v14 = vpop.f32.mrf.mxu1 }
 0x230   : > { %1204 = vrot.lane.b32.xlu0 %v1163_v20, %s1655_s26  ;;  %v1166_v0 = vmul.f32 %v1613_v13, %v1511_v14 }
 0x231   : > { %v1147_v33 = vpop.f32.mrf.mxu1 }
 0x232   : > { %v1164_v11 = vmul.f32 %v1607_v12, %v1147_v33 }
 0x234   : > { %1206 = vrot.lane.b32.xlu1 %v1164_v11, %s1655_s26  ;;  %1194 = vrot.lane.b32.xlu0 %v1000_v34, %s1654_s23 }
 0x238   : > { %1208 = vrot.lane.b32.xlu1 %v1165_v36, %s1655_s26  ;;  %1210 = vrot.lane.b32.xlu0 %v1166_v0, %s1655_s26 }
 0x28a   : > { %v1177_v40 = vpop.permute.xlu0 %1176 }
 0x28b   : > { %v1219_v7 = vsel %vm1216_vm6, %v667_v63, %v1177_v40 }
 0x28e   : > { %v1179_v25 = vpop.permute.xlu1 %1178  ;;  %v1173_v42 = vpop.permute.xlu0 %1172 }
 0x28f   : > { %v1217_v46 = vsel %vm1216_vm6, %v665_v47, %v1173_v42  ;;  %v1220_v8 = vsel %vm1216_vm6, %v668_v1, %v1179_v25 }
 0x292   : > { %v1175_v41 = vpop.permute.xlu1 %1174 }
 0x293   : > { %v1218_v51 = vsel %vm1216_vm6, %v666_v31, %v1175_v41 }
 0x294   : > { %v1193_v45 = vpop.permute.xlu0 %1192 }
 0x295   : > { %v1224_v10 = vsel %vm1221_vm9, %v1219_v7, %v1193_v45 }
 0x296   : > { %v1189_v27 = vpop.permute.xlu1 %1188 }
 0x297   : > { %v1222_v29 = vsel %vm1221_vm9, %v1217_v46, %v1189_v27 }
 0x29a   : > { %v1191_v5 = vpop.permute.xlu1 %1190 }
 0x29b   : > { %v1223_v58 = vsel %vm1221_vm9, %v1218_v51, %v1191_v5 }
 0x2a2   : > { %v1205_v53 = vpop.permute.xlu0 %1204 }
 0x2a3   : > { %v1227_v49 = vsel %vm1226_vm8, %v1222_v29, %v1205_v53 }
 0x2a4   : > { %v1237_v54 = vadd.f32 %v1397_v48, %v1227_v49 }
 0x2a6   : > { %v1241_v59 = vmax.f32 %v1237_v54, 0.0  ;;  %v1195_v60 = vpop.permute.xlu0 %1194  ;;  %v1207_v61 = vpop.permute.xlu1 %1206 }
 0x2a7   : > { %v1228_v6 = vsel %vm1226_vm8, %v1223_v58, %v1207_v61  ;;  %v1225_v18 = vsel %vm1221_vm9, %v1220_v8, %v1195_v60 }
 0x2a8   : > { %v1249_v52 = vadd.f32 %v1245_v26, %v1241_v59  ;;  %v1238_v56 = vadd.f32 %v1397_v48, %v1228_v6 }
 0x2aa   : > { %1254 = vst.msk [vmem:[%s449_s13] sm:$0xff] %vm1253_vm10, %v1249_v52  ;;  %v1242_v4 = vmax.f32 %v1238_v56, 0.0  ;;  %v1211_v39 = vpop.permute.xlu0 %1210  ;;  %v1209_v2 = vpop.permute.xlu1 %1208 }
 0x2ab   : > { %v1230_v16 = vsel %vm1226_vm8, %v1225_v18, %v1211_v39  ;;  %v1229_v17 = vsel %vm1226_vm8, %v1224_v10, %v1209_v2 }
 0x2ac   : > { %v1250_v21 = vadd.f32 %v1246_v44, %v1242_v4  ;;  %v1240_v62 = vadd.f32 %v1397_v48, %v1230_v16  ;;  %v1239_v22 = vadd.f32 %v1397_v48, %v1229_v17 }
 0x2ae   : > { %1255 = vst.msk [vmem:[%s449_s13 + $0x8] sm:$0xff] %vm1253_vm10, %v1250_v21  ;;  %v1244_v24 = vmax.f32 %v1240_v62, 0.0  ;;  %v1243_v28 = vmax.f32 %v1239_v22, 0.0 }
 0x2b0   : > { %v1252_v30 = vadd.f32 %v1248_v23, %v1244_v24  ;;  %v1251_v9 = vadd.f32 %v1247_v3, %v1243_v28 }
 0x2b2   : > { %1256 = vst.msk [vmem:[%s449_s13 + $0x10] sm:$0xff] %vm1253_vm10, %v1251_v9  ;;  %1257 = vst.msk [vmem:[%s449_s13 + $0x18] sm:$0xff] %vm1253_vm10, %v1252_v30 }
 0x2b3 PF: > { %p14_p9 = scmp.ge.s32.totalorder %s1713_s28, 4   ;;  %s2098_s24 = smov %s1640_s25 }
 0x2b4   : > { %s2099_s25 = smov %s1722_s8  ;;  %s2100_s26 = smov %s1713_s28 }
 0x2b5   :  { %16 = sbr.rel (!%p14_p9) target bundleno = 2 (0x2), region = 136 }

// kernel: gat_forward.23
= control target key start
LH: loop header
LB: loop body
LE: loop exit
PB: predicated region body
PF: predicated region fallthrough
CT: control target
= control target key end

     0   :  { %s1249_s18 = smov 0   ;;  %s1524_s0 = inlined_call_operand.vmem [shape: bf16[64,32], index: 0, kind: input, shape index: {}]   ;;  %s1525_s1 = inlined_call_operand.vmem [shape: f32[4,64], index: 1, kind: input, shape index: {}]   ;;  %s1526_s2 = inlined_call_operand.vmem [shape: f32[64,4], index: 2, kind: input, shape index: {}]   ;;  %s1527_s3 = inlined_call_operand.vmem [shape: bf16[64,64], index: 3, kind: input, shape index: {}]   ;;  %s1528_s4 = inlined_call_operand.vmem [shape: f32[1,8], index: 4, kind: input, shape index: {}]   ;;  %s1529_s5 = inlined_call_operand.vmem [shape: f32[64,8], index: 5, kind: output, shape index: {}]  }
   0x1 LB: > { %s1015_s19 = sadd.s32 4294967295, %s1210_s18   ;;  %p1019_p0 = scmp.ge.s32.totalorder %s1210_s18, 1  ;;  %s1210_s18 = sphi %s1249_s18, %s15_s18  }
   0x2   : > { %p199_p1 = scmp.lt.s32.totalorder %s1210_s18, 3 }
   0x4   : > { %p200_p2 = pnand %p1019_p0, %p199_p1 }
   0x5   : > { %s1020_s20 = sshll.u32 (!%p200_p2), %s1015_s19, 2  ;;  %s1216_s12 = smov (!%p200_p2), 120  }
   0x6   : > { %203 = sbr.rel (%p200_p2) target bundleno = 551 (0x227), region = 40  ;;  %p233_p3 = scmp.lt.s32.totalorder (!%p200_p2), %s1020_s20, 7 }
   0x7   : > { %s1217_s13 = smov (!%p200_p2), 112   ;;  %s1218_s14 = smov (!%p200_p2), 104  }
   0xb   : > { %v1212_v0 = vmov 0   ;;  %v1260_v1 = vld [vmem:[%s1524_s0 + $0x18] sm:$0xff]   ;;  %s1539_s20 = smov (!%p233_p3, %s1020_s20), 7  ;;  %v1267_v2 = vld [vmem:[%s1524_s0 + $0x10] sm:$0xff]   ;;  %v1138_v5 = vld [vmem:[%s1524_s0 + $0x8] sm:$0xff]   ;;  %v1213_v17 = vmov 1   ;;  %v286_v20 = vlaneseq }
   0xc   : > { %1129 = vset.pattern.permute.xlu1 %v1212_v0  ;;  %1128 = vset.pattern.permute.xlu0 %v1212_v0  ;;  %s1021_s25 = sshll.u32 %s1539_s20, 3  ;;  %s1023_s26 = sshll.u32 %s1539_s20, 2  ;;  %v1295_v15 = vld [vmem:[%s1524_s0] sm:$0xff]   ;;  %v1214_v18 = vmov 2   ;;  %v1215_v19 = vmov 3   ;;  %vm322_vm6 = vcmask 523264  }
   0xd   : > { %1065 = vmatprep.subr.bf16.mxu0 %v1260_v1  ;;  %s236_s29 = scalar_lea.vmem %s1526_s2, %s1021_s25  ;;  %s242_s7 = scalar_lea.vmem %s1527_s3, %s1023_s26  ;;  %v1314_v21 = vshrl.u32 %v286_v20, 7  ;;  %v1320_v23 = vld [vmem:[%s1525_s1] sm:$0xf] }
   0xe   : > { %1066 = vmatpush3.bf16.msra.mxu0 %v1260_v1  ;;  %v263_v3 = vld [vmem:[%s236_s29 + $0x10] sm:$0xff]  ;;  %v261_v4 = vld [vmem:[%s236_s29] sm:$0xff]  ;;  %v256_v7 = vld [vmem:[%s242_s7 + $0xc] sm:$0xf]  ;;  %s248_s21 = scalar_lea.vmem %s1529_s5, %s1021_s25 }
   0xf   : > { %1067 = vmatprep.subr.bf16.mxu0 %v1267_v2  ;;  %278 = vperm.xlu1 %1129, %v263_v3   ;;  %v253_v6 = vld [vmem:[%s242_s7] sm:$0xf]  ;;  %v264_v8 = vld [vmem:[%s236_s29 + $0x18] sm:$0xff]  ;;  %v262_v9 = vld [vmem:[%s236_s29 + $0x8] sm:$0xff]  ;;  %vm260_vm1 = vcmp.gt.bf16.partialorder %v256_v7, 0  ;;  %v288_v22 = vsub.s32 0, %v1314_v21 }
  0x10   : > { %268 = vperm.xlu0 %1128, %v261_v4   ;;  %vm257_vm0 = vcmp.gt.bf16.partialorder %v253_v6, 0  ;;  %v254_v10 = vld [vmem:[%s242_s7 + $0x4] sm:$0xf]  ;;  %v255_v12 = vld [vmem:[%s242_s7 + $0x8] sm:$0xf]  ;;  %v1288_v13 = vsel %vm260_vm1, 65537, %v1212_v0 }
  0x11   : > { %v1286_v11 = vsel %vm257_vm0, 65537, %v1212_v0  ;;  %vm258_vm2 = vcmp.gt.bf16.partialorder %v254_v10, 0  ;;  %vm259_vm3 = vcmp.gt.bf16.partialorder %v255_v12, 0  ;;  %v289_v24 = vrot.slane %v1320_v23, %v288_v22 }
  0x12   : > { %1068 = vmatpush3.bf16.msra.mxu0 %v1267_v2  ;;  %v1290_v14 = vsel %vm258_vm2, 65537, %v1212_v0  ;;  %v1297_v16 = vsel %vm259_vm3, 65537, %v1212_v0  ;;  %v310_v25 = vunpack.c.l.b16 %v1286_v11  ;;  %v474_v30 = vsub.s32 1, %v1314_v21 }
  0x13   : > { %1069 = vmatprep.subr.bf16.mxu0 %v1138_v5  ;;  %283 = vperm.xlu1 %1129, %v264_v8   ;;  %v313_v31 = vunpack.c.l.b16 %v1288_v13  ;;  %v311_v32 = vunpack.c.l.b16 %v1290_v14  ;;  %v312_v38 = vunpack.c.l.b16 %v1297_v16  ;;  %v627_v62 = vsub.s32 2, %v1314_v21 }
  0x14   : > { %273 = vperm.xlu0 %1128, %v262_v9   ;;  %vm1327_vm5 = vcmp.ne.s32.totalorder %v310_v25, 0  ;;  %v475_v43 = vrot.slane %v1320_v23, %v474_v30  ;;  %v780_v14 = vsub.s32 3, %v1314_v21 }
  0x15   : > { %vm1337_vm8 = vcmp.ne.s32.totalorder %v313_v31, 0  ;;  %vm1341_vm9 = vcmp.ne.s32.totalorder %v311_v32, 0  ;;  %vm1347_vm12 = vcmp.ne.s32.totalorder %v312_v38, 0 }
  0x16   : > { %1070 = vmatpush3.bf16.msra.mxu0 %v1138_v5 }
  0x17   : > { %1071 = vmatprep.subr.bf16.mxu0 %v1295_v15  ;;  %1131 = vset.pattern.permute.xlu1 %v1213_v17 }
  0x18   : > { %1130 = vset.pattern.permute.xlu0 %v1213_v17  ;;  %461 = vperm.xlu1 %1131, %v262_v9  }
  0x19   : > { %457 = vperm.xlu0 %1130, %v261_v4  }
  0x1a   : > { %1072 = vmatpush3.bf16.msra.mxu0 %v1295_v15 }
  0x1c   : > { %465 = vperm.xlu1 %1131, %v263_v3  }
  0x1d   : > { %469 = vperm.xlu0 %1130, %v264_v8  }
  0x20   : > { %1132 = vset.pattern.permute.xlu1 %v1214_v18 }
  0x21   : > { %1133 = vset.pattern.permute.xlu0 %v1214_v18  ;;  %610 = vperm.xlu1 %1132, %v261_v4  }
  0x22   : > { %614 = vperm.xlu0 %1133, %v262_v9  }
  0x25   : > { %618 = vperm.xlu1 %1132, %v263_v3  }
  0x26   : > { %1134 = vset.pattern.permute.xlu0 %v1215_v19 }
  0x27   : > { %763 = vperm.xlu0 %1134, %v261_v4  }
  0x29   : > { %622 = vperm.xlu1 %1132, %v264_v8  }
  0x2b   : > { %775 = vperm.xlu0 %1134, %v264_v8  }
  0x2d   : > { %1135 = vset.pattern.permute.xlu1 %v1215_v19 }
  0x2e   : > { %767 = vperm.xlu1 %1135, %v262_v9   ;;  %v628_v9 = vrot.slane %v1320_v23, %v627_v62 }
  0x2f   : > { %540 = vrot.lane.b32.xlu0 %v1260_v1, %s1216_s12 }
  0x32   : > { %771 = vperm.xlu1 %1135, %v263_v3  }
  0x33   : > { %536 = vrot.lane.b32.xlu0 %v1138_v5, %s1216_s12 }
  0x36   : > { %538 = vrot.lane.b32.xlu1 %v1267_v2, %s1216_s12 }
  0x37   : > { %534 = vrot.lane.b32.xlu0 %v1295_v15, %s1216_s12 }
  0x3a   : > { %693 = vrot.lane.b32.xlu1 %v1260_v1, %s1217_s13 }
  0x3b   : > { %846 = vrot.lane.b32.xlu0 %v1260_v1, %s1218_s14 }
  0x3e   : > { %691 = vrot.lane.b32.xlu1 %v1267_v2, %s1217_s13 }
  0x3f   : > { %844 = vrot.lane.b32.xlu0 %v1267_v2, %s1218_s14 }
  0x42   : > { %689 = vrot.lane.b32.xlu1 %v1138_v5, %s1217_s13 }
  0x43   : > { %842 = vrot.lane.b32.xlu0 %v1138_v5, %s1218_s14 }
  0x8a   : > { %v279_v26 = vpop.permute.xlu1 %278 }
  0x8b   : > { %v269_v27 = vpop.permute.xlu0 %268  ;;  %v292_v28 = vadd.f32 %v289_v24, %v279_v26 }
  0x8c   : > { %v290_v29 = vadd.f32 %v289_v24, %v269_v27  ;;  %v781_v27 = vrot.slane %v1320_v23, %v780_v14 }
  0x8d   : > { %v300_v35 = vmul.f32 0.2, %v292_v28  ;;  %vm296_vm7 = vcmp.gt.f32.partialorder %v292_v28, 0.0 }
  0x8e   : > { %v298_v33 = vmul.f32 0.2, %v290_v29  ;;  %vm294_vm4 = vcmp.gt.f32.partialorder %v290_v29, 0.0  ;;  %v284_v36 = vpop.permute.xlu1 %283 }
  0x8f   : > { %v274_v37 = vpop.permute.xlu0 %273  ;;  %v293_v39 = vadd.f32 %v289_v24, %v284_v36  ;;  %v304_v49 = vsel %vm296_vm7, %v292_v28, %v300_v35 }
  0x90   : > { %v291_v40 = vadd.f32 %v289_v24, %v274_v37  ;;  %v302_v41 = vsel %vm294_vm4, %v290_v29, %v298_v33  ;;  %v1365_v61 = vsel %vm1347_vm12, %v304_v49, -1e+30 }
  0x91   : > { %v1334_v42 = vsel %vm1327_vm5, %v302_v41, -1e+30  ;;  %v301_v46 = vmul.f32 0.2, %v293_v39  ;;  %vm297_vm10 = vcmp.gt.f32.partialorder %v293_v39, 0.0  ;;  %v329_v7 = vsel %vm322_vm6, %v1365_v61, -inf }
  0x92   : > { %v299_v47 = vmul.f32 0.2, %v291_v40  ;;  %v323_v48 = vsel %vm322_vm6, %v1334_v42, -inf  ;;  %vm295_vm11 = vcmp.gt.f32.partialorder %v291_v40, 0.0 }
  0x93   : > { %324 = vmax.xlane.f32.xlu1 %v323_v48  ;;  %v462_v51 = vpop.permute.xlu1 %461  ;;  %v305_v53 = vsel %vm297_vm10, %v293_v39, %v301_v46 }
  0x94   : > { %v458_v52 = vpop.permute.xlu0 %457  ;;  %v303_v54 = vsel %vm295_vm11, %v291_v40, %v299_v47  ;;  %v477_v55 = vadd.f32 %v475_v43, %v462_v51  ;;  %v1353_v57 = vsel %vm1337_vm8, %v305_v53, -1e+30 }
  0x95   : > { %v476_v56 = vadd.f32 %v475_v43, %v458_v52  ;;  %v1357_v58 = vsel %vm1341_vm9, %v303_v54, -1e+30  ;;  %v332_v59 = vsel %vm322_vm6, %v1353_v57, -inf }
  0x96   : > { %v326_v60 = vsel %vm322_vm6, %v1357_v58, -inf  ;;  %v485_v63 = vmul.f32 0.2, %v477_v55  ;;  %vm481_vm13 = vcmp.gt.f32.partialorder %v477_v55, 0.0 }
  0x97   : > { %v484_v0 = vmul.f32 0.2, %v476_v56  ;;  %333 = vmax.xlane.f32.xlu1 %v332_v59  ;;  %327 = vmax.xlane.f32.xlu0 %v326_v60  ;;  %vm480_vm14 = vcmp.gt.f32.partialorder %v476_v56, 0.0  ;;  %v466_v1 = vpop.permute.xlu1 %465 }
  0x98   : > { %v470_v2 = vpop.permute.xlu0 %469  ;;  %v478_v3 = vadd.f32 %v475_v43, %v466_v1  ;;  %v489_v5 = vsel %vm481_vm13, %v477_v55, %v485_v63 }
  0x99   : > { %v479_v4 = vadd.f32 %v475_v43, %v470_v2  ;;  %v488_v6 = vsel %vm480_vm14, %v476_v56, %v484_v0  ;;  %v1372_v8 = vsel %vm1341_vm9, %v489_v5, -1e+30 }
  0x9a   : > { %v1377_v10 = vsel %vm1327_vm5, %v488_v6, -1e+30  ;;  %v486_v11 = vmul.f32 0.2, %v478_v3  ;;  %v499_v13 = vsel %vm322_vm6, %v1372_v8, -inf  ;;  %vm482_vm0 = vcmp.gt.f32.partialorder %v478_v3, 0.0 }
  0x9b   : > { %v487_v12 = vmul.f32 0.2, %v479_v4  ;;  %330 = vmax.xlane.f32.xlu0 %v329_v7  ;;  %500 = vmax.xlane.f32.xlu1 %v499_v13  ;;  %v496_v16 = vsel %vm322_vm6, %v1377_v10, -inf  ;;  %vm483_vm15 = vcmp.gt.f32.partialorder %v479_v4, 0.0 }
  0x9c   : > { %v611_v17 = vpop.permute.xlu1 %610  ;;  %v490_v20 = vsel %vm482_vm0, %v478_v3, %v486_v11 }
  0x9d   : > { %v615_v18 = vpop.permute.xlu0 %614  ;;  %v491_v19 = vsel %vm483_vm15, %v479_v4, %v487_v12  ;;  %v629_v22 = vadd.f32 %v628_v9, %v611_v17  ;;  %v1392_v26 = vsel %vm1347_vm12, %v490_v20, -1e+30 }
  0x9e   : > { %v630_v24 = vadd.f32 %v628_v9, %v615_v18  ;;  %v1386_v25 = vsel %vm1337_vm8, %v491_v19, -1e+30  ;;  %v502_v32 = vsel %vm322_vm6, %v1392_v26, -inf }
  0x9f   : > { %497 = vmax.xlane.f32.xlu0 %v496_v16  ;;  %v505_v21 = vsel %vm322_vm6, %v1386_v25, -inf  ;;  %v637_v28 = vmul.f32 0.2, %v629_v22  ;;  %vm633_vm2 = vcmp.gt.f32.partialorder %v629_v22, 0.0 }
  0xa0   : > { %v638_v29 = vmul.f32 0.2, %v630_v24  ;;  %506 = vmax.xlane.f32.xlu1 %v505_v21  ;;  %vm634_vm1 = vcmp.gt.f32.partialorder %v630_v24, 0.0  ;;  %v619_v30 = vpop.permute.xlu1 %618 }
  0xa1   : > { %v631_v31 = vadd.f32 %v628_v9, %v619_v30  ;;  %v641_v35 = vsel %vm633_vm2, %v629_v22, %v637_v28 }
  0xa2   : > { %v642_v33 = vsel %vm634_vm1, %v630_v24, %v638_v29  ;;  %v764_v36 = vpop.permute.xlu0 %763  ;;  %v1403_v23 = vsel %vm1327_vm5, %v641_v35, -1e+30 }
  0xa3   : > { %503 = vmax.xlane.f32.xlu0 %v502_v32  ;;  %v1399_v37 = vsel %vm1341_vm9, %v642_v33, -1e+30  ;;  %v782_v38 = vadd.f32 %v781_v27, %v764_v36  ;;  %v639_v39 = vmul.f32 0.2, %v631_v31  ;;  %vm635_vm3 = vcmp.gt.f32.partialorder %v631_v31, 0.0 }
  0xa4   : > { %v652_v40 = vsel %vm322_vm6, %v1399_v37, -inf  ;;  %v623_v41 = vpop.permute.xlu1 %622  ;;  %v649_v47 = vsel %vm322_vm6, %v1403_v23, -inf }
  0xa5   : > { %653 = vmax.xlane.f32.xlu1 %v652_v40  ;;  %v790_v43 = vmul.f32 0.2, %v782_v38  ;;  %vm786_vm4 = vcmp.gt.f32.partialorder %v782_v38, 0.0  ;;  %v632_v46 = vadd.f32 %v628_v9, %v623_v41  ;;  %v643_v48 = vsel %vm635_vm3, %v631_v31, %v639_v39 }
  0xa6   : > { %v776_v49 = vpop.permute.xlu0 %775  ;;  %v1411_v51 = vsel %vm1347_vm12, %v643_v48, -1e+30 }
  0xa7   : > { %650 = vmax.xlane.f32.xlu0 %v649_v47  ;;  %v794_v52 = vsel %vm786_vm4, %v782_v38, %v790_v43  ;;  %v640_v53 = vmul.f32 0.2, %v632_v46  ;;  %vm636_vm7 = vcmp.gt.f32.partialorder %v632_v46, 0.0  ;;  %v655_v56 = vsel %vm322_vm6, %v1411_v51, -inf }
  0xa8   : > { %v1415_v54 = vsel %vm1327_vm5, %v794_v52, -1e+30  ;;  %v785_v63 = vadd.f32 %v781_v27, %v776_v49 }
  0xa9   : > { %v768_v55 = vpop.permute.xlu1 %767  ;;  %v644_v59 = vsel %vm636_vm7, %v632_v46, %v640_v53  ;;  %v802_v34 = vsel %vm322_vm6, %v1415_v54, -inf }
  0xaa   : > { %v541_v60 = vpop.permute.xlu0 %540  ;;  %v783_v62 = vadd.f32 %v781_v27, %v768_v55  ;;  %v1421_v0 = vsel %vm1337_vm8, %v644_v59, -1e+30  ;;  %v793_v5 = vmul.f32 0.2, %v785_v63  ;;  %vm789_vm10 = vcmp.gt.f32.partialorder %v785_v63, 0.0 }
  0xab   : > { %656 = vmax.xlane.f32.xlu0 %v655_v56  ;;  %1077 = vmatprep.subr.bf16.mxu1 %v541_v60  ;;  %v658_v1 = vsel %vm322_vm6, %v1421_v0, -inf }
  0xac   : > { %1078 = vmatpush3.bf16.msra.mxu1 %v541_v60  ;;  %v791_v2 = vmul.f32 0.2, %v783_v62  ;;  %659 = vmax.xlane.f32.xlu1 %v658_v1  ;;  %vm787_vm5 = vcmp.gt.f32.partialorder %v783_v62, 0.0  ;;  %v797_v16 = vsel %vm789_vm10, %v785_v63, %v793_v5 }
  0xad   : > { %v772_v3 = vpop.permute.xlu1 %771  ;;  %v1441_v19 = vsel %vm1337_vm8, %v797_v16, -1e+30 }
  0xae   : > { %v537_v4 = vpop.permute.xlu0 %536  ;;  %v784_v6 = vadd.f32 %v781_v27, %v772_v3  ;;  %v795_v7 = vsel %vm787_vm5, %v783_v62, %v791_v2  ;;  %v811_v50 = vsel %vm322_vm6, %v1441_v19, -inf }
  0xaf   : > { %803 = vmax.xlane.f32.xlu0 %v802_v34  ;;  %v1429_v9 = vsel %vm1341_vm9, %v795_v7, -1e+30 }
  0xb0   : > { %v792_v11 = vmul.f32 0.2, %v784_v6  ;;  %v805_v12 = vsel %vm322_vm6, %v1429_v9, -inf  ;;  %vm788_vm11 = vcmp.gt.f32.partialorder %v784_v6, 0.0 }
  0xb1   : > { %806 = vmax.xlane.f32.xlu1 %v805_v12  ;;  %v539_v13 = vpop.permute.xlu1 %538 }
  0xb2   : > { %v796_v14 = vsel %vm788_vm11, %v784_v6, %v792_v11  ;;  %1079 = vmatprep.subr.bf16.mxu1 %v539_v13  ;;  %v535_v18 = vpop.permute.xlu0 %534 }
  0xb3   : > { %v1435_v17 = vsel %vm1347_vm12, %v796_v14, -1e+30  ;;  %1080 = vmatpush3.bf16.msra.mxu1 %v539_v13 }
  0xb4   : > { %v808_v45 = vsel %vm322_vm6, %v1435_v17, -inf  ;;  %1081 = vmatprep.subr.bf16.mxu1 %v537_v4 }
  0xb5   : > { %809 = vmax.xlane.f32.xlu1 %v808_v45  ;;  %v1443_v20 = vpop.permute.xlu1 %693 }
  0xb6   : > { %1089 = vmatprep.subr.bf16.mxu0 %v1443_v20  ;;  %v1448_v22 = vpop.permute.xlu0 %846 }
  0xb7   : > { %1082 = vmatpush3.bf16.msra.mxu1 %v537_v4 }
  0xb8   : > { %1083 = vmatprep.subr.bf16.mxu1 %v535_v18 }
  0xb9   : > { %812 = vmax.xlane.f32.xlu1 %v811_v50  ;;  %v1455_v44 = vpop.permute.xlu1 %691 }
  0xba   : > { %v1457_v24 = vpop.permute.xlu0 %844 }
  0xbb   : > { %1084 = vmatpush3.bf16.msra.mxu1 %v535_v18 }
  0xbc   : > { %1101 = vmatprep.subr.bf16.mxu1 %v1448_v22 }
  0xbd   : > { %v1459_v21 = vpop.permute.xlu1 %689 }
  0xbe   : > { %v1461_v27 = vpop.permute.xlu0 %842 }
  0xc5   : > { %840 = vrot.lane.b32.xlu0 %v1295_v15, %s1218_s14 }
  0xca   : > { %687 = vrot.lane.b32.xlu1 %v1295_v15, %s1217_s13 }
 0x11c   : > { %v325_v28 = vpop.xlane.xlu1 %324 }
 0x11d   : > { %v335_v29 = vsub.f32 %v1334_v42, %v325_v28 }
 0x11f   : > { %v339_v30 = vmul.f32 1.442695, %v335_v29 }
 0x120   : > { %v334_v31 = vpop.xlane.xlu1 %333  ;;  %v328_v32 = vpop.xlane.xlu0 %327 }
 0x121   : > { %1140 = vpow2.f32 %v339_v30  ;;  %v338_v33 = vsub.f32 %v1353_v57, %v334_v31  ;;  %v336_v35 = vsub.f32 %v1357_v58, %v328_v32 }
 0x123   : > { %v341_v15 = vmul.f32 1.442695, %v336_v35  ;;  %v345_v36 = vmul.f32 1.442695, %v338_v33 }
 0x124   : > { %v331_v38 = vpop.xlane.xlu0 %330  ;;  %v501_v40 = vpop.xlane.xlu1 %500 }
 0x125   : > { %v337_v39 = vsub.f32 %v1365_v61, %v331_v38  ;;  %1142 = vpow2.f32 %v341_v15  ;;  %v509_v41 = vsub.f32 %v1372_v8, %v501_v40 }
 0x126   : > { %1144 = vpow2.f32 %v345_v36 }
 0x127   : > { %v343_v43 = vmul.f32 1.442695, %v337_v39  ;;  %v514_v42 = vmul.f32 1.442695, %v509_v41 }
 0x128   : > { %v498_v46 = vpop.xlane.xlu0 %497 }
 0x129   : > { %1146 = vpow2.f32 %v343_v43  ;;  %v508_v47 = vsub.f32 %v1377_v10, %v498_v46  ;;  %v507_v48 = vpop.xlane.xlu1 %506 }
 0x12a   : > { %1148 = vpow2.f32 %v514_v42  ;;  %v511_v57 = vsub.f32 %v1386_v25, %v507_v48 }
 0x12b   : > { %v512_v58 = vmul.f32 1.442695, %v508_v47 }
 0x12c   : > { %v518_v49 = vmul.f32 1.442695, %v511_v57  ;;  %v504_v52 = vpop.xlane.xlu0 %503 }
 0x12d   : > { %1150 = vpow2.f32 %v512_v58  ;;  %v510_v61 = vsub.f32 %v1392_v26, %v504_v52 }
 0x12e   : > { %v1141_v53 = vpop.eup %1140  ;;  %v654_v55 = vpop.xlane.xlu1 %653  ;;  %1152 = vpow2.f32 %v518_v49 }
 0x12f   : > { %v516_v8 = vmul.f32 1.442695, %v510_v61  ;;  %v662_v56 = vsub.f32 %v1399_v37, %v654_v55  ;;  %v347_v59 = vsel %vm322_vm6, %v1141_v53, 0.0 }
 0x130   : > { %348 = vadd.xlane.f32.xlu1 %v347_v59  ;;  %v651_v10 = vpop.xlane.xlu0 %650 }
 0x131   : > { %1154 = vpow2.f32 %v516_v8  ;;  %v667_v60 = vmul.f32 1.442695, %v662_v56  ;;  %v661_v25 = vsub.f32 %v1403_v23, %v651_v10 }
 0x132   : > { %v1143_v62 = vpop.eup %1142 }
 0x133   : > { %v665_v63 = vmul.f32 1.442695, %v661_v25  ;;  %1156 = vpow2.f32 %v667_v60  ;;  %v367_v34 = vpack.c.bf16 %v1143_v62, %v1141_v53  ;;  %v1145_v26 = vpop.eup %1144  ;;  %v350_v29 = vsel %vm322_vm6, %v1143_v62, 0.0 }
 0x134   : > { %v657_v1 = vpop.xlane.xlu0 %656  ;;  %v356_v36 = vsel %vm322_vm6, %v1145_v26, 0.0 }
 0x135   : > { %1158 = vpow2.f32 %v665_v63  ;;  %v663_v2 = vsub.f32 %v1411_v51, %v657_v1  ;;  %1073 = vmatprep.mubr.msk.bf16.mxu0 %vm322_vm6, %v367_v34  ;;  %v660_v37 = vpop.xlane.xlu1 %659 }
 0x136   : > { %v1147_v3 = vpop.eup %1146  ;;  %v664_v6 = vsub.f32 %v1421_v0, %v660_v37 }
 0x137   : > { %v1149_v4 = vpop.eup %1148  ;;  %v669_v5 = vmul.f32 1.442695, %v663_v2  ;;  %v368_v7 = vpack.c.bf16 %v1145_v26, %v1147_v3  ;;  %v353_v15 = vsel %vm322_vm6, %v1147_v3, 0.0 }
 0x138   : > { %v804_v11 = vpop.xlane.xlu0 %803  ;;  %v523_v23 = vsel %vm322_vm6, %v1149_v4, 0.0  ;;  %v671_v12 = vmul.f32 1.442695, %v664_v6 }
 0x139   : > { %v814_v13 = vsub.f32 %v1415_v54, %v804_v11  ;;  %524 = vadd.xlane.f32.xlu1 %v523_v23  ;;  %1074 = vmatmul.mubr.msk.bf16.vlgmr.msra.gmra.mxu0 %vm322_vm6, %v368_v7  ;;  %1160 = vpow2.f32 %v669_v5 }
 0x13a   : > { %v1151_v14 = vpop.eup %1150  ;;  %1090 = vmatpush3.bf16.msra.mxu0 %v1443_v20  ;;  %1162 = vpow2.f32 %v671_v12  ;;  %v807_v16 = vpop.xlane.xlu1 %806 }
 0x13b   : > { %v818_v51 = vmul.f32 1.442695, %v814_v13  ;;  %1091 = vmatprep.subr.bf16.mxu0 %v1455_v44  ;;  %v520_v0 = vsel %vm322_vm6, %v1151_v14, 0.0  ;;  %v532_v18 = vpack.c.bf16 %v1149_v4, %v1151_v14  ;;  %v815_v45 = vsub.f32 %v1429_v9, %v807_v16  ;;  %v1153_v50 = vpop.eup %1152 }
 0x13c   : > { %521 = vadd.xlane.f32.xlu0 %v520_v0  ;;  %v841_v43 = vpop.permute.xlu0 %840  ;;  %v529_v47 = vsel %vm322_vm6, %v1153_v50, 0.0 }
 0x13d   : > { %1164 = vpow2.f32 %v818_v51  ;;  %1085 = vmatprep.mubr.msk.bf16.mxu1 %vm322_vm6, %v532_v18  ;;  %v820_v28 = vmul.f32 1.442695, %v815_v45 }
 0x13e   : > { %v1155_v54 = vpop.eup %1154  ;;  %1092 = vmatpush3.bf16.msra.mxu0 %v1455_v44  ;;  %v810_v20 = vpop.xlane.xlu1 %809 }
 0x13f   : > { %1093 = vmatprep.subr.bf16.mxu0 %v1459_v21  ;;  %v526_v30 = vsel %vm322_vm6, %v1155_v54, 0.0  ;;  %v533_v31 = vpack.c.bf16 %v1153_v50, %v1155_v54  ;;  %1166 = vpow2.f32 %v820_v28  ;;  %v816_v9 = vsub.f32 %v1435_v17, %v810_v20 }
 0x140   : > { %351 = vadd.xlane.f32.xlu0 %v350_v29  ;;  %527 = vadd.xlane.f32.xlu1 %v526_v30  ;;  %v1157_v32 = vpop.eup %1156 }
 0x141   : > { %1086 = vmatmul.mubr.msk.bf16.vlgmr.msra.gmra.mxu1 %vm322_vm6, %v533_v31  ;;  %v822_v44 = vmul.f32 1.442695, %v816_v9  ;;  %v676_v40 = vsel %vm322_vm6, %v1157_v32, 0.0 }
 0x142   : > { %v1159_v33 = vpop.eup %1158  ;;  %1094 = vmatpush3.bf16.msra.mxu0 %v1459_v21  ;;  %1102 = vmatpush3.bf16.msra.mxu1 %v1448_v22  ;;  %v813_v35 = vpop.xlane.xlu1 %812 }
 0x143   : > { %1103 = vmatprep.subr.bf16.mxu1 %v1457_v24  ;;  %v685_v38 = vpack.c.bf16 %v1157_v32, %v1159_v33  ;;  %v817_v17 = vsub.f32 %v1441_v19, %v813_v35  ;;  %1168 = vpow2.f32 %v822_v44  ;;  %v673_v19 = vsel %vm322_vm6, %v1159_v33, 0.0 }
 0x144   : > { %354 = vadd.xlane.f32.xlu0 %v353_v15  ;;  %357 = vadd.xlane.f32.xlu1 %v356_v36 }
 0x145   : > { %1097 = vmatprep.mubr.msk.bf16.mxu0 %vm322_vm6, %v685_v38  ;;  %v824_v39 = vmul.f32 1.442695, %v817_v17 }
 0x146   : > { %1104 = vmatpush3.bf16.msra.mxu1 %v1457_v24  ;;  %v1161_v21 = vpop.eup %1160  ;;  %v688_v22 = vpop.permute.xlu1 %687 }
 0x147   : > { %1105 = vmatprep.subr.bf16.mxu1 %v1461_v27  ;;  %v1163_v41 = vpop.eup %1162  ;;  %1170 = vpow2.f32 %v824_v39  ;;  %1095 = vmatprep.subr.bf16.mxu0 %v688_v22  ;;  %v679_v49 = vsel %vm322_vm6, %v1161_v21, 0.0 }
 0x148   : > { %677 = vadd.xlane.f32.xlu1 %v676_v40  ;;  %674 = vadd.xlane.f32.xlu0 %v673_v19  ;;  %v686_v42 = vpack.c.bf16 %v1163_v41, %v1161_v21  ;;  %v682_v52 = vsel %vm322_vm6, %v1163_v41, 0.0 }
 0x149   : > { %1096 = vmatpush3.bf16.msra.mxu0 %v688_v22 }
 0x14a   : > { %v1165_v46 = vpop.eup %1164  ;;  %1106 = vmatpush3.bf16.msra.mxu1 %v1461_v27 }
 0x14b   : > { %v826_v24 = vsel %vm322_vm6, %v1165_v46, 0.0  ;;  %1107 = vmatprep.subr.bf16.mxu1 %v841_v43 }
 0x14c   : > { %1098 = vmatmul.mubr.msk.bf16.vlgmr.msra.gmra.mxu0 %vm322_vm6, %v686_v42  ;;  %827 = vadd.xlane.f32.xlu1 %v826_v24  ;;  %v1167_v48 = vpop.eup %1166 }
 0x14d   : > { %530 = vadd.xlane.f32.xlu0 %v529_v47  ;;  %v838_v57 = vpack.c.bf16 %v1167_v48, %v1165_v46  ;;  %v829_v58 = vsel %vm322_vm6, %v1167_v48, 0.0 }
 0x14e   : > { %1108 = vmatpush3.bf16.msra.mxu1 %v841_v43 }
 0x14f   : > { %1109 = vmatprep.mubr.msk.bf16.mxu1 %vm322_vm6, %v838_v57 }
 0x150   : > { %830 = vadd.xlane.f32.xlu1 %v829_v58  ;;  %v1169_v27 = vpop.eup %1168 }
 0x151   : > { %680 = vadd.xlane.f32.xlu0 %v679_v49  ;;  %v832_v8 = vsel %vm322_vm6, %v1169_v27, 0.0 }
 0x154   : > { %v1171_v61 = vpop.eup %1170 }
 0x155   : > { %683 = vadd.xlane.f32.xlu0 %v682_v52  ;;  %v835_v53 = vsel %vm322_vm6, %v1171_v61, 0.0  ;;  %v839_v55 = vpack.c.bf16 %v1171_v61, %v1169_v27 }
 0x156   : > { %836 = vadd.xlane.f32.xlu1 %v835_v53 }
 0x157   : > { %1110 = vmatmul.mubr.msk.bf16.vlgmr.msra.gmra.mxu1 %vm322_vm6, %v839_v55  ;;  %vm942_vm6 = vcmask 64512  }
 0x159   : > { %833 = vadd.xlane.f32.xlu0 %v832_v8 }
 0x1b9   : > { %v349_v10 = vpop.xlane.xlu1 %348 }
 0x1ba   : > { %1172 = vrcp.f32 %v349_v10 }
 0x1c2   : > { %v525_v25 = vpop.xlane.xlu1 %524 }
 0x1c3   : > { %1174 = vrcp.f32 %v525_v25 }
 0x1c5   : > { %v522_v56 = vpop.xlane.xlu0 %521 }
 0x1c6   : > { %1176 = vrcp.f32 %v522_v56 }
 0x1c7   : > { %v1173_v51 = vpop.eup %1172 }
 0x1c9   : > { %v352_v59 = vpop.xlane.xlu0 %351  ;;  %v528_v62 = vpop.xlane.xlu1 %527 }
 0x1ca   : > { %1178 = vrcp.f32 %v528_v62 }
 0x1cb   : > { %1180 = vrcp.f32 %v352_v59 }
 0x1cd   : > { %v355_v60 = vpop.xlane.xlu0 %354  ;;  %v358_v1 = vpop.xlane.xlu1 %357 }
 0x1ce   : > { %1182 = vrcp.f32 %v358_v1 }
 0x1cf   : > { %1184 = vrcp.f32 %v355_v60 }
 0x1d0   : > { %v1175_v16 = vpop.eup %1174 }
 0x1d1   : > { %v675_v63 = vpop.xlane.xlu0 %674  ;;  %v678_v26 = vpop.xlane.xlu1 %677 }
 0x1d2   : > { %1186 = vrcp.f32 %v678_v26 }
 0x1d3   : > { %1188 = vrcp.f32 %v675_v63  ;;  %v1177_v18 = vpop.eup %1176 }
 0x1d5   : > { %v828_v37 = vpop.xlane.xlu1 %827 }
 0x1d6   : > { %v531_v34 = vpop.xlane.xlu0 %530 }
 0x1d7   : > { %1190 = vrcp.f32 %v531_v34  ;;  %v1179_v45 = vpop.eup %1178 }
 0x1d8   : > { %v1181_v54 = vpop.eup %1180 }
 0x1d9   : > { %v831_v7 = vpop.xlane.xlu1 %830 }
 0x1da   : > { %v681_v2 = vpop.xlane.xlu0 %680 }
 0x1db   : > { %1192 = vrcp.f32 %v681_v2  ;;  %v1183_v28 = vpop.eup %1182 }
 0x1dc   : > { %v1185_v29 = vpop.eup %1184 }
 0x1de   : > { %v684_v5 = vpop.xlane.xlu0 %683 }
 0x1df   : > { %1194 = vrcp.f32 %v684_v5  ;;  %v837_v13 = vpop.xlane.xlu1 %836  ;;  %v1187_v30 = vpop.eup %1186 }
 0x1e0   : > { %v1189_v9 = vpop.eup %1188 }
 0x1e2   : > { %v834_v11 = vpop.xlane.xlu0 %833 }
 0x1e3   : > { %1196 = vrcp.f32 %v834_v11 }
 0x1e4   : > { %1198 = vrcp.f32 %v828_v37  ;;  %v1191_v33 = vpop.eup %1190  ;;  %v1038_v37 = vld [vmem:[%s1528_s4] ss:$0 sm:$0xff] }
 0x1e5   : > { %1200 = vrcp.f32 %v837_v13 }
 0x1e6   : > { %1202 = vrcp.f32 %v831_v7 }
 0x1e8   : > { %v1193_v15 = vpop.eup %1192 }
 0x1ec   : > { %v1195_v39 = vpop.eup %1194 }
 0x1f0   : > { %v1197_v19 = vpop.eup %1196 }
 0x1f1   : > { %v1199_v47 = vpop.eup %1198 }
 0x1f2   : > { %v1201_v55 = vpop.eup %1200 }
 0x1f3   : > { %v1203_v62 = vpop.eup %1202 }
 0x1f9   : > { %v1075_v3 = vpop.f32.mrf.mxu0 }
 0x1fa   : > { %v454_v21 = vmul.f32 %v1185_v29, %v1075_v3 }
 0x1fb   : > { %v433_v4 = vpop.f32.mrf.mxu0 }
 0x1fc   : > { %v452_v36 = vmul.f32 %v1173_v51, %v433_v4 }
 0x1fd   : > { %v1076_v6 = vpop.f32.mrf.mxu0 }
 0x1fe   : > { %v455_v43 = vmul.f32 %v1183_v28, %v1076_v6 }
 0x1ff   : > { %v436_v23 = vpop.f32.mrf.mxu0 }
 0x200   : > { %v453_v48 = vmul.f32 %v1181_v54, %v436_v23 }
 0x201   : > { %v1087_v12 = vpop.f32.mrf.mxu1 }
 0x202   : > { %v607_v44 = vmul.f32 %v1179_v45, %v1087_v12 }
 0x203   : > { %v586_v0 = vpop.f32.mrf.mxu1 }
 0x204   : > { %v605_v32 = vmul.f32 %v1177_v18, %v586_v0  ;;  %v918_v57 = vadd.f32 %v607_v44, %v454_v21 }
 0x205   : > { %v1088_v20 = vpop.f32.mrf.mxu1 }
 0x206   : > { %v608_v38 = vmul.f32 %v1191_v33, %v1088_v20  ;;  %v916_v42 = vadd.f32 %v605_v32, %v452_v36 }
 0x207   : > { %v589_v35 = vpop.f32.mrf.mxu1 }
 0x208   : > { %v606_v46 = vmul.f32 %v1175_v16, %v589_v35  ;;  %v919_v27 = vadd.f32 %v608_v38, %v455_v43 }
 0x20a   : > { %v917_v59 = vadd.f32 %v606_v46, %v453_v48 }
 0x20c   : > { %v1099_v14 = vpop.f32.mrf.mxu0 }
 0x20d   : > { %v760_v22 = vmul.f32 %v1193_v15, %v1099_v14 }
 0x20e   : > { %v739_v50 = vpop.f32.mrf.mxu0 }
 0x20f   : > { %v758_v17 = vmul.f32 %v1189_v9, %v739_v50  ;;  %v922_v8 = vadd.f32 %v918_v57, %v760_v22 }
 0x210   : > { %v1100_v31 = vpop.f32.mrf.mxu0 }
 0x211   : > { %v761_v24 = vmul.f32 %v1195_v39, %v1100_v31  ;;  %v920_v52 = vadd.f32 %v916_v42, %v758_v17 }
 0x212   : > { %v742_v40 = vpop.f32.mrf.mxu0 }
 0x213   : > { %v759_v61 = vmul.f32 %v1187_v30, %v742_v40  ;;  %v923_v10 = vadd.f32 %v919_v27, %v761_v24 }
 0x215   : > { %v921_v34 = vadd.f32 %v917_v59, %v759_v61 }
 0x217   : > { %v1111_v41 = vpop.f32.mrf.mxu1 }
 0x218   : > { %v913_v58 = vmul.f32 %v1197_v19, %v1111_v41 }
 0x219   : > { %v892_v49 = vpop.f32.mrf.mxu1 }
 0x21a   : > { %v911_v53 = vmul.f32 %v1199_v47, %v892_v49  ;;  %v926_v63 = vadd.f32 %v922_v8, %v913_v58 }
 0x21b   : > { %v1112_v56 = vpop.f32.mrf.mxu1 }
 0x21c   : > { %v924_v60 = vadd.f32 %v920_v52, %v911_v53  ;;  %v914_v25 = vmul.f32 %v1201_v55, %v1112_v56  ;;  %v930_v6 = vmul.f32 0.25, %v926_v63 }
 0x21d   : > { %v895_v1 = vpop.f32.mrf.mxu1 }
 0x21e   : > { %v928_v26 = vmul.f32 0.25, %v924_v60  ;;  %v927_v2 = vadd.f32 %v923_v10, %v914_v25  ;;  %v912_v3 = vmul.f32 %v1203_v62, %v895_v1  ;;  %v940_v12 = vadd.f32 %v1038_v37, %v930_v6 }
 0x220   : > { %v938_v4 = vadd.f32 %v1038_v37, %v928_v26  ;;  %v925_v5 = vadd.f32 %v921_v34, %v912_v3  ;;  %v931_v7 = vmul.f32 0.25, %v927_v2  ;;  %945 = vst.msk [vmem:[%s248_s21 + $0x10] sm:$0xff] %vm942_vm6, %v940_v12 }
 0x222   : > { %943 = vst.msk [vmem:[%s248_s21] sm:$0xff] %vm942_vm6, %v938_v4  ;;  %v929_v11 = vmul.f32 0.25, %v925_v5  ;;  %v941_v13 = vadd.f32 %v1038_v37, %v931_v7 }
 0x224   : > { %v939_v23 = vadd.f32 %v1038_v37, %v929_v11  ;;  %946 = vst.msk [vmem:[%s248_s21 + $0x18] sm:$0xff] %vm942_vm6, %v941_v13 }
 0x226   : > { %944 = vst.msk [vmem:[%s248_s21 + $0x8] sm:$0xff] %vm942_vm6, %v939_v23 }
 0x227 PF: > { %s15_s18 = sadd.s32 1, %s1210_s18  }
 0x228   : > { %p12_p4 = scmp.ge.s32.totalorder %s15_s18, 4  }
 0x22a   :  { %14 = sbr.rel (!%p12_p4) target bundleno = 1 (0x1), region = 73 }

// kernel: gat_forward.17
= control target key start
LH: loop header
LB: loop body
LE: loop exit
PB: predicated region body
PF: predicated region fallthrough
CT: control target
= control target key end

     0   :  { %s1382_s21 = smov 0   ;;  %s1707_s0 = inlined_call_operand.vmem [shape: bf16[64,32], index: 0, kind: input, shape index: {}]   ;;  %s1708_s1 = inlined_call_operand.vmem [shape: f32[4,64], index: 1, kind: input, shape index: {}]   ;;  %s1709_s2 = inlined_call_operand.vmem [shape: f32[64,4], index: 2, kind: input, shape index: {}]   ;;  %s1710_s3 = inlined_call_operand.vmem [shape: bf16[64,64], index: 3, kind: input, shape index: {}]   ;;  %s1711_s4 = inlined_call_operand.vmem [shape: f32[1,32], index: 4, kind: input, shape index: {}]   ;;  %s1712_s5 = inlined_call_operand.vmem [shape: f32[64,32], index: 5, kind: input, shape index: {}]   ;;  %s1713_s6 = inlined_call_operand.vmem [shape: f32[64,32], index: 6, kind: output, shape index: {}]  }
   0x1 LB: > { %s1135_s22 = sadd.s32 4294967295, %s1335_s21   ;;  %p1139_p0 = scmp.ge.s32.totalorder %s1335_s21, 1  ;;  %s1335_s21 = sphi %s1382_s21, %s16_s21  }
   0x2   : > { %p235_p1 = scmp.lt.s32.totalorder %s1335_s21, 3 }
   0x4   : > { %p236_p2 = pnand %p1139_p0, %p235_p1 }
   0x5   : > { %s1140_s23 = sshll.u32 (!%p236_p2), %s1135_s22, 2  ;;  %s1341_s16 = smov (!%p236_p2), 120  }
   0x6   : > { %239 = sbr.rel (%p236_p2) target bundleno = 671 (0x29f), region = 44  ;;  %p276_p3 = scmp.lt.s32.totalorder (!%p236_p2), %s1140_s23, 7 }
   0x7   : > { %s1342_s17 = smov (!%p236_p2), 112   ;;  %s1343_s18 = smov (!%p236_p2), 104  }
   0x8   : > { %s1344_s22 = smov (!%p236_p2), 8   ;;  %s1346_s24 = smov (!%p236_p2), 24  }
   0xb   : > { %v1337_v0 = vmov 0   ;;  %v1393_v1 = vld [vmem:[%s1707_s0 + $0x18] sm:$0xff]   ;;  %s1723_s23 = smov (!%p276_p3, %s1140_s23), 7  ;;  %v1398_v2 = vld [vmem:[%s1707_s0 + $0x10] sm:$0xff]   ;;  %v1263_v5 = vld [vmem:[%s1707_s0 + $0x8] sm:$0xff]   ;;  %v1338_v17 = vmov 1   ;;  %v335_v20 = vlaneseq }
   0xc   : > { %1254 = vset.pattern.permute.xlu1 %v1337_v0  ;;  %1253 = vset.pattern.permute.xlu0 %v1337_v0  ;;  %s1401_s28 = sshll.u32 %s1723_s23, 3  ;;  %s1143_s29 = sshll.u32 %s1723_s23, 2  ;;  %v1425_v15 = vld [vmem:[%s1707_s0] sm:$0xff]   ;;  %v1339_v18 = vmov 2   ;;  %v1340_v19 = vmov 3   ;;  %vm371_vm6 = vcmask 523264  }
   0xd   : > { %1187 = vmatprep.subr.bf16.mxu0 %v1393_v1  ;;  %s279_s8 = scalar_lea.vmem %s1709_s2, %s1401_s28  ;;  %s285_s11 = scalar_lea.vmem %s1710_s3, %s1143_s29  ;;  %v1444_v21 = vshrl.u32 %v335_v20, 7  ;;  %v1450_v23 = vld [vmem:[%s1708_s1] sm:$0xf] }
   0xe   : > { %1188 = vmatpush3.bf16.msra.mxu0 %v1393_v1  ;;  %v312_v3 = vld [vmem:[%s279_s8 + $0x10] sm:$0xff]  ;;  %v310_v4 = vld [vmem:[%s279_s8] sm:$0xff]  ;;  %v305_v7 = vld [vmem:[%s285_s11 + $0xc] sm:$0xf]  ;;  %s1345_s23 = smov 16   ;;  %s1677_s30 = scalar_lea.vmem %s1712_s5, %s1401_s28 }
   0xf   : > { %1189 = vmatprep.subr.bf16.mxu0 %v1398_v2  ;;  %327 = vperm.xlu1 %1254, %v312_v3   ;;  %v302_v6 = vld [vmem:[%s285_s11] sm:$0xf]  ;;  %v313_v8 = vld [vmem:[%s279_s8 + $0x18] sm:$0xff]  ;;  %v311_v9 = vld [vmem:[%s279_s8 + $0x8] sm:$0xff]  ;;  %vm309_vm1 = vcmp.gt.bf16.partialorder %v305_v7, 0  ;;  %v337_v22 = vsub.s32 0, %v1444_v21  ;;  %s297_s9 = scalar_lea.vmem %s1713_s6, %s1401_s28 }
  0x10   : > { %317 = vperm.xlu0 %1253, %v310_v4   ;;  %vm306_vm0 = vcmp.gt.bf16.partialorder %v302_v6, 0  ;;  %v303_v10 = vld [vmem:[%s285_s11 + $0x4] sm:$0xf]  ;;  %v304_v12 = vld [vmem:[%s285_s11 + $0x8] sm:$0xf]  ;;  %v1418_v13 = vsel %vm309_vm1, 65537, %v1337_v0 }
  0x11   : > { %v1416_v11 = vsel %vm306_vm0, 65537, %v1337_v0  ;;  %vm307_vm2 = vcmp.gt.bf16.partialorder %v303_v10, 0  ;;  %vm308_vm3 = vcmp.gt.bf16.partialorder %v304_v12, 0  ;;  %v338_v24 = vrot.slane %v1450_v23, %v337_v22 }
  0x12   : > { %1190 = vmatpush3.bf16.msra.mxu0 %v1398_v2  ;;  %v1420_v14 = vsel %vm307_vm2, 65537, %v1337_v0  ;;  %v1427_v16 = vsel %vm308_vm3, 65537, %v1337_v0  ;;  %v359_v25 = vunpack.c.l.b16 %v1416_v11  ;;  %v523_v30 = vsub.s32 1, %v1444_v21 }
  0x13   : > { %1191 = vmatprep.subr.bf16.mxu0 %v1263_v5  ;;  %332 = vperm.xlu1 %1254, %v313_v8   ;;  %v362_v31 = vunpack.c.l.b16 %v1418_v13  ;;  %v360_v32 = vunpack.c.l.b16 %v1420_v14  ;;  %v361_v38 = vunpack.c.l.b16 %v1427_v16  ;;  %v676_v62 = vsub.s32 2, %v1444_v21 }
  0x14   : > { %322 = vperm.xlu0 %1253, %v311_v9   ;;  %vm1457_vm5 = vcmp.ne.s32.totalorder %v359_v25, 0  ;;  %v524_v43 = vrot.slane %v1450_v23, %v523_v30  ;;  %v829_v14 = vsub.s32 3, %v1444_v21 }
  0x15   : > { %vm1467_vm8 = vcmp.ne.s32.totalorder %v362_v31, 0  ;;  %vm1471_vm9 = vcmp.ne.s32.totalorder %v360_v32, 0  ;;  %vm1477_vm12 = vcmp.ne.s32.totalorder %v361_v38, 0 }
  0x16   : > { %1192 = vmatpush3.bf16.msra.mxu0 %v1263_v5 }
  0x17   : > { %1193 = vmatprep.subr.bf16.mxu0 %v1425_v15  ;;  %1256 = vset.pattern.permute.xlu1 %v1338_v17 }
  0x18   : > { %1255 = vset.pattern.permute.xlu0 %v1338_v17  ;;  %510 = vperm.xlu1 %1256, %v311_v9  }
  0x19   : > { %506 = vperm.xlu0 %1255, %v310_v4  }
  0x1a   : > { %1194 = vmatpush3.bf16.msra.mxu0 %v1425_v15 }
  0x1c   : > { %514 = vperm.xlu1 %1256, %v312_v3  }
  0x1d   : > { %518 = vperm.xlu0 %1255, %v313_v8  }
  0x20   : > { %1257 = vset.pattern.permute.xlu1 %v1339_v18 }
  0x21   : > { %1258 = vset.pattern.permute.xlu0 %v1339_v18  ;;  %659 = vperm.xlu1 %1257, %v310_v4  }
  0x22   : > { %663 = vperm.xlu0 %1258, %v311_v9  }
  0x25   : > { %667 = vperm.xlu1 %1257, %v312_v3  }
  0x26   : > { %1259 = vset.pattern.permute.xlu0 %v1340_v19 }
  0x27   : > { %812 = vperm.xlu0 %1259, %v310_v4  }
  0x29   : > { %671 = vperm.xlu1 %1257, %v313_v8  }
  0x2b   : > { %824 = vperm.xlu0 %1259, %v313_v8  }
  0x2d   : > { %1260 = vset.pattern.permute.xlu1 %v1340_v19 }
  0x2e   : > { %816 = vperm.xlu1 %1260, %v311_v9   ;;  %v677_v9 = vrot.slane %v1450_v23, %v676_v62 }
  0x2f   : > { %589 = vrot.lane.b32.xlu0 %v1393_v1, %s1341_s16 }
  0x32   : > { %820 = vperm.xlu1 %1260, %v312_v3  }
  0x33   : > { %585 = vrot.lane.b32.xlu0 %v1263_v5, %s1341_s16 }
  0x36   : > { %587 = vrot.lane.b32.xlu1 %v1398_v2, %s1341_s16 }
  0x37   : > { %583 = vrot.lane.b32.xlu0 %v1425_v15, %s1341_s16 }
  0x3a   : > { %742 = vrot.lane.b32.xlu1 %v1393_v1, %s1342_s17 }
  0x3b   : > { %895 = vrot.lane.b32.xlu0 %v1393_v1, %s1343_s18 }
  0x3e   : > { %740 = vrot.lane.b32.xlu1 %v1398_v2, %s1342_s17 }
  0x3f   : > { %893 = vrot.lane.b32.xlu0 %v1398_v2, %s1343_s18 }
  0x42   : > { %738 = vrot.lane.b32.xlu1 %v1263_v5, %s1342_s17 }
  0x43   : > { %891 = vrot.lane.b32.xlu0 %v1263_v5, %s1343_s18 }
  0x8a   : > { %v328_v26 = vpop.permute.xlu1 %327 }
  0x8b   : > { %v318_v27 = vpop.permute.xlu0 %317  ;;  %v341_v28 = vadd.f32 %v338_v24, %v328_v26 }
  0x8c   : > { %v339_v29 = vadd.f32 %v338_v24, %v318_v27  ;;  %v830_v27 = vrot.slane %v1450_v23, %v829_v14 }
  0x8d   : > { %v349_v35 = vmul.f32 0.2, %v341_v28  ;;  %vm345_vm7 = vcmp.gt.f32.partialorder %v341_v28, 0.0 }
  0x8e   : > { %v347_v33 = vmul.f32 0.2, %v339_v29  ;;  %vm343_vm4 = vcmp.gt.f32.partialorder %v339_v29, 0.0  ;;  %v333_v36 = vpop.permute.xlu1 %332 }
  0x8f   : > { %v323_v37 = vpop.permute.xlu0 %322  ;;  %v342_v39 = vadd.f32 %v338_v24, %v333_v36  ;;  %v353_v49 = vsel %vm345_vm7, %v341_v28, %v349_v35 }
  0x90   : > { %v340_v40 = vadd.f32 %v338_v24, %v323_v37  ;;  %v351_v41 = vsel %vm343_vm4, %v339_v29, %v347_v33  ;;  %v1495_v61 = vsel %vm1477_vm12, %v353_v49, -1e+30 }
  0x91   : > { %v1464_v42 = vsel %vm1457_vm5, %v351_v41, -1e+30  ;;  %v350_v46 = vmul.f32 0.2, %v342_v39  ;;  %vm346_vm10 = vcmp.gt.f32.partialorder %v342_v39, 0.0  ;;  %v378_v7 = vsel %vm371_vm6, %v1495_v61, -inf }
  0x92   : > { %v348_v47 = vmul.f32 0.2, %v340_v40  ;;  %v372_v48 = vsel %vm371_vm6, %v1464_v42, -inf  ;;  %vm344_vm11 = vcmp.gt.f32.partialorder %v340_v40, 0.0 }
  0x93   : > { %373 = vmax.xlane.f32.xlu1 %v372_v48  ;;  %v511_v51 = vpop.permute.xlu1 %510  ;;  %v354_v53 = vsel %vm346_vm10, %v342_v39, %v350_v46 }
  0x94   : > { %v507_v52 = vpop.permute.xlu0 %506  ;;  %v352_v54 = vsel %vm344_vm11, %v340_v40, %v348_v47  ;;  %v526_v55 = vadd.f32 %v524_v43, %v511_v51  ;;  %v1483_v57 = vsel %vm1467_vm8, %v354_v53, -1e+30 }
  0x95   : > { %v525_v56 = vadd.f32 %v524_v43, %v507_v52  ;;  %v1487_v58 = vsel %vm1471_vm9, %v352_v54, -1e+30  ;;  %v381_v59 = vsel %vm371_vm6, %v1483_v57, -inf }
  0x96   : > { %v375_v60 = vsel %vm371_vm6, %v1487_v58, -inf  ;;  %v534_v63 = vmul.f32 0.2, %v526_v55  ;;  %vm530_vm13 = vcmp.gt.f32.partialorder %v526_v55, 0.0 }
  0x97   : > { %v533_v0 = vmul.f32 0.2, %v525_v56  ;;  %382 = vmax.xlane.f32.xlu1 %v381_v59  ;;  %376 = vmax.xlane.f32.xlu0 %v375_v60  ;;  %vm529_vm14 = vcmp.gt.f32.partialorder %v525_v56, 0.0  ;;  %v515_v1 = vpop.permute.xlu1 %514 }
  0x98   : > { %v519_v2 = vpop.permute.xlu0 %518  ;;  %v527_v3 = vadd.f32 %v524_v43, %v515_v1  ;;  %v538_v5 = vsel %vm530_vm13, %v526_v55, %v534_v63 }
  0x99   : > { %v528_v4 = vadd.f32 %v524_v43, %v519_v2  ;;  %v537_v6 = vsel %vm529_vm14, %v525_v56, %v533_v0  ;;  %v1502_v8 = vsel %vm1471_vm9, %v538_v5, -1e+30 }
  0x9a   : > { %v1507_v10 = vsel %vm1457_vm5, %v537_v6, -1e+30  ;;  %v535_v11 = vmul.f32 0.2, %v527_v3  ;;  %v548_v13 = vsel %vm371_vm6, %v1502_v8, -inf  ;;  %vm531_vm0 = vcmp.gt.f32.partialorder %v527_v3, 0.0 }
  0x9b   : > { %v536_v12 = vmul.f32 0.2, %v528_v4  ;;  %379 = vmax.xlane.f32.xlu0 %v378_v7  ;;  %549 = vmax.xlane.f32.xlu1 %v548_v13  ;;  %v545_v16 = vsel %vm371_vm6, %v1507_v10, -inf  ;;  %vm532_vm15 = vcmp.gt.f32.partialorder %v528_v4, 0.0 }
  0x9c   : > { %v660_v17 = vpop.permute.xlu1 %659  ;;  %v539_v20 = vsel %vm531_vm0, %v527_v3, %v535_v11 }
  0x9d   : > { %v664_v18 = vpop.permute.xlu0 %663  ;;  %v540_v19 = vsel %vm532_vm15, %v528_v4, %v536_v12  ;;  %v678_v22 = vadd.f32 %v677_v9, %v660_v17  ;;  %v1522_v26 = vsel %vm1477_vm12, %v539_v20, -1e+30 }
  0x9e   : > { %v679_v24 = vadd.f32 %v677_v9, %v664_v18  ;;  %v1516_v25 = vsel %vm1467_vm8, %v540_v19, -1e+30  ;;  %v551_v32 = vsel %vm371_vm6, %v1522_v26, -inf }
  0x9f   : > { %546 = vmax.xlane.f32.xlu0 %v545_v16  ;;  %v554_v21 = vsel %vm371_vm6, %v1516_v25, -inf  ;;  %v686_v28 = vmul.f32 0.2, %v678_v22  ;;  %vm682_vm2 = vcmp.gt.f32.partialorder %v678_v22, 0.0 }
  0xa0   : > { %v687_v29 = vmul.f32 0.2, %v679_v24  ;;  %555 = vmax.xlane.f32.xlu1 %v554_v21  ;;  %vm683_vm1 = vcmp.gt.f32.partialorder %v679_v24, 0.0  ;;  %v668_v30 = vpop.permute.xlu1 %667 }
  0xa1   : > { %v680_v31 = vadd.f32 %v677_v9, %v668_v30  ;;  %v690_v35 = vsel %vm682_vm2, %v678_v22, %v686_v28 }
  0xa2   : > { %v691_v33 = vsel %vm683_vm1, %v679_v24, %v687_v29  ;;  %v813_v36 = vpop.permute.xlu0 %812  ;;  %v1533_v23 = vsel %vm1457_vm5, %v690_v35, -1e+30 }
  0xa3   : > { %552 = vmax.xlane.f32.xlu0 %v551_v32  ;;  %v1529_v37 = vsel %vm1471_vm9, %v691_v33, -1e+30  ;;  %v831_v38 = vadd.f32 %v830_v27, %v813_v36  ;;  %v688_v39 = vmul.f32 0.2, %v680_v31  ;;  %vm684_vm3 = vcmp.gt.f32.partialorder %v680_v31, 0.0 }
  0xa4   : > { %v701_v40 = vsel %vm371_vm6, %v1529_v37, -inf  ;;  %v672_v41 = vpop.permute.xlu1 %671  ;;  %v698_v47 = vsel %vm371_vm6, %v1533_v23, -inf }
  0xa5   : > { %702 = vmax.xlane.f32.xlu1 %v701_v40  ;;  %v839_v43 = vmul.f32 0.2, %v831_v38  ;;  %vm835_vm4 = vcmp.gt.f32.partialorder %v831_v38, 0.0  ;;  %v681_v46 = vadd.f32 %v677_v9, %v672_v41  ;;  %v692_v48 = vsel %vm684_vm3, %v680_v31, %v688_v39 }
  0xa6   : > { %v825_v49 = vpop.permute.xlu0 %824  ;;  %v1541_v51 = vsel %vm1477_vm12, %v692_v48, -1e+30 }
  0xa7   : > { %699 = vmax.xlane.f32.xlu0 %v698_v47  ;;  %v843_v52 = vsel %vm835_vm4, %v831_v38, %v839_v43  ;;  %v689_v53 = vmul.f32 0.2, %v681_v46  ;;  %vm685_vm7 = vcmp.gt.f32.partialorder %v681_v46, 0.0  ;;  %v704_v56 = vsel %vm371_vm6, %v1541_v51, -inf }
  0xa8   : > { %v1545_v54 = vsel %vm1457_vm5, %v843_v52, -1e+30  ;;  %v834_v63 = vadd.f32 %v830_v27, %v825_v49 }
  0xa9   : > { %v817_v55 = vpop.permute.xlu1 %816  ;;  %v693_v59 = vsel %vm685_vm7, %v681_v46, %v689_v53  ;;  %v851_v34 = vsel %vm371_vm6, %v1545_v54, -inf }
  0xaa   : > { %v590_v60 = vpop.permute.xlu0 %589  ;;  %v832_v62 = vadd.f32 %v830_v27, %v817_v55  ;;  %v1551_v0 = vsel %vm1467_vm8, %v693_v59, -1e+30  ;;  %v842_v5 = vmul.f32 0.2, %v834_v63  ;;  %vm838_vm10 = vcmp.gt.f32.partialorder %v834_v63, 0.0 }
  0xab   : > { %705 = vmax.xlane.f32.xlu0 %v704_v56  ;;  %1199 = vmatprep.subr.bf16.mxu1 %v590_v60  ;;  %v707_v1 = vsel %vm371_vm6, %v1551_v0, -inf }
  0xac   : > { %1200 = vmatpush3.bf16.msra.mxu1 %v590_v60  ;;  %v840_v2 = vmul.f32 0.2, %v832_v62  ;;  %708 = vmax.xlane.f32.xlu1 %v707_v1  ;;  %vm836_vm5 = vcmp.gt.f32.partialorder %v832_v62, 0.0  ;;  %v846_v16 = vsel %vm838_vm10, %v834_v63, %v842_v5 }
  0xad   : > { %v821_v3 = vpop.permute.xlu1 %820  ;;  %v1571_v19 = vsel %vm1467_vm8, %v846_v16, -1e+30  ;;  %vm1023_vm8 = vcmask 195584  }
  0xae   : > { %v586_v4 = vpop.permute.xlu0 %585  ;;  %v833_v6 = vadd.f32 %v830_v27, %v821_v3  ;;  %v844_v7 = vsel %vm836_vm5, %v832_v62, %v840_v2  ;;  %v860_v50 = vsel %vm371_vm6, %v1571_v19, -inf }
  0xaf   : > { %852 = vmax.xlane.f32.xlu0 %v851_v34  ;;  %v1559_v9 = vsel %vm1471_vm9, %v844_v7, -1e+30  ;;  %vm1018_vm9 = vcmask 130048  }
  0xb0   : > { %v841_v11 = vmul.f32 0.2, %v833_v6  ;;  %v854_v12 = vsel %vm371_vm6, %v1559_v9, -inf  ;;  %vm837_vm11 = vcmp.gt.f32.partialorder %v833_v6, 0.0 }
  0xb1   : > { %855 = vmax.xlane.f32.xlu1 %v854_v12  ;;  %v588_v13 = vpop.permute.xlu1 %587 }
  0xb2   : > { %v845_v14 = vsel %vm837_vm11, %v833_v6, %v841_v11  ;;  %1201 = vmatprep.subr.bf16.mxu1 %v588_v13  ;;  %v584_v18 = vpop.permute.xlu0 %583 }
  0xb3   : > { %v1565_v17 = vsel %vm1477_vm12, %v845_v14, -1e+30  ;;  %1202 = vmatpush3.bf16.msra.mxu1 %v588_v13  ;;  %vm1050_vm12 = vcmask 261120  }
  0xb4   : > { %v857_v45 = vsel %vm371_vm6, %v1565_v17, -inf  ;;  %1203 = vmatprep.subr.bf16.mxu1 %v586_v4 }
  0xb5   : > { %858 = vmax.xlane.f32.xlu1 %v857_v45  ;;  %v1573_v20 = vpop.permute.xlu1 %742 }
  0xb6   : > { %1211 = vmatprep.subr.bf16.mxu0 %v1573_v20  ;;  %v1578_v22 = vpop.permute.xlu0 %895 }
  0xb7   : > { %1204 = vmatpush3.bf16.msra.mxu1 %v586_v4 }
  0xb8   : > { %1205 = vmatprep.subr.bf16.mxu1 %v584_v18 }
  0xb9   : > { %861 = vmax.xlane.f32.xlu1 %v860_v50  ;;  %v1585_v44 = vpop.permute.xlu1 %740 }
  0xba   : > { %v1587_v24 = vpop.permute.xlu0 %893 }
  0xbb   : > { %1206 = vmatpush3.bf16.msra.mxu1 %v584_v18 }
  0xbc   : > { %1223 = vmatprep.subr.bf16.mxu1 %v1578_v22 }
  0xbd   : > { %v1589_v21 = vpop.permute.xlu1 %738 }
  0xbe   : > { %v1591_v27 = vpop.permute.xlu0 %891 }
  0xc5   : > { %889 = vrot.lane.b32.xlu0 %v1425_v15, %s1343_s18 }
  0xca   : > { %736 = vrot.lane.b32.xlu1 %v1425_v15, %s1342_s17 }
 0x11c   : > { %v374_v28 = vpop.xlane.xlu1 %373 }
 0x11d   : > { %v384_v29 = vsub.f32 %v1464_v42, %v374_v28 }
 0x11f   : > { %v388_v32 = vmul.f32 1.442695, %v384_v29 }
 0x120   : > { %v383_v30 = vpop.xlane.xlu1 %382  ;;  %v377_v31 = vpop.xlane.xlu0 %376 }
 0x121   : > { %v387_v33 = vsub.f32 %v1483_v57, %v383_v30  ;;  %v385_v35 = vsub.f32 %v1487_v58, %v377_v31  ;;  %1265 = vpow2.f32 %v388_v32 }
 0x123   : > { %v390_v36 = vmul.f32 1.442695, %v385_v35  ;;  %v394_v15 = vmul.f32 1.442695, %v387_v33 }
 0x124   : > { %v380_v38 = vpop.xlane.xlu0 %379  ;;  %v550_v40 = vpop.xlane.xlu1 %549 }
 0x125   : > { %v386_v39 = vsub.f32 %v1495_v61, %v380_v38  ;;  %1267 = vpow2.f32 %v390_v36  ;;  %v558_v41 = vsub.f32 %v1502_v8, %v550_v40 }
 0x126   : > { %1269 = vpow2.f32 %v394_v15 }
 0x127   : > { %v392_v43 = vmul.f32 1.442695, %v386_v39  ;;  %v563_v42 = vmul.f32 1.442695, %v558_v41 }
 0x128   : > { %v547_v46 = vpop.xlane.xlu0 %546 }
 0x129   : > { %1271 = vpow2.f32 %v392_v43  ;;  %v557_v47 = vsub.f32 %v1507_v10, %v547_v46  ;;  %v556_v57 = vpop.xlane.xlu1 %555 }
 0x12a   : > { %1273 = vpow2.f32 %v563_v42  ;;  %v560_v58 = vsub.f32 %v1516_v25, %v556_v57 }
 0x12b   : > { %v561_v48 = vmul.f32 1.442695, %v557_v47 }
 0x12c   : > { %v567_v49 = vmul.f32 1.442695, %v560_v58  ;;  %v553_v52 = vpop.xlane.xlu0 %552 }
 0x12d   : > { %1275 = vpow2.f32 %v561_v48  ;;  %v559_v61 = vsub.f32 %v1522_v26, %v553_v52 }
 0x12e   : > { %v703_v53 = vpop.xlane.xlu1 %702  ;;  %1277 = vpow2.f32 %v567_v49  ;;  %v1603_v60 = vpop.eup %1265 }
 0x12f   : > { %v565_v55 = vmul.f32 1.442695, %v559_v61  ;;  %v711_v8 = vsub.f32 %v1529_v37, %v703_v53  ;;  %v396_v61 = vsel %vm371_vm6, %v1603_v60, 0.0 }
 0x130   : > { %v700_v56 = vpop.xlane.xlu0 %699 }
 0x131   : > { %1279 = vpow2.f32 %v565_v55  ;;  %v716_v59 = vmul.f32 1.442695, %v711_v8  ;;  %v710_v10 = vsub.f32 %v1533_v23, %v700_v56 }
 0x132   : > { %v1605_v62 = vpop.eup %1267 }
 0x133   : > { %v714_v25 = vmul.f32 1.442695, %v710_v10  ;;  %1281 = vpow2.f32 %v716_v59  ;;  %v416_v26 = vpack.c.bf16 %v1605_v62, %v1603_v60  ;;  %v1609_v1 = vpop.eup %1269  ;;  %v399_v55 = vsel %vm371_vm6, %v1605_v62, 0.0 }
 0x134   : > { %v706_v63 = vpop.xlane.xlu0 %705  ;;  %v405_v8 = vsel %vm371_vm6, %v1609_v1, 0.0 }
 0x135   : > { %1283 = vpow2.f32 %v714_v25  ;;  %v712_v37 = vsub.f32 %v1541_v51, %v706_v63  ;;  %1195 = vmatprep.mubr.msk.bf16.mxu0 %vm371_vm6, %v416_v26  ;;  %v709_v23 = vpop.xlane.xlu1 %708 }
 0x136   : > { %v1612_v34 = vpop.eup %1271  ;;  %v713_v4 = vsub.f32 %v1551_v0, %v709_v23 }
 0x137   : > { %v1274_v2 = vpop.eup %1273  ;;  %v718_v3 = vmul.f32 1.442695, %v712_v37  ;;  %v417_v5 = vpack.c.bf16 %v1609_v1, %v1612_v34  ;;  %v402_v53 = vsel %vm371_vm6, %v1612_v34, 0.0 }
 0x138   : > { %v853_v6 = vpop.xlane.xlu0 %852  ;;  %v572_v7 = vsel %vm371_vm6, %v1274_v2, 0.0  ;;  %v720_v11 = vmul.f32 1.442695, %v713_v4 }
 0x139   : > { %v863_v12 = vsub.f32 %v1545_v54, %v853_v6  ;;  %573 = vadd.xlane.f32.xlu0 %v572_v7  ;;  %1196 = vmatmul.mubr.msk.bf16.vlgmr.msra.gmra.mxu0 %vm371_vm6, %v417_v5  ;;  %1285 = vpow2.f32 %v718_v3 }
 0x13a   : > { %v1276_v51 = vpop.eup %1275  ;;  %1212 = vmatpush3.bf16.msra.mxu0 %v1573_v20  ;;  %1287 = vpow2.f32 %v720_v11  ;;  %v856_v0 = vpop.xlane.xlu1 %855 }
 0x13b   : > { %v867_v13 = vmul.f32 1.442695, %v863_v12  ;;  %1213 = vmatprep.subr.bf16.mxu0 %v1585_v44  ;;  %v569_v14 = vsel %vm371_vm6, %v1276_v51, 0.0  ;;  %v581_v16 = vpack.c.bf16 %v1274_v2, %v1276_v51  ;;  %v864_v18 = vsub.f32 %v1559_v9, %v856_v0  ;;  %v1278_v45 = vpop.eup %1277 }
 0x13c   : > { %570 = vadd.xlane.f32.xlu1 %v569_v14  ;;  %v890_v39 = vpop.permute.xlu0 %889  ;;  %v578_v41 = vsel %vm371_vm6, %v1278_v45, 0.0 }
 0x13d   : > { %1289 = vpow2.f32 %v867_v13  ;;  %1207 = vmatprep.mubr.msk.bf16.mxu1 %vm371_vm6, %v581_v16  ;;  %v869_v50 = vmul.f32 1.442695, %v864_v18 }
 0x13e   : > { %v1280_v54 = vpop.eup %1279  ;;  %1214 = vmatpush3.bf16.msra.mxu0 %v1585_v44  ;;  %v859_v20 = vpop.xlane.xlu1 %858 }
 0x13f   : > { %1215 = vmatprep.subr.bf16.mxu0 %v1589_v21  ;;  %v575_v28 = vsel %vm371_vm6, %v1280_v54, 0.0  ;;  %v582_v29 = vpack.c.bf16 %v1278_v45, %v1280_v54  ;;  %1291 = vpow2.f32 %v869_v50  ;;  %v865_v30 = vsub.f32 %v1565_v17, %v859_v20 }
 0x140   : > { %576 = vadd.xlane.f32.xlu1 %v575_v28  ;;  %v1282_v9 = vpop.eup %1281 }
 0x141   : > { %1208 = vmatmul.mubr.msk.bf16.vlgmr.msra.gmra.mxu1 %vm371_vm6, %v582_v29  ;;  %v871_v32 = vmul.f32 1.442695, %v865_v30 }
 0x142   : > { %v1284_v31 = vpop.eup %1283  ;;  %1216 = vmatpush3.bf16.msra.mxu0 %v1589_v21  ;;  %1224 = vmatpush3.bf16.msra.mxu1 %v1578_v22  ;;  %v862_v44 = vpop.xlane.xlu1 %861  ;;  %v725_v22 = vsel %vm371_vm6, %v1282_v9, 0.0 }
 0x143   : > { %1225 = vmatprep.subr.bf16.mxu1 %v1587_v24  ;;  %v722_v33 = vsel %vm371_vm6, %v1284_v31, 0.0  ;;  %v734_v35 = vpack.c.bf16 %v1282_v9, %v1284_v31  ;;  %1293 = vpow2.f32 %v871_v32  ;;  %v866_v36 = vsub.f32 %v1571_v19, %v862_v44 }
 0x144   : > { %723 = vadd.xlane.f32.xlu0 %v722_v33 }
 0x145   : > { %1219 = vmatprep.mubr.msk.bf16.mxu0 %vm371_vm6, %v734_v35  ;;  %v873_v17 = vmul.f32 1.442695, %v866_v36 }
 0x146   : > { %1226 = vmatpush3.bf16.msra.mxu1 %v1587_v24  ;;  %v1286_v15 = vpop.eup %1285  ;;  %v737_v21 = vpop.permute.xlu1 %736 }
 0x147   : > { %1227 = vmatprep.subr.bf16.mxu1 %v1591_v27  ;;  %v1288_v38 = vpop.eup %1287  ;;  %1295 = vpow2.f32 %v873_v17  ;;  %1217 = vmatprep.subr.bf16.mxu0 %v737_v21  ;;  %v728_v47 = vsel %vm371_vm6, %v1286_v15, 0.0 }
 0x148   : > { %726 = vadd.xlane.f32.xlu0 %v725_v22  ;;  %1218 = vmatpush3.bf16.msra.mxu0 %v737_v21  ;;  %v735_v40 = vpack.c.bf16 %v1288_v38, %v1286_v15  ;;  %v731_v58 = vsel %vm371_vm6, %v1288_v38, 0.0 }
 0x14a   : > { %v1290_v19 = vpop.eup %1289  ;;  %1228 = vmatpush3.bf16.msra.mxu1 %v1591_v27 }
 0x14b   : > { %v875_v24 = vsel %vm371_vm6, %v1290_v19, 0.0  ;;  %1229 = vmatprep.subr.bf16.mxu1 %v890_v39  ;;  %1220 = vmatmul.mubr.msk.bf16.vlgmr.msra.gmra.mxu0 %vm371_vm6, %v735_v40 }
 0x14c   : > { %579 = vadd.xlane.f32.xlu0 %v578_v41  ;;  %v1292_v43 = vpop.eup %1291  ;;  %876 = vadd.xlane.f32.xlu1 %v875_v24 }
 0x14d   : > { %v878_v42 = vsel %vm371_vm6, %v1292_v43, 0.0  ;;  %v887_v46 = vpack.c.bf16 %v1292_v43, %v1290_v19 }
 0x14e   : > { %1230 = vmatpush3.bf16.msra.mxu1 %v890_v39 }
 0x14f   : > { %1231 = vmatprep.mubr.msk.bf16.mxu1 %vm371_vm6, %v887_v46 }
 0x150   : > { %879 = vadd.xlane.f32.xlu0 %v878_v42  ;;  %v1294_v27 = vpop.eup %1293  ;;  %729 = vadd.xlane.f32.xlu1 %v728_v47 }
 0x151   : > { %v881_v57 = vsel %vm371_vm6, %v1294_v27, 0.0 }
 0x154   : > { %882 = vadd.xlane.f32.xlu0 %v881_v57  ;;  %v1296_v48 = vpop.eup %1295  ;;  %732 = vadd.xlane.f32.xlu1 %v731_v58 }
 0x155   : > { %v884_v49 = vsel %vm371_vm6, %v1296_v48, 0.0  ;;  %v888_v52 = vpack.c.bf16 %v1296_v48, %v1294_v27 }
 0x157   : > { %1232 = vmatmul.mubr.msk.bf16.vlgmr.msra.gmra.mxu1 %vm371_vm6, %v888_v52  ;;  %vm1013_vm6 = vcmask 64512  }
 0x158   : > { %397 = vadd.xlane.f32.xlu0 %v396_v61  ;;  %885 = vadd.xlane.f32.xlu1 %v884_v49 }
 0x15c   : > { %403 = vadd.xlane.f32.xlu0 %v402_v53  ;;  %400 = vadd.xlane.f32.xlu1 %v399_v55 }
 0x160   : > { %406 = vadd.xlane.f32.xlu1 %v405_v8 }
 0x1c2   : > { %v574_v56 = vpop.xlane.xlu0 %573 }
 0x1c5   : > { %v571_v10 = vpop.xlane.xlu1 %570 }
 0x1c9   : > { %v577_v25 = vpop.xlane.xlu1 %576 }
 0x1ca   : > { %1297 = vrcp.f32 %v577_v25 }
 0x1cb   : > { %1299 = vrcp.f32 %v571_v10 }
 0x1cd   : > { %v724_v59 = vpop.xlane.xlu0 %723 }
 0x1d1   : > { %v727_v60 = vpop.xlane.xlu0 %726 }
 0x1d5   : > { %v580_v63 = vpop.xlane.xlu0 %579  ;;  %v877_v26 = vpop.xlane.xlu1 %876 }
 0x1d6   : > { %1301 = vrcp.f32 %v580_v63 }
 0x1d7   : > { %1303 = vrcp.f32 %v574_v56  ;;  %v1298_v62 = vpop.eup %1297 }
 0x1d8   : > { %v1300_v4 = vpop.eup %1299 }
 0x1d9   : > { %v730_v37 = vpop.xlane.xlu1 %729  ;;  %v880_v16 = vpop.xlane.xlu0 %879 }
 0x1da   : > { %1305 = vrcp.f32 %v730_v37 }
 0x1db   : > { %1307 = vrcp.f32 %v724_v59  ;;  %v1160_v59 = vld [vmem:[%s1711_s4] ss:$0 sm:$0xff] }
 0x1dc   : > { %1309 = vrcp.f32 %v727_v60 }
 0x1dd   : > { %v733_v45 = vpop.xlane.xlu1 %732  ;;  %1311 = vrcp.f32 %v877_v26  ;;  %v883_v9 = vpop.xlane.xlu0 %882 }
 0x1de   : > { %1313 = vrcp.f32 %v880_v16 }
 0x1df   : > { %1315 = vrcp.f32 %v733_v45  ;;  %v1043_v45 = vld [vmem:[%s1677_s30 + $0x8] sm:$0xff] }
 0x1e0   : > { %1317 = vrcp.f32 %v883_v9 }
 0x1e1   : > { %v886_v32 = vpop.xlane.xlu1 %885  ;;  %v398_v47 = vpop.xlane.xlu0 %397 }
 0x1e2   : > { %1319 = vrcp.f32 %v886_v32  ;;  %v1044_v32 = vld [vmem:[%s1677_s30 + $0x10] sm:$0xff] }
 0x1e3   : > { %v1302_v5 = vpop.eup %1301  ;;  %1321 = vrcp.f32 %v398_v47 }
 0x1e4   : > { %v1304_v13 = vpop.eup %1303 }
 0x1e5   : > { %v401_v46 = vpop.xlane.xlu1 %400  ;;  %v404_v57 = vpop.xlane.xlu0 %403 }
 0x1e6   : > { %1323 = vrcp.f32 %v401_v46 }
 0x1e7   : > { %v1306_v18 = vpop.eup %1305  ;;  %1325 = vrcp.f32 %v404_v57 }
 0x1e8   : > { %v1308_v20 = vpop.eup %1307 }
 0x1e9   : > { %v1310_v31 = vpop.eup %1309  ;;  %v407_v27 = vpop.xlane.xlu1 %406 }
 0x1ea   : > { %v1312_v36 = vpop.eup %1311  ;;  %1327 = vrcp.f32 %v407_v27 }
 0x1eb   : > { %v1314_v22 = vpop.eup %1313 }
 0x1ec   : > { %v1316_v38 = vpop.eup %1315 }
 0x1ed   : > { %v1318_v41 = vpop.eup %1317 }
 0x1ef   : > { %v1320_v24 = vpop.eup %1319 }
 0x1f0   : > { %v1322_v53 = vpop.eup %1321 }
 0x1f3   : > { %v1324_v10 = vpop.eup %1323 }
 0x1f9   : > { %v1659_v34 = vpop.f32.mrf.mxu0 }
 0x1fb   : > { %v1661_v1 = vpop.f32.mrf.mxu0 }
 0x1fc   : > { %v501_v8 = vmul.f32 %v1322_v53, %v1661_v1 }
 0x1fd   : > { %v1663_v7 = vpop.f32.mrf.mxu0 }
 0x1ff   : > { %v1665_v0 = vpop.f32.mrf.mxu0 }
 0x200   : > { %v502_v26 = vmul.f32 %v1324_v10, %v1665_v0 }
 0x201   : > { %v1209_v23 = vpop.f32.mrf.mxu1 }
 0x202   : > { %v656_v2 = vmul.f32 %v1298_v62, %v1209_v23  ;;  %v1326_v23 = vpop.eup %1325 }
 0x203   : > { %v635_v3 = vpop.f32.mrf.mxu1 }
 0x204   : > { %973 = vrot.lane.b32.xlu0 %v656_v2, %s1344_s22  ;;  %v654_v11 = vmul.f32 %v1300_v4, %v635_v3  ;;  %v1042_v2 = vld [vmem:[%s1677_s30] sm:$0xff]  ;;  %v1328_v3 = vpop.eup %1327 }
 0x205   : > { %v1210_v6 = vpop.f32.mrf.mxu1 }
 0x206   : > { %v657_v12 = vmul.f32 %v1302_v5, %v1210_v6 }
 0x207   : > { %v638_v51 = vpop.f32.mrf.mxu1 }
 0x208   : > { %969 = vrot.lane.b32.xlu0 %v654_v11, %s1344_s22  ;;  %975 = vrot.lane.b32.xlu1 %v657_v12, %s1344_s22  ;;  %v655_v14 = vmul.f32 %v1304_v13, %v638_v51  ;;  %v503_v12 = vmul.f32 %v1326_v23, %v1659_v34  ;;  %v504_v51 = vmul.f32 %v1328_v3, %v1663_v7 }
 0x20b   : > { %v1221_v54 = vpop.f32.mrf.mxu0 }
 0x20c   : > { %971 = vrot.lane.b32.xlu1 %v655_v14, %s1344_s22  ;;  %v809_v50 = vmul.f32 %v1306_v18, %v1221_v54 }
 0x20d   : > { %v788_v28 = vpop.f32.mrf.mxu0 }
 0x20e   : > { %v807_v29 = vmul.f32 %v1308_v20, %v788_v28  ;;  %989 = vrot.lane.b32.xlu0 %v809_v50, %s1345_s23 }
 0x20f   : > { %v1222_v30 = vpop.f32.mrf.mxu0 }
 0x210   : > { %985 = vrot.lane.b32.xlu1 %v807_v29, %s1345_s23  ;;  %v810_v40 = vmul.f32 %v1316_v38, %v1222_v30 }
 0x211   : > { %v791_v44 = vpop.f32.mrf.mxu0 }
 0x212   : > { %v808_v33 = vmul.f32 %v1310_v31, %v791_v44  ;;  %v1045_v44 = vld [vmem:[%s1677_s30 + $0x18] sm:$0xff] }
 0x214   : > { %987 = vrot.lane.b32.xlu1 %v808_v33, %s1345_s23 }
 0x217   : > { %v1233_v35 = vpop.f32.mrf.mxu1 }
 0x218   : > { %v962_v43 = vmul.f32 %v1318_v41, %v1233_v35 }
 0x219   : > { %v941_v17 = vpop.f32.mrf.mxu1 }
 0x21a   : > { %v960_v15 = vmul.f32 %v1312_v36, %v941_v17 }
 0x21b   : > { %v1234_v21 = vpop.f32.mrf.mxu1 }
 0x21c   : > { %1001 = vrot.lane.b32.xlu0 %v960_v15, %s1346_s24  ;;  %v963_v42 = vmul.f32 %v1320_v24, %v1234_v21 }
 0x21d   : > { %v944_v39 = vpop.f32.mrf.mxu1 }
 0x21e   : > { %v961_v19 = vmul.f32 %v1314_v22, %v944_v39 }
 0x220   : > { %991 = vrot.lane.b32.xlu0 %v810_v40, %s1345_s23  ;;  %1003 = vrot.lane.b32.xlu1 %v961_v19, %s1346_s24 }
 0x224   : > { %1007 = vrot.lane.b32.xlu0 %v963_v42, %s1346_s24  ;;  %1005 = vrot.lane.b32.xlu1 %v962_v43, %s1346_s24 }
 0x276   : > { %v974_v48 = vpop.permute.xlu0 %973 }
 0x277   : > { %v1016_v16 = vsel %vm1013_vm6, %v503_v12, %v974_v48 }
 0x27a   : > { %v976_v58 = vpop.permute.xlu1 %975  ;;  %v970_v52 = vpop.permute.xlu0 %969 }
 0x27b   : > { %v1014_v56 = vsel %vm1013_vm6, %v501_v8, %v970_v52  ;;  %v1017_v18 = vsel %vm1013_vm6, %v504_v51, %v976_v58 }
 0x27e   : > { %v972_v49 = vpop.permute.xlu1 %971 }
 0x27f   : > { %v1015_v1 = vsel %vm1013_vm6, %v502_v26, %v972_v49 }
 0x280   : > { %v990_v55 = vpop.permute.xlu0 %989 }
 0x281   : > { %v1021_v54 = vsel %vm1018_vm9, %v1016_v16, %v990_v55 }
 0x282   : > { %v986_v61 = vpop.permute.xlu1 %985 }
 0x283   : > { %v1019_v60 = vsel %vm1018_vm9, %v1014_v56, %v986_v61 }
 0x286   : > { %v988_v25 = vpop.permute.xlu1 %987 }
 0x287   : > { %v1020_v4 = vsel %vm1018_vm9, %v1015_v1, %v988_v25 }
 0x28e   : > { %v1002_v63 = vpop.permute.xlu0 %1001 }
 0x28f   : > { %v1024_v37 = vsel %vm1023_vm8, %v1019_v60, %v1002_v63 }
 0x290   : > { %v1034_v62 = vadd.f32 %v1160_v59, %v1024_v37 }
 0x292   : > { %v1038_v5 = vmax.f32 %v1034_v62, 0.0  ;;  %v1004_v6 = vpop.permute.xlu1 %1003  ;;  %v992_v11 = vpop.permute.xlu0 %991 }
 0x293   : > { %v1025_v13 = vsel %vm1023_vm8, %v1020_v4, %v1004_v6  ;;  %v1022_v34 = vsel %vm1018_vm9, %v1017_v18, %v992_v11 }
 0x294   : > { %v1046_v0 = vadd.f32 %v1042_v2, %v1038_v5  ;;  %v1035_v14 = vadd.f32 %v1160_v59, %v1025_v13 }
 0x296   : > { %1051 = vst.msk [vmem:[%s297_s9] sm:$0xff] %vm1050_vm12, %v1046_v0  ;;  %v1039_v50 = vmax.f32 %v1035_v14, 0.0  ;;  %v1006_v7 = vpop.permute.xlu1 %1005  ;;  %v1008_v20 = vpop.permute.xlu0 %1007 }
 0x297   : > { %v1026_v28 = vsel %vm1023_vm8, %v1021_v54, %v1006_v7  ;;  %v1027_v29 = vsel %vm1023_vm8, %v1022_v34, %v1008_v20 }
 0x298   : > { %v1047_v30 = vadd.f32 %v1043_v45, %v1039_v50  ;;  %v1036_v9 = vadd.f32 %v1160_v59, %v1026_v28  ;;  %v1037_v31 = vadd.f32 %v1160_v59, %v1027_v29 }
 0x29a   : > { %1052 = vst.msk [vmem:[%s297_s9 + $0x8] sm:$0xff] %vm1050_vm12, %v1047_v30  ;;  %v1040_v33 = vmax.f32 %v1036_v9, 0.0  ;;  %v1041_v35 = vmax.f32 %v1037_v31, 0.0 }
 0x29c   : > { %v1048_v36 = vadd.f32 %v1044_v32, %v1040_v33  ;;  %v1049_v17 = vadd.f32 %v1045_v44, %v1041_v35 }
 0x29e   : > { %1053 = vst.msk [vmem:[%s297_s9 + $0x10] sm:$0xff] %vm1050_vm12, %v1048_v36  ;;  %1054 = vst.msk [vmem:[%s297_s9 + $0x18] sm:$0xff] %vm1050_vm12, %v1049_v17 }
 0x29f PF: > { %s16_s21 = sadd.s32 1, %s1335_s21  }
 0x2a0   : > { %p13_p4 = scmp.ge.s32.totalorder %s16_s21, 4  }
 0x2a2   :  { %15 = sbr.rel (!%p13_p4) target bundleno = 1 (0x1), region = 80 }

</bundles_post_ra>
